<compile_context>
chip_gen: v7x
topology: tpu7x:2x2x1
jax: 0.10.0
libtpu: 0.0.40
codegen_flags: <defaults>
</compile_context>

<pallas_src>
import functools
import math

import jax
import jax.numpy as jnp
from jax import lax
from jax.experimental import pallas as pl
from jax.experimental.pallas import tpu as pltpu


# ----------------------------- in-kernel helpers ----------------------------

def _layernorm(x, g, b, eps=1e-12):
    mu = jnp.mean(x, axis=-1, keepdims=True)
    xc = x - mu
    var = jnp.mean(xc * xc, axis=-1, keepdims=True)
    return xc * lax.rsqrt(var + eps) * g + b


def _gelu(y):
    # TODO(synk): HF BERT 'gelu' is erf-based; tanh approximation used here.
    return 0.5 * y * (1.0 + jnp.tanh(0.7978845608028654 * (y + 0.044715 * y * y * y)))


# ----------------------------- fused BERT kernel ----------------------------

def _bert_fused_kernel(lens_ref,                          # (B,) int32 SMEM (scalar prefetch)
                       x_ref,                             # (BB, S, H) f32 embedded input block
                       wqkv_ref, wo_ref, w1_ref, w2_ref,  # bf16 weights, all layers resident
                       vec_ref,                           # (L, 8, W)  f32 packed bias/LN vectors
                       misc_ref,                          # (3, Wm)    f32 emb-LN g/b + cls bias
                       clsw_ref,                          # (H, NP)    bf16 classifier weight
                       out_ref,                           # (BB, 1, NP) f32 padded logits
                       *, num_heads, num_layers):
    """Whole encoder + classifier for one batch block (grid axis = batch blocks)."""
    BB, S, H = x_ref.shape
    Dh = H // num_heads
    I = w1_ref.shape[-1]
    NP = clsw_ref.shape[-1]
    M = BB * S

    # ---- additive attention masks: built once per kernel from SMEM lengths ----
    base = pl.program_id(0) * BB
    key_pos = lax.broadcasted_iota(jnp.int32, (S, S), 1)
    masks = []
    for bb in range(BB):
        valid = lens_ref[base + bb]
        masks.append(jnp.where(key_pos < valid, jnp.float32(0.0), jnp.float32(-1e9)))

    # ---- embedding LayerNorm on all BB*S rows at once (no residual) ----
    x = _layernorm(x_ref[...].reshape(M, H), misc_ref[0:1, :H], misc_ref[1:2, :H])

    for l in range(num_layers):
        vec = vec_ref[l]                                   # (8, W) f32, one load per layer

        # ---- fused QKV projection over all M rows (1/sqrt(Dh) folded into Wq/bq) ----
        x_bf = x.astype(jnp.bfloat16)
        qkv = jnp.dot(x_bf, wqkv_ref[l],
                      preferred_element_type=jnp.float32) + vec[0:1, :3 * H]   # (M, 3H) f32
        qkv = qkv.astype(jnp.bfloat16)      # single cast -> every attention matmul is bf16

        # ---- per-(batch, head) attention; contexts concatenated lane-dense ----
        ctx_rows = []
        for bb in range(BB):
            r0 = bb * S
            ctx_heads = []
            for h in range(num_heads):
                q = qkv[r0:r0 + S, h * Dh:(h + 1) * Dh]                        # (S, Dh) bf16
                k = qkv[r0:r0 + S, H + h * Dh:H + (h + 1) * Dh]                # (S, Dh) bf16
                v = qkv[r0:r0 + S, 2 * H + h * Dh:2 * H + (h + 1) * Dh]        # (S, Dh) bf16
                s = lax.dot_general(q, k, (((1,), (1,)), ((), ())),
                                    preferred_element_type=jnp.float32)        # (S, S)
                s = s + masks[bb]
                s = s - jnp.max(s, axis=-1, keepdims=True)
                p = jnp.exp(s)
                p = p * pl.reciprocal(jnp.sum(p, axis=-1, keepdims=True), approx=True)
                ctx_heads.append(jnp.dot(p.astype(jnp.bfloat16), v,
                                         preferred_element_type=jnp.float32))  # (S, Dh)
            ctx_rows.append(jnp.concatenate(ctx_heads, axis=-1))               # (S, H)
        ctx = jnp.concatenate(ctx_rows, axis=0).astype(jnp.bfloat16)           # (M, H) bf16

        # one full-K o-projection (== concat_heads @ Wo) over all rows
        attn = jnp.dot(ctx, wo_ref[l],
                       preferred_element_type=jnp.float32) + vec[1:2, :H]      # (M, H)
        x = _layernorm(attn + x, vec[2:3, :H], vec[3:4, :H])

        # ---- feed-forward on all M rows ----
        x_bf = x.astype(jnp.bfloat16)
        h1 = jnp.dot(x_bf, w1_ref[l],
                     preferred_element_type=jnp.float32) + vec[4:5, :I]        # (M, I)
        h1 = _gelu(h1)
        h2 = jnp.dot(h1.astype(jnp.bfloat16), w2_ref[l],
                     preferred_element_type=jnp.float32) + vec[5:6, :H]        # (M, H)
        x = _layernorm(h2 + x, vec[6:7, :H], vec[7:8, :H])

    # ---- [CLS] pooling + classifier (nn.Dropout(0.3) is identity in eval) ----
    cls = jnp.concatenate([x[bb * S:bb * S + 1, :] for bb in range(BB)], axis=0)  # (BB, H)
    logits = jnp.dot(cls.astype(jnp.bfloat16), clsw_ref[...],
                     preferred_element_type=jnp.float32) + misc_ref[2:3, :NP]     # (BB, NP)
    out_ref[...] = logits.reshape(BB, 1, NP)


# ----------------------------- model (glue + kernel) ------------------------

def _num_batch_blocks(B):
    """v7x has 2 TensorCores -> split batch across them; v5e/v6e: one big block."""
    try:
        kind = jax.devices()[0].device_kind.lower()
    except Exception:
        kind = ""
    if ("v7" in kind or "7x" in kind) and B % 2 == 0:
        return 2
    return 1


def meeting_analysis_forward(params, input_ids, attention_mask, cfg):
    B, S = input_ids.shape
    H, NH = cfg["hidden"], cfg["heads"]
    L, I = cfg["layers"], cfg["intermediate"]
    C = cfg["n_classes"]
    Dh = H // NH
    NP = max(128, -(-C // 128) * 128)          # lane-padded classifier width
    W = max(3 * H, I, 128)                     # packed per-layer vector width
    Wm = max(H, NP)

    # --- embeddings (table gathers stay in XLA glue) ---
    emb = (params["word_emb"][input_ids]
           + params["pos_emb"][jnp.arange(S)][None, :, :]
           + params["type_emb"][0][None, None, :]).astype(jnp.float32)   # (B, S, H)

    # sequence lengths for the in-kernel additive mask (prefix-mask assumption:
    # trailing padding, as produced by the HF tokenizer)
    lens = jnp.sum(attention_mask.astype(jnp.int32), axis=-1)            # (B,) int32

    # --- pack weights for the fused kernel (bf16 MXU operands, f32 bias/LN) ---
    scale = 1.0 / math.sqrt(Dh)
    wqkv = jnp.concatenate([params["wq"] * scale, params["wk"], params["wv"]],
                           axis=-1).astype(jnp.bfloat16)                  # (L, H, 3H)
    wo = params["wo"].astype(jnp.bfloat16)                                # (L, H, H)
    w1 = params["w1"].astype(jnp.bfloat16)                                # (L, H, I)
    w2 = params["w2"].astype(jnp.bfloat16)                                # (L, I, H)
    cls_w = (jnp.zeros((H, NP), jnp.float32)
             .at[:, :C].set(params["cls_w"]).astype(jnp.bfloat16))        # (H, NP)

    # packed per-layer f32 vectors: one BlockSpec instead of 12
    bqkv = jnp.concatenate([params["bq"] * scale, params["bk"], params["bv"]], axis=-1)
    vec = jnp.zeros((L, 8, W), jnp.float32)
    vec = vec.at[:, 0, :3 * H].set(bqkv)
    vec = vec.at[:, 1, :H].set(params["bo"])
    vec = vec.at[:, 2, :H].set(params["ln1_g"])
    vec = vec.at[:, 3, :H].set(params["ln1_b"])
    vec = vec.at[:, 4, :I].set(params["b1"])
    vec = vec.at[:, 5, :H].set(params["b2"])
    vec = vec.at[:, 6, :H].set(params["ln2_g"])
    vec = vec.at[:, 7, :H].set(params["ln2_b"])

    misc = jnp.zeros((3, Wm), jnp.float32)
    misc = misc.at[0, :H].set(params["emb_ln_g"])
    misc = misc.at[1, :H].set(params["emb_ln_b"])
    misc = misc.at[2, :C].set(params["cls_b"])

    nblk = _num_batch_blocks(B)
    BB = B // nblk

    kern = functools.partial(_bert_fused_kernel, num_heads=NH, num_layers=L)
    const3 = lambda b, *_: (0, 0, 0)
    const2 = lambda b, *_: (0, 0)

    out = pl.pallas_call(
        kern,
        out_shape=jax.ShapeDtypeStruct((B, 1, NP), jnp.float32),
        grid_spec=pltpu.PrefetchScalarGridSpec(
            num_scalar_prefetch=1,                          # lens -> SMEM
            grid=(nblk,),
            in_specs=[
                pl.BlockSpec((BB, S, H), lambda b, *_: (b, 0, 0)),   # embedded input
                pl.BlockSpec((L, H, 3 * H), const3),                 # Wqkv (bf16)
                pl.BlockSpec((L, H, H), const3),                     # Wo   (bf16)
                pl.BlockSpec((L, H, I), const3),                     # W1   (bf16)
                pl.BlockSpec((L, I, H), const3),                     # W2   (bf16)
                pl.BlockSpec((L, 8, W), const3),                     # packed bias/LN (f32)
                pl.BlockSpec((3, Wm), const2),                       # emb LN g/b + cls bias
                pl.BlockSpec((H, NP), const2),                       # classifier W (bf16)
            ],
            out_specs=pl.BlockSpec((BB, 1, NP), lambda b, *_: (b, 0, 0)),
        ),
        compiler_params=pltpu.CompilerParams(
            dimension_semantics=("parallel",)),             # v7x: one batch half per TC
    )(lens, emb, wqkv, wo, w1, w2, vec, misc, cls_w)

    return out.reshape(B, NP)[:, :C]


# ----------------------------- deterministic params -------------------------

def init_params(key, cfg):
    H, I, L, C = cfg["hidden"], cfg["intermediate"], cfg["layers"], cfg["n_classes"]

    def nrm(k, shape, std=0.02):
        return (std * jax.random.normal(k, shape)).astype(jnp.float32)

    keys = jax.random.split(key, 10)
    return {
        "word_emb": nrm(keys[0], (cfg["vocab"], H)),
        "pos_emb": nrm(keys[1], (cfg["max_pos"], H)),
        "type_emb": nrm(keys[2], (2, H)),
        "emb_ln_g": jnp.ones((H,), jnp.float32),
        "emb_ln_b": jnp.zeros((H,), jnp.float32),
        "wq": nrm(keys[3], (L, H, H)), "bq": jnp.zeros((L, H), jnp.float32),
        "wk": nrm(keys[4], (L, H, H)), "bk": jnp.zeros((L, H), jnp.float32),
        "wv": nrm(keys[5], (L, H, H)), "bv": jnp.zeros((L, H), jnp.float32),
        "wo": nrm(keys[6], (L, H, H)), "bo": jnp.zeros((L, H), jnp.float32),
        "ln1_g": jnp.ones((L, H), jnp.float32), "ln1_b": jnp.zeros((L, H), jnp.float32),
        "w1": nrm(keys[7], (L, H, I)), "b1": jnp.zeros((L, I), jnp.float32),
        "w2": nrm(keys[8], (L, I, H)), "b2": jnp.zeros((L, H), jnp.float32),
        "ln2_g": jnp.ones((L, H), jnp.float32), "ln2_b": jnp.zeros((L, H), jnp.float32),
        "cls_w": nrm(keys[9], (H, C)), "cls_b": jnp.zeros((C,), jnp.float32),
    }


# ----------------------------- entry point -----------------------------------

if __name__ == "__main__":
    cfg = dict(vocab=100, hidden=128, heads=4, intermediate=512,
               layers=2, max_pos=64, n_classes=3)
    B, S = 2, 16

    key = jax.random.PRNGKey(0)
    pkey, ikey = jax.random.split(key)
    params = init_params(pkey, cfg)

    input_ids = jax.random.randint(ikey, (B, S), 0, cfg["vocab"], dtype=jnp.int32)
    # second example has 4 padding positions at the end (prefix-style HF mask)
    valid_lens = jnp.array([[S], [S - 4]], dtype=jnp.int32)
    attention_mask = (jnp.arange(S)[None, :] < valid_lens).astype(jnp.int32)

    fwd = jax.jit(lambda p, ids, m: meeting_analysis_forward(p, ids, m, cfg))
    logits = fwd(params, input_ids, attention_mask)
    jax.block_until_ready(logits)
    assert logits.shape == (B, cfg["n_classes"])
    print("KERNEL_OK")
</pallas_src>

<mosaic_0001>
module attributes {stable_mosaic.version = 11 : i64} {
  func.func @_bert_fused_kernel(%arg0: i32, %arg1: memref<2xi32, #tpu.memory_space<smem>>, %arg2: memref<2x16x128xf32, #tpu.memory_space<vmem>>, %arg3: memref<2x128x384xbf16, #tpu.memory_space<vmem>>, %arg4: memref<2x128x128xbf16, #tpu.memory_space<vmem>>, %arg5: memref<2x128x512xbf16, #tpu.memory_space<vmem>>, %arg6: memref<2x512x128xbf16, #tpu.memory_space<vmem>>, %arg7: memref<2x8x512xf32, #tpu.memory_space<vmem>>, %arg8: memref<3x128xf32, #tpu.memory_space<vmem>>, %arg9: memref<128x128xbf16, #tpu.memory_space<vmem>>, %arg10: memref<2x1x128xf32, #tpu.memory_space<vmem>>) attributes {dimension_semantics = [#tpu.dimension_semantics<parallel>], iteration_bounds = array<i64: 1>, scalar_prefetch = 1 : i64, scratch_operands = 0 : i64, tpu.core_type = #tpu.core_type<tc>, window_params = [{transform_indices = @transform_0, window_bounds = array<i64: 2, 16, 128>}, {pipeline_mode = #tpu.pipeline_mode<synchronous>, transform_indices = @transform_1, window_bounds = array<i64: 2, 128, 384>}, {pipeline_mode = #tpu.pipeline_mode<synchronous>, transform_indices = @transform_2, window_bounds = array<i64: 2, 128, 128>}, {pipeline_mode = #tpu.pipeline_mode<synchronous>, transform_indices = @transform_3, window_bounds = array<i64: 2, 128, 512>}, {pipeline_mode = #tpu.pipeline_mode<synchronous>, transform_indices = @transform_4, window_bounds = array<i64: 2, 512, 128>}, {pipeline_mode = #tpu.pipeline_mode<synchronous>, transform_indices = @transform_5, window_bounds = array<i64: 2, 8, 512>}, {pipeline_mode = #tpu.pipeline_mode<synchronous>, transform_indices = @transform_6, window_bounds = array<i64: 3, 128>}, {pipeline_mode = #tpu.pipeline_mode<synchronous>, transform_indices = @transform_7, window_bounds = array<i64: 128, 128>}, {transform_indices = @transform_8, window_bounds = array<i64: 2, 1, 128>}]} {
    %c2_i32 = arith.constant 2 : i32
    %0 = arith.muli %arg0, %c2_i32 : i32
    %1 = tpu.iota {dimensions = array<i32: 1>} : vector<16x16xi32>
    %c0_i32 = arith.constant 0 : i32
    %2 = arith.addi %0, %c0_i32 : i32
    %3 = arith.index_cast %2 : i32 to index
    %4 = memref.load %arg1[%3] : memref<2xi32, #tpu.memory_space<smem>>
    %5 = vector.broadcast %4 : i32 to vector<16x16xi32>
    %6 = arith.cmpi slt, %1, %5 : vector<16x16xi32>
    %cst = arith.constant 0.000000e+00 : f32
    %cst_0 = arith.constant -1.000000e+09 : f32
    %7 = vector.broadcast %cst : f32 to vector<16x16xf32>
    %8 = vector.broadcast %cst_0 : f32 to vector<16x16xf32>
    %9 = arith.select %6, %7, %8 : vector<16x16xi1>, vector<16x16xf32>
    %c1_i32 = arith.constant 1 : i32
    %10 = arith.addi %0, %c1_i32 : i32
    %11 = arith.index_cast %10 : i32 to index
    %12 = memref.load %arg1[%11] : memref<2xi32, #tpu.memory_space<smem>>
    %13 = vector.broadcast %12 : i32 to vector<16x16xi32>
    %14 = arith.cmpi slt, %1, %13 : vector<16x16xi32>
    %cst_1 = arith.constant 0.000000e+00 : f32
    %cst_2 = arith.constant -1.000000e+09 : f32
    %15 = vector.broadcast %cst_1 : f32 to vector<16x16xf32>
    %16 = vector.broadcast %cst_2 : f32 to vector<16x16xf32>
    %17 = arith.select %14, %15, %16 : vector<16x16xi1>, vector<16x16xf32>
    %c0 = arith.constant 0 : index
    %c0_3 = arith.constant 0 : index
    %c0_4 = arith.constant 0 : index
    %18 = vector.load %arg2[%c0, %c0_3, %c0_4] : memref<2x16x128xf32, #tpu.memory_space<vmem>>, vector<2x16x128xf32>
    %19 = vector.shape_cast %18 : vector<2x16x128xf32> to vector<32x128xf32>
    %c0_5 = arith.constant 0 : index
    %c0_6 = arith.constant 0 : index
    %20 = vector.load %arg8[%c0_5, %c0_6] : memref<3x128xf32, #tpu.memory_space<vmem>>, vector<1x128xf32>
    %c1 = arith.constant 1 : index
    %c0_7 = arith.constant 0 : index
    %21 = vector.load %arg8[%c1, %c0_7] : memref<3x128xf32, #tpu.memory_space<vmem>>, vector<1x128xf32>
    %cst_8 = arith.constant dense<0.000000e+00> : vector<32xf32>
    %22 = vector.multi_reduction <add>, %19, %cst_8 [1] : vector<32x128xf32> to vector<32xf32>
    %23 = vector.shape_cast %22 : vector<32xf32> to vector<32x1xf32>
    %cst_9 = arith.constant 1.280000e+02 : f32
    %24 = vector.broadcast %cst_9 : f32 to vector<32x1xf32>
    %25 = arith.divf %23, %24 : vector<32x1xf32>
    %26 = vector.broadcast %25 : vector<32x1xf32> to vector<32x128xf32>
    %27 = arith.subf %19, %26 : vector<32x128xf32>
    %28 = arith.mulf %27, %27 : vector<32x128xf32>
    %cst_10 = arith.constant dense<0.000000e+00> : vector<32xf32>
    %29 = vector.multi_reduction <add>, %28, %cst_10 [1] : vector<32x128xf32> to vector<32xf32>
    %30 = vector.shape_cast %29 : vector<32xf32> to vector<32x1xf32>
    %cst_11 = arith.constant 1.280000e+02 : f32
    %31 = vector.broadcast %cst_11 : f32 to vector<32x1xf32>
    %32 = arith.divf %30, %31 : vector<32x1xf32>
    %cst_12 = arith.constant 9.99999996E-13 : f32
    %33 = vector.broadcast %cst_12 : f32 to vector<32x1xf32>
    %34 = arith.addf %32, %33 : vector<32x1xf32>
    %35 = math.rsqrt %34 : vector<32x1xf32>
    %36 = vector.broadcast %35 : vector<32x1xf32> to vector<32x128xf32>
    %37 = arith.mulf %27, %36 : vector<32x128xf32>
    %38 = vector.broadcast %20 : vector<1x128xf32> to vector<32x128xf32>
    %39 = arith.mulf %37, %38 : vector<32x128xf32>
    %40 = vector.broadcast %21 : vector<1x128xf32> to vector<32x128xf32>
    %41 = arith.addf %39, %40 : vector<32x128xf32>
    %c0_13 = arith.constant 0 : index
    %c0_14 = arith.constant 0 : index
    %c0_15 = arith.constant 0 : index
    %42 = vector.load %arg7[%c0_13, %c0_14, %c0_15] : memref<2x8x512xf32, #tpu.memory_space<vmem>>, vector<1x8x512xf32>
    %43 = vector.shape_cast %42 : vector<1x8x512xf32> to vector<8x512xf32>
    %44 = arith.truncf %41 : vector<32x128xf32> to vector<32x128xbf16>
    %c0_16 = arith.constant 0 : index
    %c0_17 = arith.constant 0 : index
    %c0_18 = arith.constant 0 : index
    %45 = vector.load %arg3[%c0_16, %c0_17, %c0_18] : memref<2x128x384xbf16, #tpu.memory_space<vmem>>, vector<1x128x384xbf16>
    %46 = vector.shape_cast %45 : vector<1x128x384xbf16> to vector<128x384xbf16>
    %cst_19 = arith.constant dense<0.000000e+00> : vector<32x384xf32>
    %47 = tpu.matmul %44, %46, %cst_19 {dimension_numbers = #tpu.dot_dimension_numbers<[1], [0], [0], [1], [0, 0, 1, 1], [], []>} : vector<32x128xbf16>, vector<128x384xbf16>, vector<32x384xf32> -> vector<32x384xf32>
    %48 = vector.extract_strided_slice %43 {offsets = [0, 0], sizes = [1, 384], strides = [1, 1]} : vector<8x512xf32> to vector<1x384xf32>
    %49 = vector.broadcast %48 : vector<1x384xf32> to vector<32x384xf32>
    %50 = arith.addf %47, %49 : vector<32x384xf32>
    %51 = arith.truncf %50 : vector<32x384xf32> to vector<32x384xbf16>
    %52 = vector.extract_strided_slice %51 {offsets = [0, 0], sizes = [16, 32], strides = [1, 1]} : vector<32x384xbf16> to vector<16x32xbf16>
    %53 = vector.extract_strided_slice %51 {offsets = [0, 128], sizes = [16, 32], strides = [1, 1]} : vector<32x384xbf16> to vector<16x32xbf16>
    %54 = vector.extract_strided_slice %51 {offsets = [0, 256], sizes = [16, 32], strides = [1, 1]} : vector<32x384xbf16> to vector<16x32xbf16>
    %cst_20 = arith.constant dense<0.000000e+00> : vector<16x16xf32>
    %55 = tpu.matmul %52, %53, %cst_20 {dimension_numbers = #tpu.dot_dimension_numbers<[1], [1], [0], [0], [0, 0, 1, 0], [], []>} : vector<16x32xbf16>, vector<16x32xbf16>, vector<16x16xf32> -> vector<16x16xf32>
    %56 = arith.addf %55, %9 : vector<16x16xf32>
    %cst_21 = arith.constant dense<0xFF800000> : vector<16xf32>
    %57 = vector.multi_reduction <maximumf>, %56, %cst_21 [1] : vector<16x16xf32> to vector<16xf32>
    %58 = vector.shape_cast %57 : vector<16xf32> to vector<16x1xf32>
    %59 = vector.broadcast %58 : vector<16x1xf32> to vector<16x16xf32>
    %60 = arith.subf %56, %59 : vector<16x16xf32>
    %61 = math.exp %60 : vector<16x16xf32>
    %cst_22 = arith.constant dense<0.000000e+00> : vector<16xf32>
    %62 = vector.multi_reduction <add>, %61, %cst_22 [1] : vector<16x16xf32> to vector<16xf32>
    %63 = vector.shape_cast %62 : vector<16xf32> to vector<16x1xf32>
    %64 = tpu.reciprocal %63 {approx = true} : vector<16x1xf32> -> vector<16x1xf32>
    %65 = vector.broadcast %64 : vector<16x1xf32> to vector<16x16xf32>
    %66 = arith.mulf %61, %65 : vector<16x16xf32>
    %67 = arith.truncf %66 : vector<16x16xf32> to vector<16x16xbf16>
    %cst_23 = arith.constant dense<0.000000e+00> : vector<16x32xf32>
    %68 = tpu.matmul %67, %54, %cst_23 {dimension_numbers = #tpu.dot_dimension_numbers<[1], [0], [0], [1], [0, 0, 1, 1], [], []>} : vector<16x16xbf16>, vector<16x32xbf16>, vector<16x32xf32> -> vector<16x32xf32>
    %69 = vector.extract_strided_slice %51 {offsets = [0, 32], sizes = [16, 32], strides = [1, 1]} : vector<32x384xbf16> to vector<16x32xbf16>
    %70 = vector.extract_strided_slice %51 {offsets = [0, 160], sizes = [16, 32], strides = [1, 1]} : vector<32x384xbf16> to vector<16x32xbf16>
    %71 = vector.extract_strided_slice %51 {offsets = [0, 288], sizes = [16, 32], strides = [1, 1]} : vector<32x384xbf16> to vector<16x32xbf16>
    %cst_24 = arith.constant dense<0.000000e+00> : vector<16x16xf32>
    %72 = tpu.matmul %69, %70, %cst_24 {dimension_numbers = #tpu.dot_dimension_numbers<[1], [1], [0], [0], [0, 0, 1, 0], [], []>} : vector<16x32xbf16>, vector<16x32xbf16>, vector<16x16xf32> -> vector<16x16xf32>
    %73 = arith.addf %72, %9 : vector<16x16xf32>
    %cst_25 = arith.constant dense<0xFF800000> : vector<16xf32>
    %74 = vector.multi_reduction <maximumf>, %73, %cst_25 [1] : vector<16x16xf32> to vector<16xf32>
    %75 = vector.shape_cast %74 : vector<16xf32> to vector<16x1xf32>
    %76 = vector.broadcast %75 : vector<16x1xf32> to vector<16x16xf32>
    %77 = arith.subf %73, %76 : vector<16x16xf32>
    %78 = math.exp %77 : vector<16x16xf32>
    %cst_26 = arith.constant dense<0.000000e+00> : vector<16xf32>
    %79 = vector.multi_reduction <add>, %78, %cst_26 [1] : vector<16x16xf32> to vector<16xf32>
    %80 = vector.shape_cast %79 : vector<16xf32> to vector<16x1xf32>
    %81 = tpu.reciprocal %80 {approx = true} : vector<16x1xf32> -> vector<16x1xf32>
    %82 = vector.broadcast %81 : vector<16x1xf32> to vector<16x16xf32>
    %83 = arith.mulf %78, %82 : vector<16x16xf32>
    %84 = arith.truncf %83 : vector<16x16xf32> to vector<16x16xbf16>
    %cst_27 = arith.constant dense<0.000000e+00> : vector<16x32xf32>
    %85 = tpu.matmul %84, %71, %cst_27 {dimension_numbers = #tpu.dot_dimension_numbers<[1], [0], [0], [1], [0, 0, 1, 1], [], []>} : vector<16x16xbf16>, vector<16x32xbf16>, vector<16x32xf32> -> vector<16x32xf32>
    %86 = vector.extract_strided_slice %51 {offsets = [0, 64], sizes = [16, 32], strides = [1, 1]} : vector<32x384xbf16> to vector<16x32xbf16>
    %87 = vector.extract_strided_slice %51 {offsets = [0, 192], sizes = [16, 32], strides = [1, 1]} : vector<32x384xbf16> to vector<16x32xbf16>
    %88 = vector.extract_strided_slice %51 {offsets = [0, 320], sizes = [16, 32], strides = [1, 1]} : vector<32x384xbf16> to vector<16x32xbf16>
    %cst_28 = arith.constant dense<0.000000e+00> : vector<16x16xf32>
    %89 = tpu.matmul %86, %87, %cst_28 {dimension_numbers = #tpu.dot_dimension_numbers<[1], [1], [0], [0], [0, 0, 1, 0], [], []>} : vector<16x32xbf16>, vector<16x32xbf16>, vector<16x16xf32> -> vector<16x16xf32>
    %90 = arith.addf %89, %9 : vector<16x16xf32>
    %cst_29 = arith.constant dense<0xFF800000> : vector<16xf32>
    %91 = vector.multi_reduction <maximumf>, %90, %cst_29 [1] : vector<16x16xf32> to vector<16xf32>
    %92 = vector.shape_cast %91 : vector<16xf32> to vector<16x1xf32>
    %93 = vector.broadcast %92 : vector<16x1xf32> to vector<16x16xf32>
    %94 = arith.subf %90, %93 : vector<16x16xf32>
    %95 = math.exp %94 : vector<16x16xf32>
    %cst_30 = arith.constant dense<0.000000e+00> : vector<16xf32>
    %96 = vector.multi_reduction <add>, %95, %cst_30 [1] : vector<16x16xf32> to vector<16xf32>
    %97 = vector.shape_cast %96 : vector<16xf32> to vector<16x1xf32>
    %98 = tpu.reciprocal %97 {approx = true} : vector<16x1xf32> -> vector<16x1xf32>
    %99 = vector.broadcast %98 : vector<16x1xf32> to vector<16x16xf32>
    %100 = arith.mulf %95, %99 : vector<16x16xf32>
    %101 = arith.truncf %100 : vector<16x16xf32> to vector<16x16xbf16>
    %cst_31 = arith.constant dense<0.000000e+00> : vector<16x32xf32>
    %102 = tpu.matmul %101, %88, %cst_31 {dimension_numbers = #tpu.dot_dimension_numbers<[1], [0], [0], [1], [0, 0, 1, 1], [], []>} : vector<16x16xbf16>, vector<16x32xbf16>, vector<16x32xf32> -> vector<16x32xf32>
    %103 = vector.extract_strided_slice %51 {offsets = [0, 96], sizes = [16, 32], strides = [1, 1]} : vector<32x384xbf16> to vector<16x32xbf16>
    %104 = vector.extract_strided_slice %51 {offsets = [0, 224], sizes = [16, 32], strides = [1, 1]} : vector<32x384xbf16> to vector<16x32xbf16>
    %105 = vector.extract_strided_slice %51 {offsets = [0, 352], sizes = [16, 32], strides = [1, 1]} : vector<32x384xbf16> to vector<16x32xbf16>
    %cst_32 = arith.constant dense<0.000000e+00> : vector<16x16xf32>
    %106 = tpu.matmul %103, %104, %cst_32 {dimension_numbers = #tpu.dot_dimension_numbers<[1], [1], [0], [0], [0, 0, 1, 0], [], []>} : vector<16x32xbf16>, vector<16x32xbf16>, vector<16x16xf32> -> vector<16x16xf32>
    %107 = arith.addf %106, %9 : vector<16x16xf32>
    %cst_33 = arith.constant dense<0xFF800000> : vector<16xf32>
    %108 = vector.multi_reduction <maximumf>, %107, %cst_33 [1] : vector<16x16xf32> to vector<16xf32>
    %109 = vector.shape_cast %108 : vector<16xf32> to vector<16x1xf32>
    %110 = vector.broadcast %109 : vector<16x1xf32> to vector<16x16xf32>
    %111 = arith.subf %107, %110 : vector<16x16xf32>
    %112 = math.exp %111 : vector<16x16xf32>
    %cst_34 = arith.constant dense<0.000000e+00> : vector<16xf32>
    %113 = vector.multi_reduction <add>, %112, %cst_34 [1] : vector<16x16xf32> to vector<16xf32>
    %114 = vector.shape_cast %113 : vector<16xf32> to vector<16x1xf32>
    %115 = tpu.reciprocal %114 {approx = true} : vector<16x1xf32> -> vector<16x1xf32>
    %116 = vector.broadcast %115 : vector<16x1xf32> to vector<16x16xf32>
    %117 = arith.mulf %112, %116 : vector<16x16xf32>
    %118 = arith.truncf %117 : vector<16x16xf32> to vector<16x16xbf16>
    %cst_35 = arith.constant dense<0.000000e+00> : vector<16x32xf32>
    %119 = tpu.matmul %118, %105, %cst_35 {dimension_numbers = #tpu.dot_dimension_numbers<[1], [0], [0], [1], [0, 0, 1, 1], [], []>} : vector<16x16xbf16>, vector<16x32xbf16>, vector<16x32xf32> -> vector<16x32xf32>
    %120 = tpu.concatenate %68, %85, %102, %119 in 1 : vector<16x32xf32>, vector<16x32xf32>, vector<16x32xf32>, vector<16x32xf32> -> vector<16x128xf32>
    %121 = vector.extract_strided_slice %51 {offsets = [16, 0], sizes = [16, 32], strides = [1, 1]} : vector<32x384xbf16> to vector<16x32xbf16>
    %122 = vector.extract_strided_slice %51 {offsets = [16, 128], sizes = [16, 32], strides = [1, 1]} : vector<32x384xbf16> to vector<16x32xbf16>
    %123 = vector.extract_strided_slice %51 {offsets = [16, 256], sizes = [16, 32], strides = [1, 1]} : vector<32x384xbf16> to vector<16x32xbf16>
    %cst_36 = arith.constant dense<0.000000e+00> : vector<16x16xf32>
    %124 = tpu.matmul %121, %122, %cst_36 {dimension_numbers = #tpu.dot_dimension_numbers<[1], [1], [0], [0], [0, 0, 1, 0], [], []>} : vector<16x32xbf16>, vector<16x32xbf16>, vector<16x16xf32> -> vector<16x16xf32>
    %125 = arith.addf %124, %17 : vector<16x16xf32>
    %cst_37 = arith.constant dense<0xFF800000> : vector<16xf32>
    %126 = vector.multi_reduction <maximumf>, %125, %cst_37 [1] : vector<16x16xf32> to vector<16xf32>
    %127 = vector.shape_cast %126 : vector<16xf32> to vector<16x1xf32>
    %128 = vector.broadcast %127 : vector<16x1xf32> to vector<16x16xf32>
    %129 = arith.subf %125, %128 : vector<16x16xf32>
    %130 = math.exp %129 : vector<16x16xf32>
    %cst_38 = arith.constant dense<0.000000e+00> : vector<16xf32>
    %131 = vector.multi_reduction <add>, %130, %cst_38 [1] : vector<16x16xf32> to vector<16xf32>
    %132 = vector.shape_cast %131 : vector<16xf32> to vector<16x1xf32>
    %133 = tpu.reciprocal %132 {approx = true} : vector<16x1xf32> -> vector<16x1xf32>
    %134 = vector.broadcast %133 : vector<16x1xf32> to vector<16x16xf32>
    %135 = arith.mulf %130, %134 : vector<16x16xf32>
    %136 = arith.truncf %135 : vector<16x16xf32> to vector<16x16xbf16>
    %cst_39 = arith.constant dense<0.000000e+00> : vector<16x32xf32>
    %137 = tpu.matmul %136, %123, %cst_39 {dimension_numbers = #tpu.dot_dimension_numbers<[1], [0], [0], [1], [0, 0, 1, 1], [], []>} : vector<16x16xbf16>, vector<16x32xbf16>, vector<16x32xf32> -> vector<16x32xf32>
    %138 = vector.extract_strided_slice %51 {offsets = [16, 32], sizes = [16, 32], strides = [1, 1]} : vector<32x384xbf16> to vector<16x32xbf16>
    %139 = vector.extract_strided_slice %51 {offsets = [16, 160], sizes = [16, 32], strides = [1, 1]} : vector<32x384xbf16> to vector<16x32xbf16>
    %140 = vector.extract_strided_slice %51 {offsets = [16, 288], sizes = [16, 32], strides = [1, 1]} : vector<32x384xbf16> to vector<16x32xbf16>
    %cst_40 = arith.constant dense<0.000000e+00> : vector<16x16xf32>
    %141 = tpu.matmul %138, %139, %cst_40 {dimension_numbers = #tpu.dot_dimension_numbers<[1], [1], [0], [0], [0, 0, 1, 0], [], []>} : vector<16x32xbf16>, vector<16x32xbf16>, vector<16x16xf32> -> vector<16x16xf32>
    %142 = arith.addf %141, %17 : vector<16x16xf32>
    %cst_41 = arith.constant dense<0xFF800000> : vector<16xf32>
    %143 = vector.multi_reduction <maximumf>, %142, %cst_41 [1] : vector<16x16xf32> to vector<16xf32>
    %144 = vector.shape_cast %143 : vector<16xf32> to vector<16x1xf32>
    %145 = vector.broadcast %144 : vector<16x1xf32> to vector<16x16xf32>
    %146 = arith.subf %142, %145 : vector<16x16xf32>
    %147 = math.exp %146 : vector<16x16xf32>
    %cst_42 = arith.constant dense<0.000000e+00> : vector<16xf32>
    %148 = vector.multi_reduction <add>, %147, %cst_42 [1] : vector<16x16xf32> to vector<16xf32>
    %149 = vector.shape_cast %148 : vector<16xf32> to vector<16x1xf32>
    %150 = tpu.reciprocal %149 {approx = true} : vector<16x1xf32> -> vector<16x1xf32>
    %151 = vector.broadcast %150 : vector<16x1xf32> to vector<16x16xf32>
    %152 = arith.mulf %147, %151 : vector<16x16xf32>
    %153 = arith.truncf %152 : vector<16x16xf32> to vector<16x16xbf16>
    %cst_43 = arith.constant dense<0.000000e+00> : vector<16x32xf32>
    %154 = tpu.matmul %153, %140, %cst_43 {dimension_numbers = #tpu.dot_dimension_numbers<[1], [0], [0], [1], [0, 0, 1, 1], [], []>} : vector<16x16xbf16>, vector<16x32xbf16>, vector<16x32xf32> -> vector<16x32xf32>
    %155 = vector.extract_strided_slice %51 {offsets = [16, 64], sizes = [16, 32], strides = [1, 1]} : vector<32x384xbf16> to vector<16x32xbf16>
    %156 = vector.extract_strided_slice %51 {offsets = [16, 192], sizes = [16, 32], strides = [1, 1]} : vector<32x384xbf16> to vector<16x32xbf16>
    %157 = vector.extract_strided_slice %51 {offsets = [16, 320], sizes = [16, 32], strides = [1, 1]} : vector<32x384xbf16> to vector<16x32xbf16>
    %cst_44 = arith.constant dense<0.000000e+00> : vector<16x16xf32>
    %158 = tpu.matmul %155, %156, %cst_44 {dimension_numbers = #tpu.dot_dimension_numbers<[1], [1], [0], [0], [0, 0, 1, 0], [], []>} : vector<16x32xbf16>, vector<16x32xbf16>, vector<16x16xf32> -> vector<16x16xf32>
    %159 = arith.addf %158, %17 : vector<16x16xf32>
    %cst_45 = arith.constant dense<0xFF800000> : vector<16xf32>
    %160 = vector.multi_reduction <maximumf>, %159, %cst_45 [1] : vector<16x16xf32> to vector<16xf32>
    %161 = vector.shape_cast %160 : vector<16xf32> to vector<16x1xf32>
    %162 = vector.broadcast %161 : vector<16x1xf32> to vector<16x16xf32>
    %163 = arith.subf %159, %162 : vector<16x16xf32>
    %164 = math.exp %163 : vector<16x16xf32>
    %cst_46 = arith.constant dense<0.000000e+00> : vector<16xf32>
    %165 = vector.multi_reduction <add>, %164, %cst_46 [1] : vector<16x16xf32> to vector<16xf32>
    %166 = vector.shape_cast %165 : vector<16xf32> to vector<16x1xf32>
    %167 = tpu.reciprocal %166 {approx = true} : vector<16x1xf32> -> vector<16x1xf32>
    %168 = vector.broadcast %167 : vector<16x1xf32> to vector<16x16xf32>
    %169 = arith.mulf %164, %168 : vector<16x16xf32>
    %170 = arith.truncf %169 : vector<16x16xf32> to vector<16x16xbf16>
    %cst_47 = arith.constant dense<0.000000e+00> : vector<16x32xf32>
    %171 = tpu.matmul %170, %157, %cst_47 {dimension_numbers = #tpu.dot_dimension_numbers<[1], [0], [0], [1], [0, 0, 1, 1], [], []>} : vector<16x16xbf16>, vector<16x32xbf16>, vector<16x32xf32> -> vector<16x32xf32>
    %172 = vector.extract_strided_slice %51 {offsets = [16, 96], sizes = [16, 32], strides = [1, 1]} : vector<32x384xbf16> to vector<16x32xbf16>
    %173 = vector.extract_strided_slice %51 {offsets = [16, 224], sizes = [16, 32], strides = [1, 1]} : vector<32x384xbf16> to vector<16x32xbf16>
    %174 = vector.extract_strided_slice %51 {offsets = [16, 352], sizes = [16, 32], strides = [1, 1]} : vector<32x384xbf16> to vector<16x32xbf16>
    %cst_48 = arith.constant dense<0.000000e+00> : vector<16x16xf32>
    %175 = tpu.matmul %172, %173, %cst_48 {dimension_numbers = #tpu.dot_dimension_numbers<[1], [1], [0], [0], [0, 0, 1, 0], [], []>} : vector<16x32xbf16>, vector<16x32xbf16>, vector<16x16xf32> -> vector<16x16xf32>
    %176 = arith.addf %175, %17 : vector<16x16xf32>
    %cst_49 = arith.constant dense<0xFF800000> : vector<16xf32>
    %177 = vector.multi_reduction <maximumf>, %176, %cst_49 [1] : vector<16x16xf32> to vector<16xf32>
    %178 = vector.shape_cast %177 : vector<16xf32> to vector<16x1xf32>
    %179 = vector.broadcast %178 : vector<16x1xf32> to vector<16x16xf32>
    %180 = arith.subf %176, %179 : vector<16x16xf32>
    %181 = math.exp %180 : vector<16x16xf32>
    %cst_50 = arith.constant dense<0.000000e+00> : vector<16xf32>
    %182 = vector.multi_reduction <add>, %181, %cst_50 [1] : vector<16x16xf32> to vector<16xf32>
    %183 = vector.shape_cast %182 : vector<16xf32> to vector<16x1xf32>
    %184 = tpu.reciprocal %183 {approx = true} : vector<16x1xf32> -> vector<16x1xf32>
    %185 = vector.broadcast %184 : vector<16x1xf32> to vector<16x16xf32>
    %186 = arith.mulf %181, %185 : vector<16x16xf32>
    %187 = arith.truncf %186 : vector<16x16xf32> to vector<16x16xbf16>
    %cst_51 = arith.constant dense<0.000000e+00> : vector<16x32xf32>
    %188 = tpu.matmul %187, %174, %cst_51 {dimension_numbers = #tpu.dot_dimension_numbers<[1], [0], [0], [1], [0, 0, 1, 1], [], []>} : vector<16x16xbf16>, vector<16x32xbf16>, vector<16x32xf32> -> vector<16x32xf32>
    %189 = tpu.concatenate %137, %154, %171, %188 in 1 : vector<16x32xf32>, vector<16x32xf32>, vector<16x32xf32>, vector<16x32xf32> -> vector<16x128xf32>
    %190 = tpu.concatenate %120, %189 in 0 : vector<16x128xf32>, vector<16x128xf32> -> vector<32x128xf32>
    %191 = arith.truncf %190 : vector<32x128xf32> to vector<32x128xbf16>
    %c0_52 = arith.constant 0 : index
    %c0_53 = arith.constant 0 : index
    %c0_54 = arith.constant 0 : index
    %192 = vector.load %arg4[%c0_52, %c0_53, %c0_54] : memref<2x128x128xbf16, #tpu.memory_space<vmem>>, vector<1x128x128xbf16>
    %193 = vector.shape_cast %192 : vector<1x128x128xbf16> to vector<128x128xbf16>
    %cst_55 = arith.constant dense<0.000000e+00> : vector<32x128xf32>
    %194 = tpu.matmul %191, %193, %cst_55 {dimension_numbers = #tpu.dot_dimension_numbers<[1], [0], [0], [1], [0, 0, 1, 1], [], []>} : vector<32x128xbf16>, vector<128x128xbf16>, vector<32x128xf32> -> vector<32x128xf32>
    %195 = vector.extract_strided_slice %43 {offsets = [1, 0], sizes = [1, 128], strides = [1, 1]} : vector<8x512xf32> to vector<1x128xf32>
    %196 = vector.broadcast %195 : vector<1x128xf32> to vector<32x128xf32>
    %197 = arith.addf %194, %196 : vector<32x128xf32>
    %198 = arith.addf %197, %41 : vector<32x128xf32>
    %199 = vector.extract_strided_slice %43 {offsets = [2, 0], sizes = [1, 128], strides = [1, 1]} : vector<8x512xf32> to vector<1x128xf32>
    %200 = vector.extract_strided_slice %43 {offsets = [3, 0], sizes = [1, 128], strides = [1, 1]} : vector<8x512xf32> to vector<1x128xf32>
    %cst_56 = arith.constant dense<0.000000e+00> : vector<32xf32>
    %201 = vector.multi_reduction <add>, %198, %cst_56 [1] : vector<32x128xf32> to vector<32xf32>
    %202 = vector.shape_cast %201 : vector<32xf32> to vector<32x1xf32>
    %cst_57 = arith.constant 1.280000e+02 : f32
    %203 = vector.broadcast %cst_57 : f32 to vector<32x1xf32>
    %204 = arith.divf %202, %203 : vector<32x1xf32>
    %205 = vector.broadcast %204 : vector<32x1xf32> to vector<32x128xf32>
    %206 = arith.subf %198, %205 : vector<32x128xf32>
    %207 = arith.mulf %206, %206 : vector<32x128xf32>
    %cst_58 = arith.constant dense<0.000000e+00> : vector<32xf32>
    %208 = vector.multi_reduction <add>, %207, %cst_58 [1] : vector<32x128xf32> to vector<32xf32>
    %209 = vector.shape_cast %208 : vector<32xf32> to vector<32x1xf32>
    %cst_59 = arith.constant 1.280000e+02 : f32
    %210 = vector.broadcast %cst_59 : f32 to vector<32x1xf32>
    %211 = arith.divf %209, %210 : vector<32x1xf32>
    %cst_60 = arith.constant 9.99999996E-13 : f32
    %212 = vector.broadcast %cst_60 : f32 to vector<32x1xf32>
    %213 = arith.addf %211, %212 : vector<32x1xf32>
    %214 = math.rsqrt %213 : vector<32x1xf32>
    %215 = vector.broadcast %214 : vector<32x1xf32> to vector<32x128xf32>
    %216 = arith.mulf %206, %215 : vector<32x128xf32>
    %217 = vector.broadcast %199 : vector<1x128xf32> to vector<32x128xf32>
    %218 = arith.mulf %216, %217 : vector<32x128xf32>
    %219 = vector.broadcast %200 : vector<1x128xf32> to vector<32x128xf32>
    %220 = arith.addf %218, %219 : vector<32x128xf32>
    %221 = arith.truncf %220 : vector<32x128xf32> to vector<32x128xbf16>
    %c0_61 = arith.constant 0 : index
    %c0_62 = arith.constant 0 : index
    %c0_63 = arith.constant 0 : index
    %222 = vector.load %arg5[%c0_61, %c0_62, %c0_63] : memref<2x128x512xbf16, #tpu.memory_space<vmem>>, vector<1x128x512xbf16>
    %223 = vector.shape_cast %222 : vector<1x128x512xbf16> to vector<128x512xbf16>
    %cst_64 = arith.constant dense<0.000000e+00> : vector<32x512xf32>
    %224 = tpu.matmul %221, %223, %cst_64 {dimension_numbers = #tpu.dot_dimension_numbers<[1], [0], [0], [1], [0, 0, 1, 1], [], []>} : vector<32x128xbf16>, vector<128x512xbf16>, vector<32x512xf32> -> vector<32x512xf32>
    %225 = vector.extract_strided_slice %43 {offsets = [4, 0], sizes = [1, 512], strides = [1, 1]} : vector<8x512xf32> to vector<1x512xf32>
    %226 = vector.broadcast %225 : vector<1x512xf32> to vector<32x512xf32>
    %227 = arith.addf %224, %226 : vector<32x512xf32>
    %cst_65 = arith.constant 5.000000e-01 : f32
    %228 = vector.broadcast %cst_65 : f32 to vector<32x512xf32>
    %229 = arith.mulf %228, %227 : vector<32x512xf32>
    %cst_66 = arith.constant 4.471500e-02 : f32
    %230 = vector.broadcast %cst_66 : f32 to vector<32x512xf32>
    %231 = arith.mulf %230, %227 : vector<32x512xf32>
    %232 = arith.mulf %231, %227 : vector<32x512xf32>
    %233 = arith.mulf %232, %227 : vector<32x512xf32>
    %234 = arith.addf %227, %233 : vector<32x512xf32>
    %cst_67 = arith.constant 0.797884583 : f32
    %235 = vector.broadcast %cst_67 : f32 to vector<32x512xf32>
    %236 = arith.mulf %235, %234 : vector<32x512xf32>
    %237 = math.tanh %236 : vector<32x512xf32>
    %cst_68 = arith.constant 1.000000e+00 : f32
    %238 = vector.broadcast %cst_68 : f32 to vector<32x512xf32>
    %239 = arith.addf %238, %237 : vector<32x512xf32>
    %240 = arith.mulf %229, %239 : vector<32x512xf32>
    %241 = arith.truncf %240 : vector<32x512xf32> to vector<32x512xbf16>
    %c0_69 = arith.constant 0 : index
    %c0_70 = arith.constant 0 : index
    %c0_71 = arith.constant 0 : index
    %242 = vector.load %arg6[%c0_69, %c0_70, %c0_71] : memref<2x512x128xbf16, #tpu.memory_space<vmem>>, vector<1x512x128xbf16>
    %243 = vector.shape_cast %242 : vector<1x512x128xbf16> to vector<512x128xbf16>
    %cst_72 = arith.constant dense<0.000000e+00> : vector<32x128xf32>
    %244 = tpu.matmul %241, %243, %cst_72 {dimension_numbers = #tpu.dot_dimension_numbers<[1], [0], [0], [1], [0, 0, 1, 1], [], []>} : vector<32x512xbf16>, vector<512x128xbf16>, vector<32x128xf32> -> vector<32x128xf32>
    %245 = vector.extract_strided_slice %43 {offsets = [5, 0], sizes = [1, 128], strides = [1, 1]} : vector<8x512xf32> to vector<1x128xf32>
    %246 = vector.broadcast %245 : vector<1x128xf32> to vector<32x128xf32>
    %247 = arith.addf %244, %246 : vector<32x128xf32>
    %248 = arith.addf %247, %220 : vector<32x128xf32>
    %249 = vector.extract_strided_slice %43 {offsets = [6, 0], sizes = [1, 128], strides = [1, 1]} : vector<8x512xf32> to vector<1x128xf32>
    %250 = vector.extract_strided_slice %43 {offsets = [7, 0], sizes = [1, 128], strides = [1, 1]} : vector<8x512xf32> to vector<1x128xf32>
    %cst_73 = arith.constant dense<0.000000e+00> : vector<32xf32>
    %251 = vector.multi_reduction <add>, %248, %cst_73 [1] : vector<32x128xf32> to vector<32xf32>
    %252 = vector.shape_cast %251 : vector<32xf32> to vector<32x1xf32>
    %cst_74 = arith.constant 1.280000e+02 : f32
    %253 = vector.broadcast %cst_74 : f32 to vector<32x1xf32>
    %254 = arith.divf %252, %253 : vector<32x1xf32>
    %255 = vector.broadcast %254 : vector<32x1xf32> to vector<32x128xf32>
    %256 = arith.subf %248, %255 : vector<32x128xf32>
    %257 = arith.mulf %256, %256 : vector<32x128xf32>
    %cst_75 = arith.constant dense<0.000000e+00> : vector<32xf32>
    %258 = vector.multi_reduction <add>, %257, %cst_75 [1] : vector<32x128xf32> to vector<32xf32>
    %259 = vector.shape_cast %258 : vector<32xf32> to vector<32x1xf32>
    %cst_76 = arith.constant 1.280000e+02 : f32
    %260 = vector.broadcast %cst_76 : f32 to vector<32x1xf32>
    %261 = arith.divf %259, %260 : vector<32x1xf32>
    %cst_77 = arith.constant 9.99999996E-13 : f32
    %262 = vector.broadcast %cst_77 : f32 to vector<32x1xf32>
    %263 = arith.addf %261, %262 : vector<32x1xf32>
    %264 = math.rsqrt %263 : vector<32x1xf32>
    %265 = vector.broadcast %264 : vector<32x1xf32> to vector<32x128xf32>
    %266 = arith.mulf %256, %265 : vector<32x128xf32>
    %267 = vector.broadcast %249 : vector<1x128xf32> to vector<32x128xf32>
    %268 = arith.mulf %266, %267 : vector<32x128xf32>
    %269 = vector.broadcast %250 : vector<1x128xf32> to vector<32x128xf32>
    %270 = arith.addf %268, %269 : vector<32x128xf32>
    %c1_78 = arith.constant 1 : index
    %c0_79 = arith.constant 0 : index
    %c0_80 = arith.constant 0 : index
    %271 = vector.load %arg7[%c1_78, %c0_79, %c0_80] : memref<2x8x512xf32, #tpu.memory_space<vmem>>, vector<1x8x512xf32>
    %272 = vector.shape_cast %271 : vector<1x8x512xf32> to vector<8x512xf32>
    %273 = arith.truncf %270 : vector<32x128xf32> to vector<32x128xbf16>
    %c1_81 = arith.constant 1 : index
    %c0_82 = arith.constant 0 : index
    %c0_83 = arith.constant 0 : index
    %274 = vector.load %arg3[%c1_81, %c0_82, %c0_83] : memref<2x128x384xbf16, #tpu.memory_space<vmem>>, vector<1x128x384xbf16>
    %275 = vector.shape_cast %274 : vector<1x128x384xbf16> to vector<128x384xbf16>
    %cst_84 = arith.constant dense<0.000000e+00> : vector<32x384xf32>
    %276 = tpu.matmul %273, %275, %cst_84 {dimension_numbers = #tpu.dot_dimension_numbers<[1], [0], [0], [1], [0, 0, 1, 1], [], []>} : vector<32x128xbf16>, vector<128x384xbf16>, vector<32x384xf32> -> vector<32x384xf32>
    %277 = vector.extract_strided_slice %272 {offsets = [0, 0], sizes = [1, 384], strides = [1, 1]} : vector<8x512xf32> to vector<1x384xf32>
    %278 = vector.broadcast %277 : vector<1x384xf32> to vector<32x384xf32>
    %279 = arith.addf %276, %278 : vector<32x384xf32>
    %280 = arith.truncf %279 : vector<32x384xf32> to vector<32x384xbf16>
    %281 = vector.extract_strided_slice %280 {offsets = [0, 0], sizes = [16, 32], strides = [1, 1]} : vector<32x384xbf16> to vector<16x32xbf16>
    %282 = vector.extract_strided_slice %280 {offsets = [0, 128], sizes = [16, 32], strides = [1, 1]} : vector<32x384xbf16> to vector<16x32xbf16>
    %283 = vector.extract_strided_slice %280 {offsets = [0, 256], sizes = [16, 32], strides = [1, 1]} : vector<32x384xbf16> to vector<16x32xbf16>
    %cst_85 = arith.constant dense<0.000000e+00> : vector<16x16xf32>
    %284 = tpu.matmul %281, %282, %cst_85 {dimension_numbers = #tpu.dot_dimension_numbers<[1], [1], [0], [0], [0, 0, 1, 0], [], []>} : vector<16x32xbf16>, vector<16x32xbf16>, vector<16x16xf32> -> vector<16x16xf32>
    %285 = arith.addf %284, %9 : vector<16x16xf32>
    %cst_86 = arith.constant dense<0xFF800000> : vector<16xf32>
    %286 = vector.multi_reduction <maximumf>, %285, %cst_86 [1] : vector<16x16xf32> to vector<16xf32>
    %287 = vector.shape_cast %286 : vector<16xf32> to vector<16x1xf32>
    %288 = vector.broadcast %287 : vector<16x1xf32> to vector<16x16xf32>
    %289 = arith.subf %285, %288 : vector<16x16xf32>
    %290 = math.exp %289 : vector<16x16xf32>
    %cst_87 = arith.constant dense<0.000000e+00> : vector<16xf32>
    %291 = vector.multi_reduction <add>, %290, %cst_87 [1] : vector<16x16xf32> to vector<16xf32>
    %292 = vector.shape_cast %291 : vector<16xf32> to vector<16x1xf32>
    %293 = tpu.reciprocal %292 {approx = true} : vector<16x1xf32> -> vector<16x1xf32>
    %294 = vector.broadcast %293 : vector<16x1xf32> to vector<16x16xf32>
    %295 = arith.mulf %290, %294 : vector<16x16xf32>
    %296 = arith.truncf %295 : vector<16x16xf32> to vector<16x16xbf16>
    %cst_88 = arith.constant dense<0.000000e+00> : vector<16x32xf32>
    %297 = tpu.matmul %296, %283, %cst_88 {dimension_numbers = #tpu.dot_dimension_numbers<[1], [0], [0], [1], [0, 0, 1, 1], [], []>} : vector<16x16xbf16>, vector<16x32xbf16>, vector<16x32xf32> -> vector<16x32xf32>
    %298 = vector.extract_strided_slice %280 {offsets = [0, 32], sizes = [16, 32], strides = [1, 1]} : vector<32x384xbf16> to vector<16x32xbf16>
    %299 = vector.extract_strided_slice %280 {offsets = [0, 160], sizes = [16, 32], strides = [1, 1]} : vector<32x384xbf16> to vector<16x32xbf16>
    %300 = vector.extract_strided_slice %280 {offsets = [0, 288], sizes = [16, 32], strides = [1, 1]} : vector<32x384xbf16> to vector<16x32xbf16>
    %cst_89 = arith.constant dense<0.000000e+00> : vector<16x16xf32>
    %301 = tpu.matmul %298, %299, %cst_89 {dimension_numbers = #tpu.dot_dimension_numbers<[1], [1], [0], [0], [0, 0, 1, 0], [], []>} : vector<16x32xbf16>, vector<16x32xbf16>, vector<16x16xf32> -> vector<16x16xf32>
    %302 = arith.addf %301, %9 : vector<16x16xf32>
    %cst_90 = arith.constant dense<0xFF800000> : vector<16xf32>
    %303 = vector.multi_reduction <maximumf>, %302, %cst_90 [1] : vector<16x16xf32> to vector<16xf32>
    %304 = vector.shape_cast %303 : vector<16xf32> to vector<16x1xf32>
    %305 = vector.broadcast %304 : vector<16x1xf32> to vector<16x16xf32>
    %306 = arith.subf %302, %305 : vector<16x16xf32>
    %307 = math.exp %306 : vector<16x16xf32>
    %cst_91 = arith.constant dense<0.000000e+00> : vector<16xf32>
    %308 = vector.multi_reduction <add>, %307, %cst_91 [1] : vector<16x16xf32> to vector<16xf32>
    %309 = vector.shape_cast %308 : vector<16xf32> to vector<16x1xf32>
    %310 = tpu.reciprocal %309 {approx = true} : vector<16x1xf32> -> vector<16x1xf32>
    %311 = vector.broadcast %310 : vector<16x1xf32> to vector<16x16xf32>
    %312 = arith.mulf %307, %311 : vector<16x16xf32>
    %313 = arith.truncf %312 : vector<16x16xf32> to vector<16x16xbf16>
    %cst_92 = arith.constant dense<0.000000e+00> : vector<16x32xf32>
    %314 = tpu.matmul %313, %300, %cst_92 {dimension_numbers = #tpu.dot_dimension_numbers<[1], [0], [0], [1], [0, 0, 1, 1], [], []>} : vector<16x16xbf16>, vector<16x32xbf16>, vector<16x32xf32> -> vector<16x32xf32>
    %315 = vector.extract_strided_slice %280 {offsets = [0, 64], sizes = [16, 32], strides = [1, 1]} : vector<32x384xbf16> to vector<16x32xbf16>
    %316 = vector.extract_strided_slice %280 {offsets = [0, 192], sizes = [16, 32], strides = [1, 1]} : vector<32x384xbf16> to vector<16x32xbf16>
    %317 = vector.extract_strided_slice %280 {offsets = [0, 320], sizes = [16, 32], strides = [1, 1]} : vector<32x384xbf16> to vector<16x32xbf16>
    %cst_93 = arith.constant dense<0.000000e+00> : vector<16x16xf32>
    %318 = tpu.matmul %315, %316, %cst_93 {dimension_numbers = #tpu.dot_dimension_numbers<[1], [1], [0], [0], [0, 0, 1, 0], [], []>} : vector<16x32xbf16>, vector<16x32xbf16>, vector<16x16xf32> -> vector<16x16xf32>
    %319 = arith.addf %318, %9 : vector<16x16xf32>
    %cst_94 = arith.constant dense<0xFF800000> : vector<16xf32>
    %320 = vector.multi_reduction <maximumf>, %319, %cst_94 [1] : vector<16x16xf32> to vector<16xf32>
    %321 = vector.shape_cast %320 : vector<16xf32> to vector<16x1xf32>
    %322 = vector.broadcast %321 : vector<16x1xf32> to vector<16x16xf32>
    %323 = arith.subf %319, %322 : vector<16x16xf32>
    %324 = math.exp %323 : vector<16x16xf32>
    %cst_95 = arith.constant dense<0.000000e+00> : vector<16xf32>
    %325 = vector.multi_reduction <add>, %324, %cst_95 [1] : vector<16x16xf32> to vector<16xf32>
    %326 = vector.shape_cast %325 : vector<16xf32> to vector<16x1xf32>
    %327 = tpu.reciprocal %326 {approx = true} : vector<16x1xf32> -> vector<16x1xf32>
    %328 = vector.broadcast %327 : vector<16x1xf32> to vector<16x16xf32>
    %329 = arith.mulf %324, %328 : vector<16x16xf32>
    %330 = arith.truncf %329 : vector<16x16xf32> to vector<16x16xbf16>
    %cst_96 = arith.constant dense<0.000000e+00> : vector<16x32xf32>
    %331 = tpu.matmul %330, %317, %cst_96 {dimension_numbers = #tpu.dot_dimension_numbers<[1], [0], [0], [1], [0, 0, 1, 1], [], []>} : vector<16x16xbf16>, vector<16x32xbf16>, vector<16x32xf32> -> vector<16x32xf32>
    %332 = vector.extract_strided_slice %280 {offsets = [0, 96], sizes = [16, 32], strides = [1, 1]} : vector<32x384xbf16> to vector<16x32xbf16>
    %333 = vector.extract_strided_slice %280 {offsets = [0, 224], sizes = [16, 32], strides = [1, 1]} : vector<32x384xbf16> to vector<16x32xbf16>
    %334 = vector.extract_strided_slice %280 {offsets = [0, 352], sizes = [16, 32], strides = [1, 1]} : vector<32x384xbf16> to vector<16x32xbf16>
    %cst_97 = arith.constant dense<0.000000e+00> : vector<16x16xf32>
    %335 = tpu.matmul %332, %333, %cst_97 {dimension_numbers = #tpu.dot_dimension_numbers<[1], [1], [0], [0], [0, 0, 1, 0], [], []>} : vector<16x32xbf16>, vector<16x32xbf16>, vector<16x16xf32> -> vector<16x16xf32>
    %336 = arith.addf %335, %9 : vector<16x16xf32>
    %cst_98 = arith.constant dense<0xFF800000> : vector<16xf32>
    %337 = vector.multi_reduction <maximumf>, %336, %cst_98 [1] : vector<16x16xf32> to vector<16xf32>
    %338 = vector.shape_cast %337 : vector<16xf32> to vector<16x1xf32>
    %339 = vector.broadcast %338 : vector<16x1xf32> to vector<16x16xf32>
    %340 = arith.subf %336, %339 : vector<16x16xf32>
    %341 = math.exp %340 : vector<16x16xf32>
    %cst_99 = arith.constant dense<0.000000e+00> : vector<16xf32>
    %342 = vector.multi_reduction <add>, %341, %cst_99 [1] : vector<16x16xf32> to vector<16xf32>
    %343 = vector.shape_cast %342 : vector<16xf32> to vector<16x1xf32>
    %344 = tpu.reciprocal %343 {approx = true} : vector<16x1xf32> -> vector<16x1xf32>
    %345 = vector.broadcast %344 : vector<16x1xf32> to vector<16x16xf32>
    %346 = arith.mulf %341, %345 : vector<16x16xf32>
    %347 = arith.truncf %346 : vector<16x16xf32> to vector<16x16xbf16>
    %cst_100 = arith.constant dense<0.000000e+00> : vector<16x32xf32>
    %348 = tpu.matmul %347, %334, %cst_100 {dimension_numbers = #tpu.dot_dimension_numbers<[1], [0], [0], [1], [0, 0, 1, 1], [], []>} : vector<16x16xbf16>, vector<16x32xbf16>, vector<16x32xf32> -> vector<16x32xf32>
    %349 = tpu.concatenate %297, %314, %331, %348 in 1 : vector<16x32xf32>, vector<16x32xf32>, vector<16x32xf32>, vector<16x32xf32> -> vector<16x128xf32>
    %350 = vector.extract_strided_slice %280 {offsets = [16, 0], sizes = [16, 32], strides = [1, 1]} : vector<32x384xbf16> to vector<16x32xbf16>
    %351 = vector.extract_strided_slice %280 {offsets = [16, 128], sizes = [16, 32], strides = [1, 1]} : vector<32x384xbf16> to vector<16x32xbf16>
    %352 = vector.extract_strided_slice %280 {offsets = [16, 256], sizes = [16, 32], strides = [1, 1]} : vector<32x384xbf16> to vector<16x32xbf16>
    %cst_101 = arith.constant dense<0.000000e+00> : vector<16x16xf32>
    %353 = tpu.matmul %350, %351, %cst_101 {dimension_numbers = #tpu.dot_dimension_numbers<[1], [1], [0], [0], [0, 0, 1, 0], [], []>} : vector<16x32xbf16>, vector<16x32xbf16>, vector<16x16xf32> -> vector<16x16xf32>
    %354 = arith.addf %353, %17 : vector<16x16xf32>
    %cst_102 = arith.constant dense<0xFF800000> : vector<16xf32>
    %355 = vector.multi_reduction <maximumf>, %354, %cst_102 [1] : vector<16x16xf32> to vector<16xf32>
    %356 = vector.shape_cast %355 : vector<16xf32> to vector<16x1xf32>
    %357 = vector.broadcast %356 : vector<16x1xf32> to vector<16x16xf32>
    %358 = arith.subf %354, %357 : vector<16x16xf32>
    %359 = math.exp %358 : vector<16x16xf32>
    %cst_103 = arith.constant dense<0.000000e+00> : vector<16xf32>
    %360 = vector.multi_reduction <add>, %359, %cst_103 [1] : vector<16x16xf32> to vector<16xf32>
    %361 = vector.shape_cast %360 : vector<16xf32> to vector<16x1xf32>
    %362 = tpu.reciprocal %361 {approx = true} : vector<16x1xf32> -> vector<16x1xf32>
    %363 = vector.broadcast %362 : vector<16x1xf32> to vector<16x16xf32>
    %364 = arith.mulf %359, %363 : vector<16x16xf32>
    %365 = arith.truncf %364 : vector<16x16xf32> to vector<16x16xbf16>
    %cst_104 = arith.constant dense<0.000000e+00> : vector<16x32xf32>
    %366 = tpu.matmul %365, %352, %cst_104 {dimension_numbers = #tpu.dot_dimension_numbers<[1], [0], [0], [1], [0, 0, 1, 1], [], []>} : vector<16x16xbf16>, vector<16x32xbf16>, vector<16x32xf32> -> vector<16x32xf32>
    %367 = vector.extract_strided_slice %280 {offsets = [16, 32], sizes = [16, 32], strides = [1, 1]} : vector<32x384xbf16> to vector<16x32xbf16>
    %368 = vector.extract_strided_slice %280 {offsets = [16, 160], sizes = [16, 32], strides = [1, 1]} : vector<32x384xbf16> to vector<16x32xbf16>
    %369 = vector.extract_strided_slice %280 {offsets = [16, 288], sizes = [16, 32], strides = [1, 1]} : vector<32x384xbf16> to vector<16x32xbf16>
    %cst_105 = arith.constant dense<0.000000e+00> : vector<16x16xf32>
    %370 = tpu.matmul %367, %368, %cst_105 {dimension_numbers = #tpu.dot_dimension_numbers<[1], [1], [0], [0], [0, 0, 1, 0], [], []>} : vector<16x32xbf16>, vector<16x32xbf16>, vector<16x16xf32> -> vector<16x16xf32>
    %371 = arith.addf %370, %17 : vector<16x16xf32>
    %cst_106 = arith.constant dense<0xFF800000> : vector<16xf32>
    %372 = vector.multi_reduction <maximumf>, %371, %cst_106 [1] : vector<16x16xf32> to vector<16xf32>
    %373 = vector.shape_cast %372 : vector<16xf32> to vector<16x1xf32>
    %374 = vector.broadcast %373 : vector<16x1xf32> to vector<16x16xf32>
    %375 = arith.subf %371, %374 : vector<16x16xf32>
    %376 = math.exp %375 : vector<16x16xf32>
    %cst_107 = arith.constant dense<0.000000e+00> : vector<16xf32>
    %377 = vector.multi_reduction <add>, %376, %cst_107 [1] : vector<16x16xf32> to vector<16xf32>
    %378 = vector.shape_cast %377 : vector<16xf32> to vector<16x1xf32>
    %379 = tpu.reciprocal %378 {approx = true} : vector<16x1xf32> -> vector<16x1xf32>
    %380 = vector.broadcast %379 : vector<16x1xf32> to vector<16x16xf32>
    %381 = arith.mulf %376, %380 : vector<16x16xf32>
    %382 = arith.truncf %381 : vector<16x16xf32> to vector<16x16xbf16>
    %cst_108 = arith.constant dense<0.000000e+00> : vector<16x32xf32>
    %383 = tpu.matmul %382, %369, %cst_108 {dimension_numbers = #tpu.dot_dimension_numbers<[1], [0], [0], [1], [0, 0, 1, 1], [], []>} : vector<16x16xbf16>, vector<16x32xbf16>, vector<16x32xf32> -> vector<16x32xf32>
    %384 = vector.extract_strided_slice %280 {offsets = [16, 64], sizes = [16, 32], strides = [1, 1]} : vector<32x384xbf16> to vector<16x32xbf16>
    %385 = vector.extract_strided_slice %280 {offsets = [16, 192], sizes = [16, 32], strides = [1, 1]} : vector<32x384xbf16> to vector<16x32xbf16>
    %386 = vector.extract_strided_slice %280 {offsets = [16, 320], sizes = [16, 32], strides = [1, 1]} : vector<32x384xbf16> to vector<16x32xbf16>
    %cst_109 = arith.constant dense<0.000000e+00> : vector<16x16xf32>
    %387 = tpu.matmul %384, %385, %cst_109 {dimension_numbers = #tpu.dot_dimension_numbers<[1], [1], [0], [0], [0, 0, 1, 0], [], []>} : vector<16x32xbf16>, vector<16x32xbf16>, vector<16x16xf32> -> vector<16x16xf32>
    %388 = arith.addf %387, %17 : vector<16x16xf32>
    %cst_110 = arith.constant dense<0xFF800000> : vector<16xf32>
    %389 = vector.multi_reduction <maximumf>, %388, %cst_110 [1] : vector<16x16xf32> to vector<16xf32>
    %390 = vector.shape_cast %389 : vector<16xf32> to vector<16x1xf32>
    %391 = vector.broadcast %390 : vector<16x1xf32> to vector<16x16xf32>
    %392 = arith.subf %388, %391 : vector<16x16xf32>
    %393 = math.exp %392 : vector<16x16xf32>
    %cst_111 = arith.constant dense<0.000000e+00> : vector<16xf32>
    %394 = vector.multi_reduction <add>, %393, %cst_111 [1] : vector<16x16xf32> to vector<16xf32>
    %395 = vector.shape_cast %394 : vector<16xf32> to vector<16x1xf32>
    %396 = tpu.reciprocal %395 {approx = true} : vector<16x1xf32> -> vector<16x1xf32>
    %397 = vector.broadcast %396 : vector<16x1xf32> to vector<16x16xf32>
    %398 = arith.mulf %393, %397 : vector<16x16xf32>
    %399 = arith.truncf %398 : vector<16x16xf32> to vector<16x16xbf16>
    %cst_112 = arith.constant dense<0.000000e+00> : vector<16x32xf32>
    %400 = tpu.matmul %399, %386, %cst_112 {dimension_numbers = #tpu.dot_dimension_numbers<[1], [0], [0], [1], [0, 0, 1, 1], [], []>} : vector<16x16xbf16>, vector<16x32xbf16>, vector<16x32xf32> -> vector<16x32xf32>
    %401 = vector.extract_strided_slice %280 {offsets = [16, 96], sizes = [16, 32], strides = [1, 1]} : vector<32x384xbf16> to vector<16x32xbf16>
    %402 = vector.extract_strided_slice %280 {offsets = [16, 224], sizes = [16, 32], strides = [1, 1]} : vector<32x384xbf16> to vector<16x32xbf16>
    %403 = vector.extract_strided_slice %280 {offsets = [16, 352], sizes = [16, 32], strides = [1, 1]} : vector<32x384xbf16> to vector<16x32xbf16>
    %cst_113 = arith.constant dense<0.000000e+00> : vector<16x16xf32>
    %404 = tpu.matmul %401, %402, %cst_113 {dimension_numbers = #tpu.dot_dimension_numbers<[1], [1], [0], [0], [0, 0, 1, 0], [], []>} : vector<16x32xbf16>, vector<16x32xbf16>, vector<16x16xf32> -> vector<16x16xf32>
    %405 = arith.addf %404, %17 : vector<16x16xf32>
    %cst_114 = arith.constant dense<0xFF800000> : vector<16xf32>
    %406 = vector.multi_reduction <maximumf>, %405, %cst_114 [1] : vector<16x16xf32> to vector<16xf32>
    %407 = vector.shape_cast %406 : vector<16xf32> to vector<16x1xf32>
    %408 = vector.broadcast %407 : vector<16x1xf32> to vector<16x16xf32>
    %409 = arith.subf %405, %408 : vector<16x16xf32>
    %410 = math.exp %409 : vector<16x16xf32>
    %cst_115 = arith.constant dense<0.000000e+00> : vector<16xf32>
    %411 = vector.multi_reduction <add>, %410, %cst_115 [1] : vector<16x16xf32> to vector<16xf32>
    %412 = vector.shape_cast %411 : vector<16xf32> to vector<16x1xf32>
    %413 = tpu.reciprocal %412 {approx = true} : vector<16x1xf32> -> vector<16x1xf32>
    %414 = vector.broadcast %413 : vector<16x1xf32> to vector<16x16xf32>
    %415 = arith.mulf %410, %414 : vector<16x16xf32>
    %416 = arith.truncf %415 : vector<16x16xf32> to vector<16x16xbf16>
    %cst_116 = arith.constant dense<0.000000e+00> : vector<16x32xf32>
    %417 = tpu.matmul %416, %403, %cst_116 {dimension_numbers = #tpu.dot_dimension_numbers<[1], [0], [0], [1], [0, 0, 1, 1], [], []>} : vector<16x16xbf16>, vector<16x32xbf16>, vector<16x32xf32> -> vector<16x32xf32>
    %418 = tpu.concatenate %366, %383, %400, %417 in 1 : vector<16x32xf32>, vector<16x32xf32>, vector<16x32xf32>, vector<16x32xf32> -> vector<16x128xf32>
    %419 = tpu.concatenate %349, %418 in 0 : vector<16x128xf32>, vector<16x128xf32> -> vector<32x128xf32>
    %420 = arith.truncf %419 : vector<32x128xf32> to vector<32x128xbf16>
    %c1_117 = arith.constant 1 : index
    %c0_118 = arith.constant 0 : index
    %c0_119 = arith.constant 0 : index
    %421 = vector.load %arg4[%c1_117, %c0_118, %c0_119] : memref<2x128x128xbf16, #tpu.memory_space<vmem>>, vector<1x128x128xbf16>
    %422 = vector.shape_cast %421 : vector<1x128x128xbf16> to vector<128x128xbf16>
    %cst_120 = arith.constant dense<0.000000e+00> : vector<32x128xf32>
    %423 = tpu.matmul %420, %422, %cst_120 {dimension_numbers = #tpu.dot_dimension_numbers<[1], [0], [0], [1], [0, 0, 1, 1], [], []>} : vector<32x128xbf16>, vector<128x128xbf16>, vector<32x128xf32> -> vector<32x128xf32>
    %424 = vector.extract_strided_slice %272 {offsets = [1, 0], sizes = [1, 128], strides = [1, 1]} : vector<8x512xf32> to vector<1x128xf32>
    %425 = vector.broadcast %424 : vector<1x128xf32> to vector<32x128xf32>
    %426 = arith.addf %423, %425 : vector<32x128xf32>
    %427 = arith.addf %426, %270 : vector<32x128xf32>
    %428 = vector.extract_strided_slice %272 {offsets = [2, 0], sizes = [1, 128], strides = [1, 1]} : vector<8x512xf32> to vector<1x128xf32>
    %429 = vector.extract_strided_slice %272 {offsets = [3, 0], sizes = [1, 128], strides = [1, 1]} : vector<8x512xf32> to vector<1x128xf32>
    %cst_121 = arith.constant dense<0.000000e+00> : vector<32xf32>
    %430 = vector.multi_reduction <add>, %427, %cst_121 [1] : vector<32x128xf32> to vector<32xf32>
    %431 = vector.shape_cast %430 : vector<32xf32> to vector<32x1xf32>
    %cst_122 = arith.constant 1.280000e+02 : f32
    %432 = vector.broadcast %cst_122 : f32 to vector<32x1xf32>
    %433 = arith.divf %431, %432 : vector<32x1xf32>
    %434 = vector.broadcast %433 : vector<32x1xf32> to vector<32x128xf32>
    %435 = arith.subf %427, %434 : vector<32x128xf32>
    %436 = arith.mulf %435, %435 : vector<32x128xf32>
    %cst_123 = arith.constant dense<0.000000e+00> : vector<32xf32>
    %437 = vector.multi_reduction <add>, %436, %cst_123 [1] : vector<32x128xf32> to vector<32xf32>
    %438 = vector.shape_cast %437 : vector<32xf32> to vector<32x1xf32>
    %cst_124 = arith.constant 1.280000e+02 : f32
    %439 = vector.broadcast %cst_124 : f32 to vector<32x1xf32>
    %440 = arith.divf %438, %439 : vector<32x1xf32>
    %cst_125 = arith.constant 9.99999996E-13 : f32
    %441 = vector.broadcast %cst_125 : f32 to vector<32x1xf32>
    %442 = arith.addf %440, %441 : vector<32x1xf32>
    %443 = math.rsqrt %442 : vector<32x1xf32>
    %444 = vector.broadcast %443 : vector<32x1xf32> to vector<32x128xf32>
    %445 = arith.mulf %435, %444 : vector<32x128xf32>
    %446 = vector.broadcast %428 : vector<1x128xf32> to vector<32x128xf32>
    %447 = arith.mulf %445, %446 : vector<32x128xf32>
    %448 = vector.broadcast %429 : vector<1x128xf32> to vector<32x128xf32>
    %449 = arith.addf %447, %448 : vector<32x128xf32>
    %450 = arith.truncf %449 : vector<32x128xf32> to vector<32x128xbf16>
    %c1_126 = arith.constant 1 : index
    %c0_127 = arith.constant 0 : index
    %c0_128 = arith.constant 0 : index
    %451 = vector.load %arg5[%c1_126, %c0_127, %c0_128] : memref<2x128x512xbf16, #tpu.memory_space<vmem>>, vector<1x128x512xbf16>
    %452 = vector.shape_cast %451 : vector<1x128x512xbf16> to vector<128x512xbf16>
    %cst_129 = arith.constant dense<0.000000e+00> : vector<32x512xf32>
    %453 = tpu.matmul %450, %452, %cst_129 {dimension_numbers = #tpu.dot_dimension_numbers<[1], [0], [0], [1], [0, 0, 1, 1], [], []>} : vector<32x128xbf16>, vector<128x512xbf16>, vector<32x512xf32> -> vector<32x512xf32>
    %454 = vector.extract_strided_slice %272 {offsets = [4, 0], sizes = [1, 512], strides = [1, 1]} : vector<8x512xf32> to vector<1x512xf32>
    %455 = vector.broadcast %454 : vector<1x512xf32> to vector<32x512xf32>
    %456 = arith.addf %453, %455 : vector<32x512xf32>
    %cst_130 = arith.constant 5.000000e-01 : f32
    %457 = vector.broadcast %cst_130 : f32 to vector<32x512xf32>
    %458 = arith.mulf %457, %456 : vector<32x512xf32>
    %cst_131 = arith.constant 4.471500e-02 : f32
    %459 = vector.broadcast %cst_131 : f32 to vector<32x512xf32>
    %460 = arith.mulf %459, %456 : vector<32x512xf32>
    %461 = arith.mulf %460, %456 : vector<32x512xf32>
    %462 = arith.mulf %461, %456 : vector<32x512xf32>
    %463 = arith.addf %456, %462 : vector<32x512xf32>
    %cst_132 = arith.constant 0.797884583 : f32
    %464 = vector.broadcast %cst_132 : f32 to vector<32x512xf32>
    %465 = arith.mulf %464, %463 : vector<32x512xf32>
    %466 = math.tanh %465 : vector<32x512xf32>
    %cst_133 = arith.constant 1.000000e+00 : f32
    %467 = vector.broadcast %cst_133 : f32 to vector<32x512xf32>
    %468 = arith.addf %467, %466 : vector<32x512xf32>
    %469 = arith.mulf %458, %468 : vector<32x512xf32>
    %470 = arith.truncf %469 : vector<32x512xf32> to vector<32x512xbf16>
    %c1_134 = arith.constant 1 : index
    %c0_135 = arith.constant 0 : index
    %c0_136 = arith.constant 0 : index
    %471 = vector.load %arg6[%c1_134, %c0_135, %c0_136] : memref<2x512x128xbf16, #tpu.memory_space<vmem>>, vector<1x512x128xbf16>
    %472 = vector.shape_cast %471 : vector<1x512x128xbf16> to vector<512x128xbf16>
    %cst_137 = arith.constant dense<0.000000e+00> : vector<32x128xf32>
    %473 = tpu.matmul %470, %472, %cst_137 {dimension_numbers = #tpu.dot_dimension_numbers<[1], [0], [0], [1], [0, 0, 1, 1], [], []>} : vector<32x512xbf16>, vector<512x128xbf16>, vector<32x128xf32> -> vector<32x128xf32>
    %474 = vector.extract_strided_slice %272 {offsets = [5, 0], sizes = [1, 128], strides = [1, 1]} : vector<8x512xf32> to vector<1x128xf32>
    %475 = vector.broadcast %474 : vector<1x128xf32> to vector<32x128xf32>
    %476 = arith.addf %473, %475 : vector<32x128xf32>
    %477 = arith.addf %476, %449 : vector<32x128xf32>
    %478 = vector.extract_strided_slice %272 {offsets = [6, 0], sizes = [1, 128], strides = [1, 1]} : vector<8x512xf32> to vector<1x128xf32>
    %479 = vector.extract_strided_slice %272 {offsets = [7, 0], sizes = [1, 128], strides = [1, 1]} : vector<8x512xf32> to vector<1x128xf32>
    %cst_138 = arith.constant dense<0.000000e+00> : vector<32xf32>
    %480 = vector.multi_reduction <add>, %477, %cst_138 [1] : vector<32x128xf32> to vector<32xf32>
    %481 = vector.shape_cast %480 : vector<32xf32> to vector<32x1xf32>
    %cst_139 = arith.constant 1.280000e+02 : f32
    %482 = vector.broadcast %cst_139 : f32 to vector<32x1xf32>
    %483 = arith.divf %481, %482 : vector<32x1xf32>
    %484 = vector.broadcast %483 : vector<32x1xf32> to vector<32x128xf32>
    %485 = arith.subf %477, %484 : vector<32x128xf32>
    %486 = arith.mulf %485, %485 : vector<32x128xf32>
    %cst_140 = arith.constant dense<0.000000e+00> : vector<32xf32>
    %487 = vector.multi_reduction <add>, %486, %cst_140 [1] : vector<32x128xf32> to vector<32xf32>
    %488 = vector.shape_cast %487 : vector<32xf32> to vector<32x1xf32>
    %cst_141 = arith.constant 1.280000e+02 : f32
    %489 = vector.broadcast %cst_141 : f32 to vector<32x1xf32>
    %490 = arith.divf %488, %489 : vector<32x1xf32>
    %cst_142 = arith.constant 9.99999996E-13 : f32
    %491 = vector.broadcast %cst_142 : f32 to vector<32x1xf32>
    %492 = arith.addf %490, %491 : vector<32x1xf32>
    %493 = math.rsqrt %492 : vector<32x1xf32>
    %494 = vector.broadcast %493 : vector<32x1xf32> to vector<32x128xf32>
    %495 = arith.mulf %485, %494 : vector<32x128xf32>
    %496 = vector.broadcast %478 : vector<1x128xf32> to vector<32x128xf32>
    %497 = arith.mulf %495, %496 : vector<32x128xf32>
    %498 = vector.broadcast %479 : vector<1x128xf32> to vector<32x128xf32>
    %499 = arith.addf %497, %498 : vector<32x128xf32>
    %500 = vector.extract_strided_slice %499 {offsets = [0, 0], sizes = [1, 128], strides = [1, 1]} : vector<32x128xf32> to vector<1x128xf32>
    %501 = vector.extract_strided_slice %499 {offsets = [16, 0], sizes = [1, 128], strides = [1, 1]} : vector<32x128xf32> to vector<1x128xf32>
    %502 = tpu.concatenate %500, %501 in 0 : vector<1x128xf32>, vector<1x128xf32> -> vector<2x128xf32>
    %503 = arith.truncf %502 : vector<2x128xf32> to vector<2x128xbf16>
    %c0_143 = arith.constant 0 : index
    %c0_144 = arith.constant 0 : index
    %504 = vector.load %arg9[%c0_143, %c0_144] : memref<128x128xbf16, #tpu.memory_space<vmem>>, vector<128x128xbf16>
    %cst_145 = arith.constant dense<0.000000e+00> : vector<2x128xf32>
    %505 = tpu.matmul %503, %504, %cst_145 {dimension_numbers = #tpu.dot_dimension_numbers<[1], [0], [0], [1], [0, 0, 1, 1], [], []>} : vector<2x128xbf16>, vector<128x128xbf16>, vector<2x128xf32> -> vector<2x128xf32>
    %c2 = arith.constant 2 : index
    %c0_146 = arith.constant 0 : index
    %506 = vector.load %arg8[%c2, %c0_146] : memref<3x128xf32, #tpu.memory_space<vmem>>, vector<1x128xf32>
    %507 = vector.broadcast %506 : vector<1x128xf32> to vector<2x128xf32>
    %508 = arith.addf %505, %507 : vector<2x128xf32>
    %509 = vector.shape_cast %508 : vector<2x128xf32> to vector<2x1x128xf32>
    %c0_147 = arith.constant 0 : index
    %c0_148 = arith.constant 0 : index
    %c0_149 = arith.constant 0 : index
    %510 = vector.load %arg10[%c0_147, %c0_148, %c0_149] : memref<2x1x128xf32, #tpu.memory_space<vmem>>, vector<2x1x128xf32>
    tpu.vector_store %arg10[%c0_147, %c0_148, %c0_149], %509 {strides = array<i32>} : memref<2x1x128xf32, #tpu.memory_space<vmem>>, vector<2x1x128xf32>,
    return
  }
  func.func @transform_0(%arg0: i32, %arg1: memref<2xi32, #tpu.memory_space<smem>>) -> (i32, i32, i32) {
    %c0_i32 = arith.constant 0 : i32
    %c0_i32_0 = arith.constant 0 : i32
    %c0_i32_1 = arith.constant 0 : i32
    return %arg0, %c0_i32, %c0_i32_0 : i32, i32, i32
  }
  func.func @transform_1(%arg0: i32, %arg1: memref<2xi32, #tpu.memory_space<smem>>) -> (i32, i32, i32) {
    %c0_i32 = arith.constant 0 : i32
    %c0_i32_0 = arith.constant 0 : i32
    %c0_i32_1 = arith.constant 0 : i32
    %c0_i32_2 = arith.constant 0 : i32
    return %c0_i32, %c0_i32_0, %c0_i32_1 : i32, i32, i32
  }
  func.func @transform_2(%arg0: i32, %arg1: memref<2xi32, #tpu.memory_space<smem>>) -> (i32, i32, i32) {
    %c0_i32 = arith.constant 0 : i32
    %c0_i32_0 = arith.constant 0 : i32
    %c0_i32_1 = arith.constant 0 : i32
    %c0_i32_2 = arith.constant 0 : i32
    return %c0_i32, %c0_i32_0, %c0_i32_1 : i32, i32, i32
  }
  func.func @transform_3(%arg0: i32, %arg1: memref<2xi32, #tpu.memory_space<smem>>) -> (i32, i32, i32) {
    %c0_i32 = arith.constant 0 : i32
    %c0_i32_0 = arith.constant 0 : i32
    %c0_i32_1 = arith.constant 0 : i32
    %c0_i32_2 = arith.constant 0 : i32
    return %c0_i32, %c0_i32_0, %c0_i32_1 : i32, i32, i32
  }
  func.func @transform_4(%arg0: i32, %arg1: memref<2xi32, #tpu.memory_space<smem>>) -> (i32, i32, i32) {
    %c0_i32 = arith.constant 0 : i32
    %c0_i32_0 = arith.constant 0 : i32
    %c0_i32_1 = arith.constant 0 : i32
    %c0_i32_2 = arith.constant 0 : i32
    return %c0_i32, %c0_i32_0, %c0_i32_1 : i32, i32, i32
  }
  func.func @transform_5(%arg0: i32, %arg1: memref<2xi32, #tpu.memory_space<smem>>) -> (i32, i32, i32) {
    %c0_i32 = arith.constant 0 : i32
    %c0_i32_0 = arith.constant 0 : i32
    %c0_i32_1 = arith.constant 0 : i32
    %c0_i32_2 = arith.constant 0 : i32
    return %c0_i32, %c0_i32_0, %c0_i32_1 : i32, i32, i32
  }
  func.func @transform_6(%arg0: i32, %arg1: memref<2xi32, #tpu.memory_space<smem>>) -> (i32, i32) {
    %c0_i32 = arith.constant 0 : i32
    %c0_i32_0 = arith.constant 0 : i32
    %c0_i32_1 = arith.constant 0 : i32
    return %c0_i32, %c0_i32_0 : i32, i32
  }
  func.func @transform_7(%arg0: i32, %arg1: memref<2xi32, #tpu.memory_space<smem>>) -> (i32, i32) {
    %c0_i32 = arith.constant 0 : i32
    %c0_i32_0 = arith.constant 0 : i32
    %c0_i32_1 = arith.constant 0 : i32
    return %c0_i32, %c0_i32_0 : i32, i32
  }
  func.func @transform_8(%arg0: i32, %arg1: memref<2xi32, #tpu.memory_space<smem>>) -> (i32, i32, i32) {
    %c0_i32 = arith.constant 0 : i32
    %c0_i32_0 = arith.constant 0 : i32
    %c0_i32_1 = arith.constant 0 : i32
    return %arg0, %c0_i32, %c0_i32_0 : i32, i32, i32
  }
}

</mosaic_0001>

<bundles_post_ra>
// kernel: _lambda_.1
= control target key start
LH: loop header
LB: loop body
LE: loop exit
PB: predicated region body
PF: predicated region fallthrough
CT: control target
= control target key end

     0   :  { %s8313_s0 = inlined_call_operand.vmem [shape: s32[2], index: 0, kind: input, shape index: {}]   ;;  %s8314_s1 = inlined_call_operand.vmem [shape: f32[2,16,128], index: 1, kind: input, shape index: {}]   ;;  %s8315_s2 = inlined_call_operand.vmem [shape: bf16[2,128,384], index: 2, kind: input, shape index: {}]   ;;  %s8316_s3 = inlined_call_operand.vmem [shape: bf16[2,128,128], index: 3, kind: input, shape index: {}]   ;;  %s8317_s4 = inlined_call_operand.vmem [shape: bf16[2,128,512], index: 4, kind: input, shape index: {}]   ;;  %s8318_s5 = inlined_call_operand.vmem [shape: bf16[2,512,128], index: 5, kind: input, shape index: {}]   ;;  %s8319_s6 = inlined_call_operand.vmem [shape: f32[2,8,512], index: 6, kind: input, shape index: {}]   ;;  %s8320_s7 = inlined_call_operand.vmem [shape: f32[3,128], index: 7, kind: input, shape index: {}]   ;;  %s8321_s8 = inlined_call_operand.vmem [shape: bf16[128,128], index: 8, kind: input, shape index: {}]   ;;  %s8322_s9 = inlined_call_operand.hbm [shape: f32[2,1,128], index: 9, kind: output, shape index: {}]  }
   0x1   :  { %s14_s11 = sshll.u32 %s8313_s0, 4  ;;  %s15_s11 = int_to_ptr.vmem [resolvable:$true] %s14_s11 }
   0x2   :  { %s6468_s12 = scalar_lea.vmem %s15_s11, 16  ;;  %p6473_p1 = scmp.lt.s32.totalorder %s15_s11, %s15_s11 }
   0x3   :  { %p6469_p0 = scmp.ne.s32.totalorder %s15_s11, %s6468_s12  ;;  %p6474_p2 = scmp.lt.s32.totalorder %s6468_s12, %s6468_s12 }
   0x5   :  { %p6475_p3 = por %p6474_p2, %p6473_p1 }
   0x7   :  { %p6476_p4 = pnand %p6475_p3, %p6469_p0 }
   0x9   :  { %6479 = shalt.err (!%p6476_p4)  }
   0xa   :  { %s6506_s13 = smov [#allocation3]  }
   0xb   :  { %17 = dma.vmem_to_smem %s15_s11, 16, %s6506_s13, [#allocation2] }
   0xc   :  { %6502 = dma.done.wait [#allocation2], 16 }
   0xd   :  { %6503 = vsyncadd [#allocation2], 4294967280 }
   0xe   :  { %19 = sfence }
   0xf   :  { %v50_v0 = vld [vmem:[%s8314_s1] sm:$0xff]  ;;  %v52_v1 = vld [vmem:[%s8314_s1 + $0x10] sm:$0xff]  ;;  %v51_v2 = vld [vmem:[%s8314_s1 + $0x8] sm:$0xff] }
  0x10   :  { %56 = vadd.xlane.f32.xlu0 %v50_v0  ;;  %60 = vadd.xlane.f32.xlu1 %v52_v1  ;;  %v53_v3 = vld [vmem:[%s8314_s1 + $0x18] sm:$0xff]  ;;  %v5985_v4 = vld [vmem:[%s8315_s2 + $0x4] ss:$12 sps:$4 sm:$0xff]   ;;  %v5987_v5 = vld [vmem:[%s8315_s2] ss:$12 sps:$4 sm:$0xff]  }
  0x11   :  { %v5988_v6 = vld [vmem:[%s8315_s2 + $0x1c] ss:$12 sps:$4 sm:$0xff]   ;;  %295 = vmatprep.subr.bf16.mxu0 %v5985_v4 }
  0x12   :  { %v5990_v7 = vld [vmem:[%s8315_s2 + $0x8] ss:$12 sps:$4 sm:$0xff]   ;;  %296 = vmatpush1.bf16.msra.mxu0 %v5987_v5 }
  0x13   :  { %5621 = vmatprep.subr.bf16.mxu1 %v5990_v7  ;;  %297 = vmatprep.subr.bf16.mxu0 %v5988_v6 }
  0x14   :  { %58 = vadd.xlane.f32.xlu0 %v51_v2  ;;  %62 = vadd.xlane.f32.xlu1 %v53_v3 }
  0x15   :  { %5622 = vmatpush3.bf16.msra.mxu1 %v5990_v7 }
  0x16   :  { %20 = vsyncpa [#allocation5], 0  ;;  %v5991_v24 = vld [vmem:[%s8315_s2 + $0x18] ss:$12 sps:$4 sm:$0xff]   ;;  %v5992_v25 = vld [vmem:[%s8315_s2 + $0x34] ss:$12 sps:$4 sm:$0xff]  }
  0x17   :  { %298 = vmatpush1.bf16.msra.mxu0 %v5991_v24  ;;  %v5994_v26 = vld [vmem:[%s8315_s2 + $0x20] ss:$12 sps:$4 sm:$0xff]   ;;  %v5995_v27 = vld [vmem:[%s8315_s2 + $0x30] ss:$12 sps:$4 sm:$0xff]   ;;  %v5998_v29 = vld [vmem:[%s8315_s2 + $0x38] ss:$12 sps:$4 sm:$0xff]  }
  0x18   :  { %299 = vmatprep.subr.bf16.mxu0 %v5992_v25  ;;  %5623 = vmatprep.subr.bf16.mxu1 %v5994_v26  ;;  %v5996_v28 = vld [vmem:[%s8315_s2 + $0x4c] ss:$12 sps:$4 sm:$0xff]   ;;  %v5999_v30 = vld [vmem:[%s8315_s2 + $0x48] ss:$12 sps:$4 sm:$0xff]   ;;  %v6000_v31 = vld [vmem:[%s8315_s2 + $0x64] ss:$12 sps:$4 sm:$0xff]  }
  0x19   :  { %5624 = vmatpush3.bf16.msra.mxu1 %v5994_v26  ;;  %v6002_v32 = vld [vmem:[%s8315_s2 + $0x50] ss:$12 sps:$4 sm:$0xff]   ;;  %v6003_v33 = vld [vmem:[%s8315_s2 + $0x60] ss:$12 sps:$4 sm:$0xff]   ;;  %v6006_v35 = vld [vmem:[%s8315_s2 + $0x68] ss:$12 sps:$4 sm:$0xff]  }
  0x1a   :  { %5625 = vmatprep.subr.bf16.mxu1 %v5998_v29  ;;  %v6004_v34 = vld [vmem:[%s8315_s2 + $0x7c] ss:$12 sps:$4 sm:$0xff]   ;;  %v6007_v36 = vld [vmem:[%s8315_s2 + $0x78] ss:$12 sps:$4 sm:$0xff]   ;;  %v6008_v37 = vld [vmem:[%s8315_s2 + $0x94] ss:$12 sps:$4 sm:$0xff]  }
  0x1b   :  { %300 = vmatpush1.bf16.msra.mxu0 %v5995_v27  ;;  %v6010_v38 = vld [vmem:[%s8315_s2 + $0x80] ss:$12 sps:$4 sm:$0xff]   ;;  %v6507_v39 = vmov 0   ;;  %v6011_v40 = vld [vmem:[%s8315_s2 + $0x90] ss:$12 sps:$4 sm:$0xff]   ;;  %vm6509_vm0 = vmmov 0  }
  0x1c   :  { %301 = vmatprep.subr.bf16.mxu0 %v5996_v28  ;;  %327 = vmatprep.mubr.bf16.mxu0 %v6507_v39  ;;  %v6012_v41 = vld [vmem:[%s8315_s2 + $0xac] ss:$12 sps:$4 sm:$0xff]   ;;  %v6015_v43 = vld [vmem:[%s8315_s2 + $0xa8] ss:$12 sps:$4 sm:$0xff]   ;;  %v6016_v44 = vld [vmem:[%s8315_s2 + $0xb0] ss:$12 sps:$4 sm:$0xff]  }
  0x1d   :  { %5626 = vmatpush3.bf16.msra.mxu1 %v5998_v29  ;;  %v6014_v42 = vld [vmem:[%s8315_s2 + $0x98] ss:$12 sps:$4 sm:$0xff]   ;;  %v5011_v59 = vld [vmem:[%s8320_s7] ss:$0 sm:$0xff]  ;;  %vm403_vm1 = vcmask 261120   ;;  %s6510_s11 = smov 96  }
  0x1e   :  { %5627 = vmatprep.subr.bf16.mxu1 %v6002_v32  ;;  %s6511_s12 = smov 64   ;;  %s6512_s13 = smov 32   ;;  %vm451_vm3 = vcmask 130048   ;;  %vm911_vm5 = vcmask 523264   ;;  %vm914_vm6 = vcmask 785408   ;;  %vm4855_vm7 = vcmask 1040384  }
  0x1f   :  { %302 = vmatpush1.bf16.msra.mxu0 %v5999_v30  ;;  %s41_s14 = sld [smem:[#allocation3]]  ;;  %s5010_s15 = sld [smem:[#allocation3 + $0x1]] }
  0x20   :  { %303 = vmatprep.subr.bf16.mxu0 %v6000_v31  ;;  %s6515_s16 = smov [#allocation4]  }
  0x21   :  { %5628 = vmatpush3.bf16.msra.mxu1 %v6002_v32 }
  0x22   :  { %5629 = vmatprep.subr.bf16.mxu1 %v6006_v35 }
  0x23   :  { %304 = vmatpush1.bf16.msra.mxu0 %v6003_v33 }
  0x24   :  { %305 = vmatprep.subr.bf16.mxu0 %v6004_v34 }
  0x25   :  { %5630 = vmatpush3.bf16.msra.mxu1 %v6006_v35 }
  0x26   :  { %5631 = vmatprep.subr.bf16.mxu1 %v6010_v38 }
  0x27   :  { %306 = vmatpush1.bf16.msra.mxu0 %v6007_v36 }
  0x28   :  { %307 = vmatprep.subr.bf16.mxu0 %v6008_v37 }
  0x29   :  { %5632 = vmatpush3.bf16.msra.mxu1 %v6010_v38 }
  0x2a   :  { %5633 = vmatprep.subr.bf16.mxu1 %v6014_v42 }
  0x2b   :  { %308 = vmatpush1.bf16.msra.mxu0 %v6011_v40 }
  0x2c   :  { %309 = vmatprep.subr.bf16.mxu0 %v6012_v41 }
  0x2d   :  { %5634 = vmatpush3.bf16.msra.mxu1 %v6014_v42 }
  0x2e   :  { %5635 = vmatprep.subr.bf16.mxu1 %v6016_v44 }
  0x2f   :  { %310 = vmatpush1.bf16.msra.mxu0 %v6015_v43 }
  0x31   :  { %5636 = vmatpush3.bf16.msra.mxu1 %v6016_v44 }
  0x9d   :  { %v57_v8 = vpop.xlane.xlu0 %56  ;;  %v61_v9 = vpop.xlane.xlu1 %60 }
  0x9e   :  { %v65_v10 = vmul.f32 0.0078125, %v57_v8  ;;  %v67_v11 = vmul.f32 0.0078125, %v61_v9 }
  0xa0   :  { %v6595_v12 = vsub.f32 %v50_v0, %v65_v10  ;;  %v6597_v13 = vsub.f32 %v52_v1, %v67_v11  ;;  %v5012_v0 = vld [vmem:[%s8320_s7 + $0x1] ss:$0 sm:$0xff] }
  0xa1   :  { %v59_v14 = vpop.xlane.xlu0 %58  ;;  %v63_v15 = vpop.xlane.xlu1 %62 }
  0xa2   :  { %v66_v16 = vmul.f32 0.0078125, %v59_v14  ;;  %v73_v17 = vmul.f32 %v6595_v12, %v6595_v12  ;;  %v68_v18 = vmul.f32 0.0078125, %v63_v15  ;;  %v75_v19 = vmul.f32 %v6597_v13, %v6597_v13 }
  0xa3   :  { %v39_v14 = vlaneseq }
  0xa4   :  { %77 = vadd.xlane.f32.xlu0 %v73_v17  ;;  %v6603_v20 = vsub.f32 %v51_v2, %v66_v16  ;;  %v6605_v21 = vsub.f32 %v53_v3, %v68_v18  ;;  %v117_v17 = vld [vmem:[%s8319_s6] sm:$0xff]  ;;  %v118_v18 = vld [vmem:[%s8319_s6 + $0x8] sm:$0xff] }
  0xa5   :  { %v6702_v15 = vshrl.u32 %v39_v14, 7 }
  0xa6   :  { %v74_v22 = vmul.f32 %v6603_v20, %v6603_v20  ;;  %v76_v23 = vmul.f32 %v6605_v21, %v6605_v21 }
  0xa7   :  { %v6705_v16 = vsub.s32 0, %v6702_v15 }
  0xa8   :  { %81 = vadd.xlane.f32.xlu0 %v75_v19  ;;  %79 = vadd.xlane.f32.xlu1 %v74_v22  ;;  %v119_v19 = vld [vmem:[%s8319_s6 + $0x10] sm:$0xff] }
  0xa9   :  { %v162_v22 = vrot.slane %v118_v18, %v6705_v16  ;;  %v166_v24 = vrot.slane %v119_v19, %v6705_v16  ;;  %v40_v18 = vand.u32 127, %v39_v14  ;;  %v42_v19 = vstv %s41_s14 }
  0xab   :  { %vm43_vm2 = vcmp.lt.s32.totalorder %v40_v18, %v42_v19 }
  0xac   :  { %83 = vadd.xlane.f32.xlu1 %v76_v23 }
 0x131   :  { %v78_v45 = vpop.xlane.xlu0 %77 }
 0x132   :  { %v85_v46 = vmul.f32 0.0078125, %v78_v45 }
 0x134   :  { %v89_v47 = vadd.f32 1e-12, %v85_v46 }
 0x135   :  { %v80_v48 = vpop.xlane.xlu1 %79  ;;  %v82_v49 = vpop.xlane.xlu0 %81 }
 0x136   :  { %6233 = vrsqrt.f32 %v89_v47  ;;  %v86_v50 = vmul.f32 0.0078125, %v80_v48  ;;  %v87_v51 = vmul.f32 0.0078125, %v82_v49 }
 0x138   :  { %v90_v52 = vadd.f32 1e-12, %v86_v50  ;;  %v91_v53 = vadd.f32 1e-12, %v87_v51 }
 0x139   :  { %v84_v54 = vpop.xlane.xlu1 %83 }
 0x13a   :  { %6235 = vrsqrt.f32 %v90_v52  ;;  %v88_v55 = vmul.f32 0.0078125, %v84_v54 }
 0x13b   :  { %6237 = vrsqrt.f32 %v91_v53 }
 0x13c   :  { %v92_v56 = vadd.f32 1e-12, %v88_v55 }
 0x13e   :  { %6239 = vrsqrt.f32 %v92_v56 }
 0x140   :  { %v6234_v57 = vpop.eup %6233 }
 0x141   :  { %v97_v58 = vmul.f32 %v6234_v57, %v6595_v12 }
 0x143   :  { %v105_v63 = vmul.f32 %v5011_v59, %v97_v58 }
 0x144   :  { %v6236_v60 = vpop.eup %6235 }
 0x145   :  { %v6238_v61 = vpop.eup %6237  ;;  %v98_v62 = vmul.f32 %v6236_v60, %v6603_v20  ;;  %v6681_v4 = vadd.f32 %v5012_v0, %v105_v63  ;;  %v158_v20 = vrot.slane %v117_v17, %v6705_v16 }
 0x146   :  { %v99_v1 = vmul.f32 %v6238_v61, %v6597_v13  ;;  %v6508_v13 = vmov 0.0  }
 0x147   :  { %v106_v2 = vmul.f32 %v5011_v59, %v98_v62  ;;  %5641 = vmatprep.subr.bf16.mxu1 %v6508_v13  ;;  %5647 = vmatprep.subr.bf16.mxu0 %v6508_v13 }
 0x148   :  { %v6240_v3 = vpop.eup %6239  ;;  %v107_v7 = vmul.f32 %v5011_v59, %v99_v1 }
 0x149   :  { %v6683_v5 = vadd.f32 %v5012_v0, %v106_v2  ;;  %v100_v6 = vmul.f32 %v6240_v3, %v6605_v21 }
 0x14a   :  { %v6688_v10 = vadd.f32 %v5012_v0, %v107_v7 }
 0x14b   :  { %v121_v8 = vpack.c.bf16 %v6683_v5, %v6681_v4  ;;  %v108_v9 = vmul.f32 %v5011_v59, %v100_v6 }
 0x14d   :  { %328 = vmatmul.mubr.bf16.vlgmr.msra.gmra.mrb[0].mxu0 %v121_v8  ;;  %5637 = vmatprep.mubr.bf16.mxu1 %v121_v8  ;;  %v6690_v11 = vadd.f32 %v5012_v0, %v108_v9 }
 0x14e   :  { %337 = vmatprep.mubr.bf16.mxu0 %v6507_v39 }
 0x14f   :  { %v122_v12 = vpack.c.bf16 %v6690_v11, %v6688_v10 }
 0x151   :  { %5638 = vmatmul.mubr.bf16.vlgmr.msra.gmra.mrb[0].mxu1 %v122_v12 }
 0x152   :  { %5643 = vmatprep.mubr.msk.bf16.mxu1 %vm6509_vm0, %v6508_v13 }
 0x155   :  { %338 = vmatmul.mubr.bf16.gmra.mrb[4].mxu0 %v122_v12 }
 0x156   :  { %5649 = vmatprep.mubr.msk.bf16.mxu0 %vm6509_vm0, %v6508_v13 }
 0x220   :  { %v329_v21 = vpop.f32.mrb[0].mxu0 }
 0x221   :  { %v331_v23 = vpop.f32.mrb[1].mxu0  ;;  %v330_v26 = vadd.f32 %v329_v21, %v158_v20 }
 0x222   :  { %v333_v25 = vpop.f32.mrb[2].mxu0  ;;  %v332_v29 = vadd.f32 %v331_v23, %v162_v22 }
 0x223   :  { %v334_v27 = vadd.f32 %v333_v25, %v158_v20  ;;  %v335_v28 = vpop.f32.mrb[3].mxu0 }
 0x224   :  { %v336_v30 = vadd.f32 %v335_v28, %v162_v22  ;;  %v5639_v31 = vpop.f32.mrb[0].mxu1 }
 0x225   :  { %v397_v32 = vpack.c.bf16 %v334_v27, %v330_v26  ;;  %v391_v33 = vadd.f32 %v5639_v31, %v166_v24  ;;  %v382_v34 = vpop.f32.mrb[1].mxu1 }
 0x226   :  { %v398_v35 = vpack.c.bf16 %v336_v30, %v332_v29  ;;  %v5640_v36 = vpop.f32.mrb[2].mxu1  ;;  %v383_v40 = vadd.f32 %v382_v34, %v166_v24 }
 0x227   :  { %v394_v37 = vadd.f32 %v5640_v36, %v166_v24  ;;  %v385_v38 = vpop.f32.mrb[3].mxu1  ;;  %520 = vrot.lane.b32.xlu1 %v397_v32, %s6510_s11 }
 0x228   :  { %v386_v41 = vadd.f32 %v385_v38, %v166_v24  ;;  %v339_v42 = vpop.f32.mrb[4].mxu0  ;;  %523 = vrot.lane.b32.xlu0 %v398_v35, %s6510_s11  ;;  %v408_v43 = vsel %vm403_vm1, %v398_v35, 0 }
 0x229   :  { %v6722_v44 = vpack.c.bf16 %v394_v37, %v391_v33  ;;  %v341_v45 = vpop.f32.mrb[5].mxu0  ;;  %5642 = vmatpush3.bf16.xpose.msra.mxu1 %v408_v43  ;;  %v340_v48 = vadd.f32 %v339_v42, %v158_v20 }
 0x22a   :  { %v6724_v46 = vpack.c.bf16 %v386_v41, %v383_v40  ;;  %v343_v47 = vpop.f32.mrb[6].mxu0  ;;  %5653 = vmatprep.subr.bf16.mxu1 %v6508_v13  ;;  %v342_v51 = vadd.f32 %v341_v45, %v162_v22 }
 0x22b   :  { %v344_v49 = vadd.f32 %v343_v47, %v158_v20  ;;  %v345_v50 = vpop.f32.mrb[7].mxu0  ;;  %645 = vrot.lane.b32.xlu1 %v398_v35, %s6511_s12  ;;  %v6513_v20 = vmov -1e+09  }
 0x22c   :  { %v346_v52 = vadd.f32 %v345_v50, %v162_v22  ;;  %5648 = vmatpush3.bf16.msra.mxu0 %v6724_v46  ;;  %766 = vrot.lane.b32.xlu0 %v398_v35, %s6512_s13  ;;  %v6775_v21 = vsel %vm43_vm2, 0.0, %v6513_v20 }
 0x22d   :  { %v400_v53 = vpack.c.bf16 %v344_v49, %v340_v48  ;;  %5659 = vmatprep.subr.bf16.mxu0 %v6508_v13  ;;  %v47_v49 = vstv %s5010_s15 }
 0x22e   :  { %v401_v54 = vpack.c.bf16 %v346_v52, %v342_v51  ;;  %vm48_vm4 = vcmp.lt.s32.totalorder %v40_v18, %v47_v49 }
 0x22f   :  { %643 = vrot.lane.b32.xlu1 %v397_v32, %s6511_s12 }
 0x230   :  { %1035 = vrot.lane.b32.xlu0 %v401_v54, %s6510_s11  ;;  %5644 = vmatmul.mubr.msk.bf16.vlgmr.msra.gmra.mrb[4].mxu1 %vm403_vm1, %v397_v32  ;;  %v921_v0 = vsel %vm403_vm1, %v401_v54, 0 }
 0x231   :  { %5655 = vmatprep.mubr.msk.bf16.mxu1 %vm6509_vm0, %v6508_v13 }
 0x233   :  { %764 = vrot.lane.b32.xlu1 %v397_v32, %s6512_s13 }
 0x234   :  { %1157 = vrot.lane.b32.xlu0 %v401_v54, %s6511_s12 }
 0x237   :  { %1032 = vrot.lane.b32.xlu1 %v400_v53, %s6510_s11 }
 0x238   :  { %1278 = vrot.lane.b32.xlu0 %v401_v54, %s6512_s13 }
 0x23b   :  { %1155 = vrot.lane.b32.xlu1 %v400_v53, %s6511_s12 }
 0x23f   :  { %1276 = vrot.lane.b32.xlu1 %v400_v53, %s6512_s13 }
 0x299   :  { %v521_v55 = vpop.permute.xlu1 %520 }
 0x29a   :  { %v524_v56 = vpop.permute.xlu0 %523 }
 0x29b   :  { %v529_v57 = vsel %vm403_vm1, %v524_v56, 0 }
 0x29c   :  { %5654 = vmatpush3.bf16.xpose.msra.mxu1 %v529_v57  ;;  %v6811_v57 = vsel %vm48_vm4, 0.0, %v6513_v20 }
 0x29d   :  { %5665 = vmatprep.subr.bf16.mxu1 %v6508_v13  ;;  %v646_v58 = vpop.permute.xlu1 %645 }
 0x29e   :  { %v651_v59 = vsel %vm403_vm1, %v646_v58, 0  ;;  %v767_v60 = vpop.permute.xlu0 %766 }
 0x29f   :  { %v772_v62 = vsel %vm403_vm1, %v767_v60, 0 }
 0x2a1   :  { %v644_v61 = vpop.permute.xlu1 %643 }
 0x2a2   :  { %v1036_v1 = vpop.permute.xlu0 %1035 }
 0x2a3   :  { %5656 = vmatmul.mubr.msk.bf16.vlgmr.msra.gmra.mrb[8].mxu1 %vm403_vm1, %v521_v55  ;;  %v1041_v2 = vsel %vm403_vm1, %v1036_v1, 0 }
 0x2a4   :  { %5666 = vmatpush3.bf16.xpose.msra.mxu1 %v651_v59  ;;  %5667 = vmatprep.mubr.msk.bf16.mxu1 %vm6509_vm0, %v6508_v13 }
 0x2a5   :  { %5677 = vmatprep.subr.bf16.mxu1 %v6508_v13  ;;  %v765_v63 = vpop.permute.xlu1 %764 }
 0x2a6   :  { %v1158_v3 = vpop.permute.xlu0 %1157 }
 0x2a7   :  { %v1163_v7 = vsel %vm403_vm1, %v1158_v3, 0 }
 0x2a9   :  { %v1033_v6 = vpop.permute.xlu1 %1032 }
 0x2aa   :  { %v1279_v8 = vpop.permute.xlu0 %1278 }
 0x2ab   :  { %5668 = vmatmul.mubr.msk.bf16.vlgmr.msra.gmra.mrb[12].mxu1 %vm403_vm1, %v644_v61  ;;  %v1284_v12 = vsel %vm403_vm1, %v1279_v8, 0 }
 0x2ac   :  { %5678 = vmatpush3.bf16.xpose.msra.mxu1 %v772_v62  ;;  %5679 = vmatprep.mubr.msk.bf16.mxu1 %vm6509_vm0, %v6508_v13 }
 0x2ad   :  { %5689 = vmatprep.subr.bf16.mxu1 %v6508_v13  ;;  %v1156_v9 = vpop.permute.xlu1 %1155 }
 0x2b1   :  { %v1277_v17 = vpop.permute.xlu1 %1276 }
 0x2b3   :  { %5680 = vmatmul.mubr.msk.bf16.vlgmr.msra.gmra.mrb[16].mxu1 %vm403_vm1, %v765_v63 }
 0x2b4   :  { %5690 = vmatpush3.bf16.xpose.msra.mxu1 %v921_v0  ;;  %5691 = vmatprep.mubr.msk.bf16.mxu1 %vm6509_vm0, %v6508_v13 }
 0x2b5   :  { %5701 = vmatprep.subr.bf16.mxu1 %v6508_v13 }
 0x2bb   :  { %5692 = vmatmul.mubr.msk.bf16.vlgmr.msra.gmra.mrb[20].mxu1 %vm403_vm1, %v400_v53 }
 0x2bc   :  { %5702 = vmatpush3.bf16.xpose.msra.mxu1 %v1041_v2  ;;  %5703 = vmatprep.mubr.msk.bf16.mxu1 %vm6509_vm0, %v6508_v13 }
 0x2bd   :  { %5713 = vmatprep.subr.bf16.mxu1 %v6508_v13 }
 0x2c3   :  { %5704 = vmatmul.mubr.msk.bf16.vlgmr.msra.gmra.mrb[24].mxu1 %vm403_vm1, %v1033_v6 }
 0x2c4   :  { %5714 = vmatpush3.bf16.xpose.msra.mxu1 %v1163_v7  ;;  %5715 = vmatprep.mubr.msk.bf16.mxu1 %vm6509_vm0, %v6508_v13 }
 0x2c5   :  { %5725 = vmatprep.subr.bf16.mxu1 %v6508_v13 }
 0x2cb   :  { %5716 = vmatmul.mubr.msk.bf16.vlgmr.msra.gmra.mrb[28].mxu1 %vm403_vm1, %v1156_v9 }
 0x2cc   :  { %5726 = vmatpush3.bf16.xpose.msra.mxu1 %v1284_v12  ;;  %5727 = vmatprep.mubr.msk.bf16.mxu1 %vm6509_vm0, %v6508_v13 }
 0x2d3   :  { %5728 = vmatmul.mubr.msk.bf16.vlgmr.msra.gmra.mrb[32].mxu1 %vm403_vm1, %v1277_v17 }
 0x303   :  { %v444_v22 = vpop.f32.mrb[4].mxu1 }
 0x304   :  { %v445_v23 = vadd.f32 %v444_v22, %v6775_v21  ;;  %v5645_v24 = vpop.f32.mrb[5].mxu1 }
 0x305   :  { %v447_v25 = vpop.f32.mrb[6].mxu1 }
 0x306   :  { %v448_v26 = vadd.f32 %v447_v25, %v6775_v21  ;;  %v5646_v27 = vpop.f32.mrb[7].mxu1  ;;  %v452_v28 = vsel %vm451_vm3, %v445_v23, -inf }
 0x307   :  { %453 = vmax.xlane.f32.xlu0 %v452_v28 }
 0x308   :  { %v455_v29 = vsel %vm451_vm3, %v448_v26, -inf }
 0x309   :  { %456 = vmax.xlane.f32.xlu1 %v455_v29 }
 0x376   :  { %v565_v14 = vpop.f32.mrb[8].mxu1 }
 0x377   :  { %v6782_v30 = vadd.f32 %v565_v14, %v6775_v21  ;;  %v5657_v31 = vpop.f32.mrb[9].mxu1 }
 0x378   :  { %v568_v32 = vpop.f32.mrb[10].mxu1 }
 0x379   :  { %v6785_v33 = vadd.f32 %v568_v32, %v6775_v21  ;;  %v5658_v34 = vpop.f32.mrb[11].mxu1  ;;  %v572_v35 = vsel %vm451_vm3, %v6782_v30, -inf }
 0x37a   :  { %573 = vmax.xlane.f32.xlu0 %v572_v35 }
 0x37b   :  { %v575_v36 = vsel %vm451_vm3, %v6785_v33, -inf }
 0x37e   :  { %v687_v37 = vpop.f32.mrb[12].mxu1  ;;  %576 = vmax.xlane.f32.xlu0 %v575_v36 }
 0x37f   :  { %v6792_v38 = vadd.f32 %v687_v37, %v6775_v21  ;;  %v5669_v40 = vpop.f32.mrb[13].mxu1 }
 0x380   :  { %v690_v41 = vpop.f32.mrb[14].mxu1 }
 0x381   :  { %v6795_v42 = vadd.f32 %v690_v41, %v6775_v21  ;;  %v5670_v43 = vpop.f32.mrb[15].mxu1  ;;  %v694_v45 = vsel %vm451_vm3, %v6792_v38, -inf }
 0x382   :  { %695 = vmax.xlane.f32.xlu0 %v694_v45 }
 0x383   :  { %v697_v47 = vsel %vm451_vm3, %v6795_v42, -inf }
 0x384   :  { %698 = vmax.xlane.f32.xlu1 %v697_v47 }
 0x386   :  { %v808_v48 = vpop.f32.mrb[16].mxu1 }
 0x387   :  { %v6802_v50 = vadd.f32 %v808_v48, %v6775_v21  ;;  %v5681_v51 = vpop.f32.mrb[17].mxu1 }
 0x388   :  { %v811_v52 = vpop.f32.mrb[18].mxu1 }
 0x389   :  { %v6805_v53 = vadd.f32 %v811_v52, %v6775_v21  ;;  %v5682_v54 = vpop.f32.mrb[19].mxu1  ;;  %v815_v55 = vsel %vm451_vm3, %v6802_v50, -inf }
 0x38a   :  { %816 = vmax.xlane.f32.xlu0 %v815_v55 }
 0x38b   :  { %v818_v56 = vsel %vm451_vm3, %v6805_v53, -inf }
 0x38c   :  { %819 = vmax.xlane.f32.xlu1 %v818_v56 }
 0x38e   :  { %v957_v58 = vpop.f32.mrb[20].mxu1 }
 0x38f   :  { %v6814_v59 = vadd.f32 %v957_v58, %v6811_v57  ;;  %v5693_v60 = vpop.f32.mrb[21].mxu1 }
 0x390   :  { %v960_v61 = vpop.f32.mrb[22].mxu1 }
 0x391   :  { %v6817_v62 = vadd.f32 %v960_v61, %v6811_v57  ;;  %v5694_v63 = vpop.f32.mrb[23].mxu1  ;;  %v964_v0 = vsel %vm451_vm3, %v6814_v59, -inf }
 0x392   :  { %965 = vmax.xlane.f32.xlu0 %v964_v0 }
 0x393   :  { %v967_v1 = vsel %vm451_vm3, %v6817_v62, -inf }
 0x394   :  { %968 = vmax.xlane.f32.xlu1 %v967_v1  ;;  %v454_v2 = vpop.xlane.xlu0 %453 }
 0x395   :  { %v458_v3 = vsub.f32 %v445_v23, %v454_v2 }
 0x396   :  { %v1077_v6 = vpop.f32.mrb[24].mxu1  ;;  %v457_v7 = vpop.xlane.xlu1 %456 }
 0x397   :  { %v460_v8 = vmul.f32 1.442695, %v458_v3  ;;  %v6824_v9 = vadd.f32 %v1077_v6, %v6811_v57  ;;  %v459_v12 = vsub.f32 %v448_v26, %v457_v7  ;;  %v5705_v17 = vpop.f32.mrb[25].mxu1 }
 0x398   :  { %v1080_v18 = vpop.f32.mrb[26].mxu1 }
 0x399   :  { %6241 = vpow2.f32 %v460_v8  ;;  %v462_v19 = vmul.f32 1.442695, %v459_v12  ;;  %v6827_v20 = vadd.f32 %v1080_v18, %v6811_v57  ;;  %v5706_v22 = vpop.f32.mrb[27].mxu1  ;;  %v1084_v24 = vsel %vm451_vm3, %v6824_v9, -inf }
 0x39a   :  { %1085 = vmax.xlane.f32.xlu0 %v1084_v24 }
 0x39b   :  { %6243 = vpow2.f32 %v462_v19  ;;  %v1087_v23 = vsel %vm451_vm3, %v6827_v20, -inf }
 0x39c   :  { %1088 = vmax.xlane.f32.xlu1 %v1087_v23 }
 0x39e   :  { %v1199_v25 = vpop.f32.mrb[28].mxu1 }
 0x39f   :  { %v6834_v26 = vadd.f32 %v1199_v25, %v6811_v57  ;;  %v5717_v27 = vpop.f32.mrb[29].mxu1 }
 0x3a0   :  { %v1202_v28 = vpop.f32.mrb[30].mxu1 }
 0x3a1   :  { %v6837_v29 = vadd.f32 %v1202_v28, %v6811_v57  ;;  %v5718_v14 = vpop.f32.mrb[31].mxu1  ;;  %v1206_v31 = vsel %vm451_vm3, %v6834_v26, -inf }
 0x3a2   :  { %1207 = vmax.xlane.f32.xlu0 %v1206_v31 }
 0x3a3   :  { %v6841_v32 = vpop.eup %6241  ;;  %v1209_v34 = vsel %vm451_vm3, %v6837_v29, -inf }
 0x3a4   :  { %1210 = vmax.xlane.f32.xlu1 %v1209_v34  ;;  %v464_v35 = vsel %vm451_vm3, %v6841_v32, 0.0 }
 0x3a5   :  { %v6847_v36 = vpop.eup %6243 }
 0x3a6   :  { %v1320_v37 = vpop.f32.mrb[32].mxu1  ;;  %465 = vadd.xlane.f32.xlu0 %v464_v35  ;;  %v467_v40 = vsel %vm451_vm3, %v6847_v36, 0.0 }
 0x3a7   :  { %v6852_v41 = vadd.f32 %v1320_v37, %v6811_v57  ;;  %v5729_v43 = vpop.f32.mrb[33].mxu1 }
 0x3a8   :  { %v1323_v45 = vpop.f32.mrb[34].mxu1  ;;  %468 = vadd.xlane.f32.xlu1 %v467_v40 }
 0x3a9   :  { %v6855_v47 = vadd.f32 %v1323_v45, %v6811_v57  ;;  %v5730_v48 = vpop.f32.mrb[35].mxu1  ;;  %v1327_v49 = vsel %vm451_vm3, %v6852_v41, -inf }
 0x3aa   :  { %1328 = vmax.xlane.f32.xlu0 %v1327_v49 }
 0x3ab   :  { %v1330_v51 = vsel %vm451_vm3, %v6855_v47, -inf }
 0x3ac   :  { %1331 = vmax.xlane.f32.xlu1 %v1330_v51 }
 0x3bd   :  { %717 = vrot.lane.b32.xlu1 %v6724_v46, %s6511_s12 }
 0x3c0   :  { %596 = vrot.lane.b32.xlu0 %v6724_v46, %s6510_s11 }
 0x407   :  { %v574_v52 = vpop.xlane.xlu0 %573 }
 0x408   :  { %v578_v54 = vsub.f32 %v6782_v30, %v574_v52 }
 0x40a   :  { %v580_v55 = vmul.f32 1.442695, %v578_v54 }
 0x40b   :  { %v577_v56 = vpop.xlane.xlu0 %576 }
 0x40c   :  { %6245 = vpow2.f32 %v580_v55  ;;  %v579_v58 = vsub.f32 %v6785_v33, %v577_v56 }
 0x40e   :  { %v582_v60 = vmul.f32 1.442695, %v579_v58 }
 0x40f   :  { %v696_v61 = vpop.xlane.xlu0 %695 }
 0x410   :  { %6247 = vpow2.f32 %v582_v60  ;;  %v700_v63 = vsub.f32 %v6792_v38, %v696_v61 }
 0x411   :  { %v699_v0 = vpop.xlane.xlu1 %698 }
 0x412   :  { %v702_v1 = vmul.f32 1.442695, %v700_v63  ;;  %v701_v2 = vsub.f32 %v6795_v42, %v699_v0 }
 0x414   :  { %6249 = vpow2.f32 %v702_v1  ;;  %v704_v3 = vmul.f32 1.442695, %v701_v2 }
 0x416   :  { %v6869_v6 = vpop.eup %6245  ;;  %6251 = vpow2.f32 %v704_v3 }
 0x417   :  { %v817_v30 = vpop.xlane.xlu0 %816  ;;  %v584_v7 = vsel %vm451_vm3, %v6869_v6, 0.0 }
 0x418   :  { %v821_v33 = vsub.f32 %v6802_v50, %v817_v30  ;;  %585 = vadd.xlane.f32.xlu0 %v584_v7 }
 0x419   :  { %v820_v8 = vpop.xlane.xlu1 %819 }
 0x41a   :  { %v6874_v12 = vpop.eup %6247  ;;  %v823_v38 = vmul.f32 1.442695, %v821_v33  ;;  %v822_v17 = vsub.f32 %v6805_v53, %v820_v8 }
 0x41b   :  { %v587_v42 = vsel %vm451_vm3, %v6874_v12, 0.0 }
 0x41c   :  { %6253 = vpow2.f32 %v823_v38  ;;  %v825_v18 = vmul.f32 1.442695, %v822_v17  ;;  %588 = vadd.xlane.f32.xlu1 %v587_v42 }
 0x41e   :  { %v6879_v19 = vpop.eup %6249  ;;  %6255 = vpow2.f32 %v825_v18 }
 0x41f   :  { %v966_v22 = vpop.xlane.xlu0 %965  ;;  %v706_v50 = vsel %vm451_vm3, %v6879_v19, 0.0 }
 0x420   :  { %v6883_v24 = vpop.eup %6251  ;;  %v970_v23 = vsub.f32 %v6814_v59, %v966_v22  ;;  %707 = vadd.xlane.f32.xlu0 %v706_v50 }
 0x421   :  { %v969_v25 = vpop.xlane.xlu1 %968  ;;  %v709_v53 = vsel %vm451_vm3, %v6883_v24, 0.0 }
 0x422   :  { %v972_v27 = vmul.f32 1.442695, %v970_v23  ;;  %v971_v28 = vsub.f32 %v6817_v62, %v969_v25  ;;  %710 = vadd.xlane.f32.xlu1 %v709_v53 }
 0x424   :  { %6257 = vpow2.f32 %v972_v27  ;;  %v974_v14 = vmul.f32 1.442695, %v971_v28 }
 0x426   :  { %v6889_v31 = vpop.eup %6253  ;;  %6259 = vpow2.f32 %v974_v14 }
 0x427   :  { %v1086_v34 = vpop.xlane.xlu0 %1085  ;;  %v827_v35 = vsel %vm451_vm3, %v6889_v31, 0.0 }
 0x428   :  { %v6893_v37 = vpop.eup %6255  ;;  %v1090_v59 = vsub.f32 %v6824_v9, %v1086_v34  ;;  %828 = vadd.xlane.f32.xlu0 %v827_v35 }
 0x429   :  { %v1089_v40 = vpop.xlane.xlu1 %1088  ;;  %v830_v43 = vsel %vm451_vm3, %v6893_v37, 0.0 }
 0x42a   :  { %v1092_v62 = vmul.f32 1.442695, %v1090_v59  ;;  %v1091_v45 = vsub.f32 %v6827_v20, %v1089_v40  ;;  %831 = vadd.xlane.f32.xlu1 %v830_v43 }
 0x42c   :  { %6261 = vpow2.f32 %v1092_v62  ;;  %v1094_v48 = vmul.f32 1.442695, %v1091_v45 }
 0x42e   :  { %v6899_v49 = vpop.eup %6257  ;;  %6263 = vpow2.f32 %v1094_v48 }
 0x42f   :  { %v1208_v51 = vpop.xlane.xlu0 %1207  ;;  %v976_v52 = vsel %vm451_vm3, %v6899_v49, 0.0 }
 0x430   :  { %v6903_v54 = vpop.eup %6259  ;;  %977 = vadd.xlane.f32.xlu0 %v976_v52  ;;  %v1212_v25 = vsub.f32 %v6834_v26, %v1208_v51 }
 0x431   :  { %v1211_v9 = vpop.xlane.xlu1 %1210  ;;  %v979_v55 = vsel %vm451_vm3, %v6903_v54, 0.0 }
 0x432   :  { %v1213_v56 = vsub.f32 %v6837_v29, %v1211_v9  ;;  %980 = vadd.xlane.f32.xlu1 %v979_v55  ;;  %v1214_v53 = vmul.f32 1.442695, %v1212_v25 }
 0x433   :  { %v466_v20 = vpop.xlane.xlu0 %465 }
 0x434   :  { %v1216_v58 = vmul.f32 1.442695, %v1213_v56  ;;  %6265 = vrcp.f32 %v466_v20 }
 0x435   :  { %v469_v60 = vpop.xlane.xlu1 %468 }
 0x436   :  { %v6908_v61 = vpop.eup %6261  ;;  %6267 = vpow2.f32 %v1216_v58 }
 0x437   :  { %6269 = vrcp.f32 %v469_v60  ;;  %v1329_v63 = vpop.xlane.xlu0 %1328  ;;  %v1096_v0 = vsel %vm451_vm3, %v6908_v61, 0.0 }
 0x438   :  { %v6912_v1 = vpop.eup %6263  ;;  %v1333_v2 = vsub.f32 %v6852_v41, %v1329_v63  ;;  %1097 = vadd.xlane.f32.xlu1 %v1096_v0 }
 0x439   :  { %v1332_v3 = vpop.xlane.xlu1 %1331  ;;  %v1099_v7 = vsel %vm451_vm3, %v6912_v1, 0.0 }
 0x43a   :  { %v1335_v29 = vmul.f32 1.442695, %v1333_v2  ;;  %v1334_v30 = vsub.f32 %v6855_v47, %v1332_v3 }
 0x43b   :  { %v597_v50 = vpop.permute.xlu0 %596 }
 0x43c   :  { %6271 = vpow2.f32 %v1335_v29  ;;  %v1337_v33 = vmul.f32 1.442695, %v1334_v30  ;;  %1100 = vadd.xlane.f32.xlu1 %v1099_v7 }
 0x43d   :  { %v718_v28 = vpop.permute.xlu1 %717 }
 0x43e   :  { %6273 = vpow2.f32 %v1337_v33  ;;  %v6266_v8 = vpop.eup %6265 }
 0x43f   :  { %v472_v41 = vmul.f32 %v6266_v8, %v6841_v32  ;;  %6275 = vpow2.f32 %v1214_v53 }
 0x440   :  { %v6918_v38 = vpop.eup %6267 }
 0x441   :  { %v6270_v17 = vpop.eup %6269  ;;  %v1221_v42 = vsel %vm451_vm3, %v6918_v38, 0.0 }
 0x442   :  { %v473_v18 = vmul.f32 %v6270_v17, %v6847_v36  ;;  %1222 = vadd.xlane.f32.xlu1 %v1221_v42 }
 0x444   :  { %v474_v47 = vpack.c.bf16 %v473_v18, %v472_v41 }
 0x446   :  { %v6924_v22 = vpop.eup %6271  ;;  %5650 = vmatmul.mubr.msk.bf16.vlgmr.msra.gmra.mrb[8].mxu0 %vm451_vm3, %v474_v47  ;;  %838 = vrot.lane.b32.xlu0 %v6724_v46, %s6512_s13 }
 0x447   :  { %5660 = vmatpush3.bf16.msra.mxu0 %v597_v50  ;;  %v1339_v23 = vsel %vm451_vm3, %v6924_v22, 0.0  ;;  %5661 = vmatprep.mubr.msk.bf16.mxu0 %vm6509_vm0, %v6508_v13 }
 0x448   :  { %v6933_v32 = vpop.eup %6273  ;;  %1340 = vadd.xlane.f32.xlu1 %v1339_v23  ;;  %5671 = vmatprep.subr.bf16.mxu0 %v6508_v13 }
 0x449   :  { %v1342_v36 = vsel %vm451_vm3, %v6933_v32, 0.0  ;;  %v6941_v46 = vpop.eup %6275 }
 0x44a   :  { %v1218_v27 = vsel %vm451_vm3, %v6941_v46, 0.0 }
 0x44c   :  { %1343 = vadd.xlane.f32.xlu1 %v1342_v36 }
 0x45d   :  { %1108 = vrot.lane.b32.xlu1 %v6722_v44, %s6510_s11 }
 0x465   :  { %1219 = vadd.xlane.f32.xlu0 %v1218_v27 }
 0x47b   :  { %1229 = vrot.lane.b32.xlu0 %v6722_v44, %s6511_s12 }
 0x47f   :  { %1350 = vrot.lane.b32.xlu0 %v6722_v44, %s6512_s13 }
 0x4a5   :  { %v586_v14 = vpop.xlane.xlu0 %585 }
 0x4a6   :  { %6277 = vrcp.f32 %v586_v14 }
 0x4a9   :  { %v589_v26 = vpop.xlane.xlu1 %588 }
 0x4aa   :  { %6279 = vrcp.f32 %v589_v26 }
 0x4ad   :  { %v708_v34 = vpop.xlane.xlu0 %707 }
 0x4ae   :  { %6281 = vrcp.f32 %v708_v34 }
 0x4af   :  { %v711_v35 = vpop.xlane.xlu1 %710 }
 0x4b0   :  { %6283 = vrcp.f32 %v711_v35  ;;  %v6278_v59 = vpop.eup %6277 }
 0x4b1   :  { %v592_v43 = vmul.f32 %v6278_v59, %v6869_v6 }
 0x4b4   :  { %v6280_v40 = vpop.eup %6279 }
 0x4b5   :  { %v593_v62 = vmul.f32 %v6280_v40, %v6874_v12  ;;  %v829_v45 = vpop.xlane.xlu0 %828 }
 0x4b6   :  { %6285 = vrcp.f32 %v829_v45 }
 0x4b7   :  { %v832_v48 = vpop.xlane.xlu1 %831  ;;  %v594_v51 = vpack.c.bf16 %v593_v62, %v592_v43 }
 0x4b8   :  { %6287 = vrcp.f32 %v832_v48  ;;  %v6282_v52 = vpop.eup %6281 }
 0x4b9   :  { %5662 = vmatmul.mubr.msk.bf16.vlgmr.msra.gmra.mrb[12].mxu0 %vm451_vm3, %v594_v51  ;;  %v714_v6 = vmul.f32 %v6282_v52, %v6879_v19 }
 0x4ba   :  { %v6284_v9 = vpop.eup %6283  ;;  %5672 = vmatpush3.bf16.msra.mxu0 %v718_v28  ;;  %5673 = vmatprep.mubr.msk.bf16.mxu0 %vm6509_vm0, %v6508_v13 }
 0x4bb   :  { %v715_v55 = vmul.f32 %v6284_v9, %v6883_v24  ;;  %5683 = vmatprep.subr.bf16.mxu0 %v6508_v13 }
 0x4bd   :  { %v978_v12 = vpop.xlane.xlu0 %977  ;;  %v716_v20 = vpack.c.bf16 %v715_v55, %v714_v6 }
 0x4be   :  { %6289 = vrcp.f32 %v978_v12 }
 0x4bf   :  { %v981_v56 = vpop.xlane.xlu1 %980 }
 0x4c0   :  { %6291 = vrcp.f32 %v981_v56  ;;  %v6286_v58 = vpop.eup %6285 }
 0x4c1   :  { %5674 = vmatmul.mubr.msk.bf16.vlgmr.msra.gmra.mrb[16].mxu0 %vm451_vm3, %v716_v20  ;;  %v839_v60 = vpop.permute.xlu0 %838  ;;  %v835_v19 = vmul.f32 %v6286_v58, %v6889_v31 }
 0x4c2   :  { %v6288_v63 = vpop.eup %6287  ;;  %5684 = vmatpush3.bf16.msra.mxu0 %v839_v60  ;;  %5685 = vmatprep.mubr.msk.bf16.mxu0 %vm6509_vm0, %v6508_v13 }
 0x4c3   :  { %v836_v24 = vmul.f32 %v6288_v63, %v6893_v37  ;;  %5695 = vmatprep.subr.bf16.mxu0 %v6508_v13 }
 0x4c5   :  { %v1098_v0 = vpop.xlane.xlu1 %1097  ;;  %v837_v2 = vpack.c.bf16 %v836_v24, %v835_v19  ;;  %v6017_v19 = vld [vmem:[%s8316_s3] sm:$0xff]  }
 0x4c6   :  { %5737 = vmatprep.subr.bf16.mxu1 %v6017_v19 }
 0x4c7   :  { %5738 = vmatpush3.bf16.msra.mxu1 %v6017_v19 }
 0x4c8   :  { %v6290_v3 = vpop.eup %6289 }
 0x4c9   :  { %5686 = vmatmul.mubr.msk.bf16.vlgmr.msra.gmra.mrb[20].mxu0 %vm451_vm3, %v837_v2  ;;  %v1101_v7 = vpop.xlane.xlu1 %1100  ;;  %v984_v37 = vmul.f32 %v6290_v3, %v6899_v49  ;;  %v6019_v2 = vld [vmem:[%s8316_s3 + $0x10] sm:$0xff]  }
 0x4ca   :  { %v6292_v29 = vpop.eup %6291  ;;  %5696 = vmatpush3.bf16.msra.mxu0 %v6722_v44  ;;  %5697 = vmatprep.mubr.msk.bf16.mxu0 %vm6509_vm0, %v6508_v13  ;;  %6293 = vrcp.f32 %v1101_v7  ;;  %v6020_v7 = vld [vmem:[%s8316_s3 + $0x18] sm:$0xff]  }
 0x4cb   :  { %v985_v30 = vmul.f32 %v6292_v29, %v6903_v54  ;;  %5707 = vmatprep.subr.bf16.mxu0 %v6508_v13  ;;  %6295 = vrcp.f32 %v1098_v0  ;;  %v6018_v0 = vld [vmem:[%s8316_s3 + $0x8] sm:$0xff]  }
 0x4cc   :  { %5739 = vmatprep.subr.bf16.mxu1 %v6018_v0 }
 0x4cd   :  { %v986_v31 = vpack.c.bf16 %v985_v30, %v984_v37  ;;  %5740 = vmatpush3.bf16.msra.mxu1 %v6018_v0 }
 0x4ce   :  { %5741 = vmatprep.subr.bf16.mxu1 %v6019_v2 }
 0x4cf   :  { %v1223_v33 = vpop.xlane.xlu1 %1222 }
 0x4d0   :  { %6297 = vrcp.f32 %v1223_v33  ;;  %v6021_v33 = vld [vmem:[%s8316_s3 + $0x20] sm:$0xff]  }
 0x4d1   :  { %5698 = vmatmul.mubr.msk.bf16.vlgmr.msra.gmra.mrb[24].mxu0 %vm451_vm3, %v986_v31  ;;  %5742 = vmatpush3.bf16.msra.mxu1 %v6019_v2 }
 0x4d2   :  { %5709 = vmatprep.mubr.msk.bf16.mxu0 %vm6509_vm0, %v6508_v13  ;;  %5743 = vmatprep.subr.bf16.mxu1 %v6020_v7 }
 0x4d4   :  { %v6294_v8 = vpop.eup %6293 }
 0x4d5   :  { %v1341_v44 = vpop.xlane.xlu1 %1340  ;;  %v6296_v42 = vpop.eup %6295  ;;  %v1105_v54 = vmul.f32 %v6294_v8, %v6912_v1  ;;  %5744 = vmatpush3.bf16.msra.mxu1 %v6020_v7  ;;  %v6023_v8 = vld [vmem:[%s8316_s3 + $0x30] sm:$0xff]  }
 0x4d6   :  { %v1104_v41 = vmul.f32 %v6296_v42, %v6908_v61  ;;  %5745 = vmatprep.subr.bf16.mxu1 %v6021_v33 }
 0x4d8   :  { %v1106_v49 = vpack.c.bf16 %v1105_v54, %v1104_v41  ;;  %v6024_v54 = vld [vmem:[%s8316_s3 + $0x38] sm:$0xff]  }
 0x4d9   :  { %v1344_v17 = vpop.xlane.xlu1 %1343  ;;  %5746 = vmatpush3.bf16.msra.mxu1 %v6021_v33 }
 0x4da   :  { %v6298_v61 = vpop.eup %6297 }
 0x4db   :  { %v1227_v23 = vmul.f32 %v6298_v61, %v6918_v38 }
 0x4dd   :  { %v1109_v18 = vpop.permute.xlu1 %1108 }
 0x4de   :  { %5708 = vmatpush3.bf16.msra.mxu0 %v1109_v18 }
 0x4df   :  { %5719 = vmatprep.subr.bf16.mxu0 %v6508_v13 }
 0x4e1   :  { %5710 = vmatmul.mubr.msk.bf16.vlgmr.msra.gmra.mrb[28].mxu0 %vm451_vm3, %v1106_v49 }
 0x4e2   :  { %5721 = vmatprep.mubr.msk.bf16.mxu0 %vm6509_vm0, %v6508_v13 }
 0x4f2   :  { %v1220_v47 = vpop.xlane.xlu0 %1219 }
 0x4f3   :  { %6299 = vrcp.f32 %v1220_v47 }
 0x4f4   :  { %6301 = vrcp.f32 %v1344_v17 }
 0x4f5   :  { %6303 = vrcp.f32 %v1341_v44  ;;  %v6022_v44 = vld [vmem:[%s8316_s3 + $0x28] sm:$0xff]  }
 0x4f6   :  { %v1230_v50 = vpop.permute.xlu0 %1229  ;;  %5747 = vmatprep.subr.bf16.mxu1 %v6022_v44 }
 0x4f7   :  { %5720 = vmatpush3.bf16.msra.mxu0 %v1230_v50  ;;  %5748 = vmatpush3.bf16.msra.mxu1 %v6022_v44 }
 0x4f8   :  { %5731 = vmatprep.subr.bf16.mxu0 %v6508_v13  ;;  %5749 = vmatprep.subr.bf16.mxu1 %v6023_v8 }
 0x4fa   :  { %v1351_v27 = vpop.permute.xlu0 %1350 }
 0x4fb   :  { %5750 = vmatpush3.bf16.msra.mxu1 %v6023_v8 }
 0x4fc   :  { %5751 = vmatprep.subr.bf16.mxu1 %v6024_v54 }
 0x4fd   :  { %v6300_v1 = vpop.eup %6299 }
 0x4fe   :  { %v1226_v36 = vmul.f32 %v6300_v1, %v6941_v46  ;;  %v6302_v53 = vpop.eup %6301 }
 0x4ff   :  { %v6304_v28 = vpop.eup %6303  ;;  %v1348_v14 = vmul.f32 %v6302_v53, %v6933_v32  ;;  %5752 = vmatpush3.bf16.msra.mxu1 %v6024_v54 }
 0x500   :  { %v1228_v25 = vpack.c.bf16 %v1227_v23, %v1226_v36  ;;  %v1347_v26 = vmul.f32 %v6304_v28, %v6924_v22 }
 0x502   :  { %5722 = vmatmul.mubr.msk.bf16.vlgmr.msra.gmra.mrb[32].mxu0 %vm451_vm3, %v1228_v25  ;;  %v1349_v34 = vpack.c.bf16 %v1348_v14, %v1347_v26 }
 0x503   :  { %5732 = vmatpush3.bf16.msra.mxu0 %v1351_v27  ;;  %5733 = vmatprep.mubr.msk.bf16.mxu0 %vm6509_vm0, %v6508_v13 }
 0x50a   :  { %5734 = vmatmul.mubr.msk.bf16.vlgmr.msra.gmra.mrb[36].mxu0 %vm451_vm3, %v1349_v34 }
 0x50b   :  { %1852 = vmatprep.mubr.bf16.mxu0 %v6507_v39 }
 0x519   :  { %v6989_v38 = vpop.f32.mrb[8].mxu0 }
 0x51a   :  { %v5651_v46 = vpop.f32.mrb[9].mxu0 }
 0x51b   :  { %v6991_v35 = vpop.f32.mrb[10].mxu0 }
 0x51c   :  { %v5652_v59 = vpop.f32.mrb[11].mxu0 }
 0x58c   :  { %v636_v40 = vpop.f32.mrb[12].mxu0 }
 0x58d   :  { %v5663_v43 = vpop.f32.mrb[13].mxu0 }
 0x58e   :  { %v639_v62 = vpop.f32.mrb[14].mxu0 }
 0x58f   :  { %v5925_v45 = vpack.i.bf16 %v639_v62, %v636_v40  ;;  %v5664_v48 = vpop.f32.mrb[15].mxu0 }
 0x591   :  { %5926 = vrot.lane.b32.xlu0 %v5925_v45, %s6512_s13 }
 0x594   :  { %v757_v32 = vpop.f32.mrb[16].mxu0 }
 0x595   :  { %v5675_v22 = vpop.f32.mrb[17].mxu0 }
 0x596   :  { %v760_v51 = vpop.f32.mrb[18].mxu0 }
 0x597   :  { %v5930_v52 = vpack.i.bf16 %v760_v51, %v757_v32  ;;  %v5676_v9 = vpop.f32.mrb[19].mxu0 }
 0x599   :  { %5931 = vrot.lane.b32.xlu1 %v5930_v52, %s6511_s12 }
 0x59c   :  { %v878_v55 = vpop.f32.mrb[20].mxu0 }
 0x59d   :  { %v5687_v6 = vpop.f32.mrb[21].mxu0 }
 0x59e   :  { %v881_v12 = vpop.f32.mrb[22].mxu0 }
 0x59f   :  { %v5935_v56 = vpack.i.bf16 %v881_v12, %v878_v55  ;;  %v5688_v20 = vpop.f32.mrb[23].mxu0 }
 0x5a1   :  { %5936 = vrot.lane.b32.xlu1 %v5935_v56, %s6510_s11 }
 0x5a4   :  { %v6996_v58 = vpop.f32.mrb[24].mxu0 }
 0x5a5   :  { %v5699_v60 = vpop.f32.mrb[25].mxu0 }
 0x5a6   :  { %v6998_v63 = vpop.f32.mrb[26].mxu0 }
 0x5a7   :  { %v5700_v24 = vpop.f32.mrb[27].mxu0 }
 0x5b4   :  { %v1148_v3 = vpop.f32.mrb[28].mxu0 }
 0x5b5   :  { %v5711_v29 = vpop.f32.mrb[29].mxu0 }
 0x5b6   :  { %v1151_v30 = vpop.f32.mrb[30].mxu0 }
 0x5b7   :  { %v5940_v37 = vpack.i.bf16 %v1151_v30, %v1148_v3  ;;  %v5712_v31 = vpop.f32.mrb[31].mxu0  ;;  %v1447_v3 = vsub.s32 1, %v6702_v15 }
 0x5b9   :  { %5941 = vrot.lane.b32.xlu0 %v5940_v37, %s6512_s13 }
 0x5d5   :  { %v1269_v17 = vpop.f32.mrb[32].mxu0 }
 0x5d6   :  { %v5723_v42 = vpop.f32.mrb[33].mxu0 }
 0x5d7   :  { %v1272_v41 = vpop.f32.mrb[34].mxu0 }
 0x5d8   :  { %v5945_v18 = vpack.i.bf16 %v1272_v41, %v1269_v17  ;;  %v5724_v49 = vpop.f32.mrb[35].mxu0  ;;  %v6025_v41 = vld [vmem:[%s8317_s4] ss:$16 sps:$4 sm:$0xff]  }
 0x5d9   :  { %v6036_v49 = vld [vmem:[%s8317_s4 + $0x2c] ss:$16 sps:$4 sm:$0xff]  }
 0x5da   :  { %5946 = vrot.lane.b32.xlu0 %v5945_v18, %s6511_s12  ;;  %v6027_v18 = vld [vmem:[%s8317_s4 + $0x4] ss:$16 sps:$4 sm:$0xff]  }
 0x5db   :  { %1820 = vmatprep.subr.bf16.mxu0 %v6027_v18 }
 0x5dc   :  { %1821 = vmatpush1.bf16.msra.mxu0 %v6025_v41 }
 0x5dd   :  { %v1390_v47 = vpop.f32.mrb[36].mxu0 }
 0x5de   :  { %v5735_v50 = vpop.f32.mrb[37].mxu0 }
 0x5df   :  { %v1393_v61 = vpop.f32.mrb[38].mxu0  ;;  %v6034_v50 = vld [vmem:[%s8317_s4 + $0x28] ss:$16 sps:$4 sm:$0xff]  }
 0x5e0   :  { %v5950_v1 = vpack.i.bf16 %v1393_v61, %v1390_v47  ;;  %v5736_v23 = vpop.f32.mrb[39].mxu0  ;;  %v6031_v47 = vld [vmem:[%s8317_s4 + $0x20] ss:$16 sps:$4 sm:$0xff]  }
 0x5e2   :  { %5951 = vrot.lane.b32.xlu1 %v5950_v1, %s6510_s11 }
 0x603   :  { %v5927_v36 = vpop.permute.xlu0 %5926 }
 0x604   :  { %v5929_v53 = vunpack.i.h.bf16 %v5927_v36  ;;  %v5928_v27 = vunpack.i.l.bf16 %v5927_v36 }
 0x606   :  { %v910_v34 = vsel %vm403_vm1, %v6991_v35, %v5929_v53  ;;  %v909_v46 = vsel %vm403_vm1, %v6989_v38, %v5928_v27 }
 0x60b   :  { %v5932_v25 = vpop.permute.xlu1 %5931 }
 0x60c   :  { %v5934_v28 = vunpack.i.h.bf16 %v5932_v25  ;;  %v5933_v14 = vunpack.i.l.bf16 %v5932_v25 }
 0x60e   :  { %v912_v43 = vsel %vm911_vm5, %v909_v46, %v5933_v14  ;;  %v913_v62 = vsel %vm911_vm5, %v910_v34, %v5934_v28 }
 0x613   :  { %v5937_v26 = vpop.permute.xlu1 %5936 }
 0x614   :  { %v5939_v59 = vunpack.i.h.bf16 %v5937_v26  ;;  %v5938_v40 = vunpack.i.l.bf16 %v5937_v26 }
 0x616   :  { %v915_v45 = vsel %vm914_vm6, %v912_v43, %v5938_v40  ;;  %v916_v48 = vsel %vm914_vm6, %v913_v62, %v5939_v59  ;;  %v6039_v40 = vld [vmem:[%s8317_s4 + $0x44] ss:$16 sps:$4 sm:$0xff]   ;;  %v6042_v43 = vld [vmem:[%s8317_s4 + $0x4c] ss:$16 sps:$4 sm:$0xff]   ;;  %v6037_v62 = vld [vmem:[%s8317_s4 + $0x40] ss:$16 sps:$4 sm:$0xff]  }
 0x617   :  { %v1427_v32 = vpack.c.bf16 %v916_v48, %v915_v45  ;;  %v6040_v45 = vld [vmem:[%s8317_s4 + $0x48] ss:$16 sps:$4 sm:$0xff]   ;;  %v6048_v48 = vld [vmem:[%s8317_s4 + $0x6c] ss:$16 sps:$4 sm:$0xff]  }
 0x619   :  { %5753 = vmatprep.mubr.bf16.mxu1 %v1427_v32  ;;  %v6043_v32 = vld [vmem:[%s8317_s4 + $0x60] ss:$16 sps:$4 sm:$0xff]  }
 0x62b   :  { %v5942_v22 = vpop.permute.xlu0 %5941 }
 0x62c   :  { %v5944_v52 = vunpack.i.h.bf16 %v5942_v22  ;;  %v5943_v9 = vunpack.i.l.bf16 %v5942_v22  ;;  %v6046_v22 = vld [vmem:[%s8317_s4 + $0x68] ss:$16 sps:$4 sm:$0xff]  }
 0x62e   :  { %v1422_v38 = vsel %vm403_vm1, %v6998_v63, %v5944_v52  ;;  %v1421_v12 = vsel %vm403_vm1, %v6996_v58, %v5943_v9  ;;  %v7048_v58 = vld [vmem:[%s8319_s6] sm:$0xff]  ;;  %v6054_v52 = vld [vmem:[%s8317_s4 + $0x8c] ss:$16 sps:$4 sm:$0xff]  }
 0x62f   :  { %v1448_v63 = vrot.slane %v7048_v58, %v1447_v3  ;;  %v6049_v9 = vld [vmem:[%s8317_s4 + $0x80] ss:$16 sps:$4 sm:$0xff]  }
 0x64c   :  { %v5947_v51 = vpop.permute.xlu0 %5946 }
 0x64d   :  { %v5949_v35 = vunpack.i.h.bf16 %v5947_v51  ;;  %v5948_v55 = vunpack.i.l.bf16 %v5947_v51  ;;  %v6051_v51 = vld [vmem:[%s8317_s4 + $0x84] ss:$16 sps:$4 sm:$0xff]  }
 0x64f   :  { %v1423_v60 = vsel %vm911_vm5, %v1421_v12, %v5948_v55  ;;  %v1424_v24 = vsel %vm911_vm5, %v1422_v38, %v5949_v35  ;;  %v6052_v35 = vld [vmem:[%s8317_s4 + $0x88] ss:$16 sps:$4 sm:$0xff]   ;;  %v6057_v55 = vld [vmem:[%s8317_s4 + $0xa4] ss:$16 sps:$4 sm:$0xff]   ;;  %v6055_v38 = vld [vmem:[%s8317_s4 + $0xa0] ss:$16 sps:$4 sm:$0xff]  }
 0x650   :  { %v6058_v12 = vld [vmem:[%s8317_s4 + $0xa8] ss:$16 sps:$4 sm:$0xff]  }
 0x654   :  { %v5952_v6 = vpop.permute.xlu1 %5951 }
 0x655   :  { %v5954_v56 = vunpack.i.h.bf16 %v5952_v6  ;;  %v5953_v20 = vunpack.i.l.bf16 %v5952_v6  ;;  %v6060_v6 = vld [vmem:[%s8317_s4 + $0xac] ss:$16 sps:$4 sm:$0xff]  }
 0x657   :  { %v1425_v19 = vsel %vm914_vm6, %v1423_v60, %v5953_v20  ;;  %v1426_v0 = vsel %vm914_vm6, %v1424_v24, %v5954_v56  ;;  %v6061_v56 = vld [vmem:[%s8317_s4 + $0xc0] ss:$16 sps:$4 sm:$0xff]   ;;  %v6063_v20 = vld [vmem:[%s8317_s4 + $0xc4] ss:$16 sps:$4 sm:$0xff]   ;;  %v6064_v60 = vld [vmem:[%s8317_s4 + $0xc8] ss:$16 sps:$4 sm:$0xff]  }
 0x658   :  { %v1428_v2 = vpack.c.bf16 %v1426_v0, %v1425_v19  ;;  %v6066_v24 = vld [vmem:[%s8317_s4 + $0xcc] ss:$16 sps:$4 sm:$0xff]   ;;  %v6069_v19 = vld [vmem:[%s8317_s4 + $0xe4] ss:$16 sps:$4 sm:$0xff]  }
 0x659   :  { %v6072_v0 = vld [vmem:[%s8317_s4 + $0xec] ss:$16 sps:$4 sm:$0xff]  }
 0x65a   :  { %5754 = vmatmul.mubr.bf16.vlgmr.msra.gmra.mrb[36].mxu1 %v1428_v2  ;;  %v6067_v2 = vld [vmem:[%s8317_s4 + $0xe0] ss:$16 sps:$4 sm:$0xff]  }
 0x65b   :  { %1905 = vmatprep.mubr.bf16.mxu1 %v6507_v39 }
 0x72d   :  { %v5755_v29 = vpop.f32.mrb[36].mxu1 }
 0x72e   :  { %v1540_v30 = vadd.f32 %v5755_v29, %v1448_v63  ;;  %v1531_v7 = vpop.f32.mrb[37].mxu1 }
 0x72f   :  { %v1532_v37 = vadd.f32 %v1531_v7, %v1448_v63  ;;  %v5756_v31 = vpop.f32.mrb[38].mxu1 }
 0x730   :  { %v1534_v33 = vpop.f32.mrb[39].mxu1  ;;  %v1543_v17 = vadd.f32 %v5756_v31, %v1448_v63  ;;  %v1548_v59 = vadd.f32 %v1540_v30, %v6688_v10  ;;  %v6045_v10 = vld [vmem:[%s8317_s4 + $0x64] ss:$16 sps:$4 sm:$0xff]  }
 0x731   :  { %v1535_v44 = vadd.f32 %v1534_v33, %v1448_v63  ;;  %v1546_v8 = vadd.f32 %v1532_v37, %v6681_v4  ;;  %v6028_v4 = vld [vmem:[%s8317_s4 + $0x8] ss:$16 sps:$4 sm:$0xff]  }
 0x732   :  { %v1549_v54 = vadd.f32 %v1543_v17, %v6690_v11  ;;  %v6033_v11 = vld [vmem:[%s8317_s4 + $0x24] ss:$16 sps:$4 sm:$0xff]   ;;  %v6070_v63 = vld [vmem:[%s8317_s4 + $0xe8] ss:$16 sps:$4 sm:$0xff]  }
 0x733   :  { %1550 = vadd.xlane.f32.xlu0 %v1546_v8  ;;  %v1547_v42 = vadd.f32 %v1535_v44, %v6683_v5  ;;  %v6030_v5 = vld [vmem:[%s8317_s4 + $0xc] ss:$16 sps:$4 sm:$0xff]   ;;  %1822 = vmatprep.subr.bf16.mxu0 %v6033_v11 }
 0x734   :  { %1873 = vmatprep.subr.bf16.mxu1 %v6030_v5  ;;  %1823 = vmatpush1.bf16.msra.mxu0 %v6031_v47  ;;  %v1604_v5 = vsub.s32 3, %v6702_v15 }
 0x735   :  { %1552 = vadd.xlane.f32.xlu1 %v1547_v42  ;;  %1874 = vmatpush1.bf16.msra.mxu1 %v6028_v4 }
 0x736   :  { %1875 = vmatprep.subr.bf16.mxu1 %v6036_v49  ;;  %1824 = vmatprep.subr.bf16.mxu0 %v6039_v40  ;;  %v6081_v40 = vld [vmem:[%s8318_s5 + $0x50] sm:$0xff]  }
 0x738   :  { %1825 = vmatpush1.bf16.msra.mxu0 %v6037_v62  ;;  %v6083_v62 = vld [vmem:[%s8318_s5 + $0x10] sm:$0xff]  }
 0x739   :  { %1556 = vadd.xlane.f32.xlu1 %v1549_v54  ;;  %1876 = vmatpush1.bf16.msra.mxu1 %v6034_v50  ;;  %v7182_v50 = vrot.slane %v7048_v58, %v1604_v5 }
 0x73a   :  { %1877 = vmatprep.subr.bf16.mxu1 %v6042_v43  ;;  %1826 = vmatprep.subr.bf16.mxu0 %v6045_v10  ;;  %v6082_v43 = vld [vmem:[%s8318_s5 + $0xd0] sm:$0xff]   ;;  %v6085_v10 = vld [vmem:[%s8318_s5 + $0x58] sm:$0xff]  }
 0x73c   :  { %1827 = vmatpush1.bf16.msra.mxu0 %v6043_v32  ;;  %v6087_v32 = vld [vmem:[%s8318_s5 + $0x18] sm:$0xff]  }
 0x73d   :  { %1878 = vmatpush1.bf16.msra.mxu1 %v6040_v45  ;;  %1828 = vmatprep.subr.bf16.mxu0 %v6051_v51  ;;  %v6084_v45 = vld [vmem:[%s8318_s5 + $0x90] sm:$0xff]   ;;  %v6089_v51 = vld [vmem:[%s8318_s5 + $0x60] sm:$0xff]  }
 0x73e   :  { %1879 = vmatprep.subr.bf16.mxu1 %v6048_v48  ;;  %v6086_v48 = vld [vmem:[%s8318_s5 + $0xd8] sm:$0xff]  }
 0x740   :  { %1829 = vmatpush1.bf16.msra.mxu0 %v6049_v9  ;;  %v6091_v9 = vld [vmem:[%s8318_s5 + $0x20] sm:$0xff]  }
 0x741   :  { %1880 = vmatpush1.bf16.msra.mxu1 %v6046_v22  ;;  %1830 = vmatprep.subr.bf16.mxu0 %v6057_v55  ;;  %v6088_v22 = vld [vmem:[%s8318_s5 + $0x98] sm:$0xff]   ;;  %v6093_v55 = vld [vmem:[%s8318_s5 + $0x68] sm:$0xff]  }
 0x742   :  { %1881 = vmatprep.subr.bf16.mxu1 %v6054_v52  ;;  %v6090_v52 = vld [vmem:[%s8318_s5 + $0xe0] sm:$0xff]  }
 0x744   :  { %1831 = vmatpush1.bf16.msra.mxu0 %v6055_v38  ;;  %v6095_v38 = vld [vmem:[%s8318_s5 + $0x28] sm:$0xff]  }
 0x745   :  { %1882 = vmatpush1.bf16.msra.mxu1 %v6052_v35  ;;  %1832 = vmatprep.subr.bf16.mxu0 %v6063_v20  ;;  %v6092_v35 = vld [vmem:[%s8318_s5 + $0xa0] sm:$0xff]   ;;  %v6098_v20 = vld [vmem:[%s8318_s5 + $0xf0] sm:$0xff]  }
 0x746   :  { %1883 = vmatprep.subr.bf16.mxu1 %v6060_v6  ;;  %v6094_v6 = vld [vmem:[%s8318_s5 + $0xe8] sm:$0xff]  }
 0x748   :  { %1833 = vmatpush1.bf16.msra.mxu0 %v6061_v56  ;;  %v6097_v56 = vld [vmem:[%s8318_s5 + $0x70] sm:$0xff]  }
 0x749   :  { %1884 = vmatpush1.bf16.msra.mxu1 %v6058_v12  ;;  %1834 = vmatprep.subr.bf16.mxu0 %v6069_v19  ;;  %v6096_v12 = vld [vmem:[%s8318_s5 + $0xa8] sm:$0xff]   ;;  %v6101_v19 = vld [vmem:[%s8318_s5 + $0x78] sm:$0xff]  }
 0x74a   :  { %1885 = vmatprep.subr.bf16.mxu1 %v6066_v24  ;;  %v6100_v24 = vld [vmem:[%s8318_s5 + $0xb0] sm:$0xff]  }
 0x74c   :  { %1835 = vmatpush1.bf16.msra.mxu0 %v6067_v2  ;;  %v6103_v2 = vld [vmem:[%s8318_s5 + $0x38] sm:$0xff]  }
 0x74d   :  { %1886 = vmatpush1.bf16.msra.mxu1 %v6064_v60  ;;  %v6099_v60 = vld [vmem:[%s8318_s5 + $0x30] sm:$0xff]  }
 0x74e   :  { %1887 = vmatprep.subr.bf16.mxu1 %v6072_v0  ;;  %v6102_v0 = vld [vmem:[%s8318_s5 + $0xf8] sm:$0xff]  }
 0x751   :  { %1888 = vmatpush1.bf16.msra.mxu1 %v6070_v63  ;;  %v6104_v63 = vld [vmem:[%s8318_s5 + $0xb8] sm:$0xff]  }
 0x7c0   :  { %v1551_v61 = vpop.xlane.xlu0 %1550 }
 0x7c1   :  { %v1558_v1 = vmul.f32 0.0078125, %v1551_v61 }
 0x7c2   :  { %v1553_v23 = vpop.xlane.xlu1 %1552 }
 0x7c3   :  { %v7080_v36 = vsub.f32 %v1546_v8, %v1558_v1  ;;  %v1559_v25 = vmul.f32 0.0078125, %v1553_v23 }
 0x7c5   :  { %v7082_v53 = vsub.f32 %v1547_v42, %v1559_v25  ;;  %v1566_v27 = vmul.f32 %v7080_v36, %v7080_v36  ;;  %v1596_v42 = vsub.s32 2, %v6702_v15  ;;  %v6073_v25 = vld [vmem:[%s8318_s5 + $0x40] sm:$0xff]  }
 0x7c6   :  { %v1557_v28 = vpop.xlane.xlu1 %1556  ;;  %5448 = vmatprep.subr.bf16.mxu0 %v6073_v25  ;;  %v6463_v25 = vld [vmem:[%s8319_s6 + $0x8] sm:$0xff] }
 0x7c7   :  { %v1561_v14 = vmul.f32 0.0078125, %v1557_v28  ;;  %1570 = vadd.xlane.f32.xlu0 %v1566_v27  ;;  %v1567_v34 = vmul.f32 %v7082_v53, %v7082_v53  ;;  %v7174_v4 = vrot.slane %v7048_v58, %v1596_v42  ;;  %v6075_v27 = vld [vmem:[%s8318_s5] sm:$0xff]  }
 0x7c8   :  { %v6076_v28 = vld [vmem:[%s8318_s5 + $0x80] sm:$0xff]  }
 0x7c9   :  { %v7086_v26 = vsub.f32 %v1549_v54, %v1561_v14  ;;  %v6077_v14 = vld [vmem:[%s8318_s5 + $0x48] sm:$0xff]  }
 0x7cb   :  { %1572 = vadd.xlane.f32.xlu0 %v1567_v34  ;;  %v1569_v46 = vmul.f32 %v7086_v26, %v7086_v26  ;;  %v6078_v34 = vld [vmem:[%s8318_s5 + $0xc8] sm:$0xff]  }
 0x7cd   :  { %1576 = vadd.xlane.f32.xlu1 %v1569_v46  ;;  %v6079_v46 = vld [vmem:[%s8318_s5 + $0x8] sm:$0xff]  }
 0x7cf   :  { %1554 = vadd.xlane.f32.xlu0 %v1548_v59 }
 0x854   :  { %v1571_v29 = vpop.xlane.xlu0 %1570 }
 0x855   :  { %v1578_v30 = vmul.f32 0.0078125, %v1571_v29 }
 0x857   :  { %v1582_v7 = vadd.f32 1e-12, %v1578_v30 }
 0x858   :  { %v1573_v37 = vpop.xlane.xlu0 %1572 }
 0x859   :  { %6305 = vrsqrt.f32 %v1582_v7  ;;  %v1579_v31 = vmul.f32 0.0078125, %v1573_v37 }
 0x85a   :  { %v1577_v29 = vpop.xlane.xlu1 %1576 }
 0x85b   :  { %v1583_v33 = vadd.f32 1e-12, %v1579_v31  ;;  %v1581_v30 = vmul.f32 0.0078125, %v1577_v29 }
 0x85c   :  { %v1555_v44 = vpop.xlane.xlu0 %1554 }
 0x85d   :  { %6307 = vrsqrt.f32 %v1583_v33  ;;  %v1560_v8 = vmul.f32 0.0078125, %v1555_v44  ;;  %v1585_v7 = vadd.f32 1e-12, %v1581_v30 }
 0x85f   :  { %v7165_v17 = vsub.f32 %v1548_v59, %v1560_v8  ;;  %v6080_v59 = vld [vmem:[%s8318_s5 + $0x88] sm:$0xff]   ;;  %6309 = vrsqrt.f32 %v1585_v7 }
 0x861   :  { %v1568_v54 = vmul.f32 %v7165_v17, %v7165_v17 }
 0x863   :  { %v6306_v41 = vpop.eup %6305  ;;  %1574 = vadd.xlane.f32.xlu0 %v1568_v54 }
 0x864   :  { %v1590_v18 = vmul.f32 %v6306_v41, %v7080_v36 }
 0x866   :  { %v1598_v47 = vmul.f32 %v7174_v4, %v1590_v18 }
 0x867   :  { %v6308_v11 = vpop.eup %6307 }
 0x868   :  { %v1591_v49 = vmul.f32 %v6308_v11, %v7082_v53  ;;  %v7186_v1 = vadd.f32 %v7182_v50, %v1598_v47  ;;  %v6074_v53 = vld [vmem:[%s8318_s5 + $0xc0] sm:$0xff]  }
 0x869   :  { %5476 = vmatprep.subr.bf16.mxu1 %v6074_v53  ;;  %v6310_v44 = vpop.eup %6309 }
 0x86a   :  { %v1599_v61 = vmul.f32 %v7174_v4, %v1591_v49  ;;  %v1593_v8 = vmul.f32 %v6310_v44, %v7086_v26  ;;  %v7304_v26 = vsub.s32 4, %v6702_v15 }
 0x86c   :  { %v7189_v23 = vadd.f32 %v7182_v50, %v1599_v61  ;;  %v1601_v18 = vmul.f32 %v7174_v4, %v1593_v8  ;;  %v7323_v53 = vrot.slane %v6463_v25, %v7304_v26 }
 0x86e   :  { %v1610_v36 = vpack.c.bf16 %v7189_v23, %v7186_v1  ;;  %v7299_v47 = vadd.f32 %v7182_v50, %v1601_v18 }
 0x870   :  { %1853 = vmatmul.mubr.bf16.vlgmr.msra.gmra.mrb[40].mxu0 %v1610_v36  ;;  %1906 = vmatmul.mubr.bf16.vlgmr.msra.gmra.mrb[40].mxu1 %v1610_v36 }
 0x871   :  { %1862 = vmatprep.mubr.bf16.mxu0 %v6507_v39  ;;  %1915 = vmatprep.mubr.bf16.mxu1 %v6507_v39 }
 0x872   :  { %5449 = vmatpush3.bf16.msra.mxu0 %v6075_v27  ;;  %5477 = vmatpush3.bf16.msra.mxu1 %v6076_v28 }
 0x873   :  { %5450 = vmatprep.subr.bf16.mxu0 %v6077_v14  ;;  %5478 = vmatprep.subr.bf16.mxu1 %v6078_v34 }
 0x876   :  { %5451 = vmatpush3.bf16.msra.mxu0 %v6079_v46  ;;  %5479 = vmatpush3.bf16.msra.mxu1 %v6080_v59 }
 0x877   :  { %5452 = vmatprep.subr.bf16.mxu0 %v6081_v40  ;;  %5480 = vmatprep.subr.bf16.mxu1 %v6082_v43 }
 0x87a   :  { %5453 = vmatpush3.bf16.msra.mxu0 %v6083_v62  ;;  %5481 = vmatpush3.bf16.msra.mxu1 %v6084_v45 }
 0x87b   :  { %5454 = vmatprep.subr.bf16.mxu0 %v6085_v10  ;;  %5482 = vmatprep.subr.bf16.mxu1 %v6086_v48 }
 0x87e   :  { %5455 = vmatpush3.bf16.msra.mxu0 %v6087_v32  ;;  %5483 = vmatpush3.bf16.msra.mxu1 %v6088_v22 }
 0x87f   :  { %5456 = vmatprep.subr.bf16.mxu0 %v6089_v51  ;;  %5484 = vmatprep.subr.bf16.mxu1 %v6090_v52 }
 0x882   :  { %5457 = vmatpush3.bf16.msra.mxu0 %v6091_v9  ;;  %5485 = vmatpush3.bf16.msra.mxu1 %v6092_v35 }
 0x883   :  { %5458 = vmatprep.subr.bf16.mxu0 %v6093_v55  ;;  %5486 = vmatprep.subr.bf16.mxu1 %v6094_v6 }
 0x886   :  { %5459 = vmatpush3.bf16.msra.mxu0 %v6095_v38  ;;  %5487 = vmatpush3.bf16.msra.mxu1 %v6096_v12 }
 0x887   :  { %5460 = vmatprep.subr.bf16.mxu0 %v6097_v56  ;;  %5488 = vmatprep.subr.bf16.mxu1 %v6098_v20 }
 0x88a   :  { %5461 = vmatpush3.bf16.msra.mxu0 %v6099_v60  ;;  %5489 = vmatpush3.bf16.msra.mxu1 %v6100_v24 }
 0x88b   :  { %5462 = vmatprep.subr.bf16.mxu0 %v6101_v19  ;;  %5490 = vmatprep.subr.bf16.mxu1 %v6102_v0 }
 0x88e   :  { %5463 = vmatpush3.bf16.msra.mxu0 %v6103_v2  ;;  %5491 = vmatpush3.bf16.msra.mxu1 %v6104_v63 }
 0x8f0   :  { %v1575_v37 = vpop.xlane.xlu0 %1574 }
 0x8f1   :  { %v1580_v31 = vmul.f32 0.0078125, %v1575_v37 }
 0x8f3   :  { %v1584_v33 = vadd.f32 1e-12, %v1580_v31 }
 0x8f5   :  { %6311 = vrsqrt.f32 %v1584_v33 }
 0x8ff   :  { %v6312_v54 = vpop.eup %6311 }
 0x900   :  { %v1592_v41 = vmul.f32 %v6312_v54, %v7165_v17  ;;  %v120_v17 = vld [vmem:[%s8319_s6 + $0x18] sm:$0xff] }
 0x901   :  { %v7326_v27 = vrot.slane %v120_v17, %v7304_v26 }
 0x902   :  { %v1600_v11 = vmul.f32 %v7174_v4, %v1592_v41  ;;  %v7311_v4 = vrot.slane %v7048_v58, %v7304_v26 }
 0x904   :  { %v7296_v49 = vadd.f32 %v7182_v50, %v1600_v11  ;;  %v6462_v50 = vld [vmem:[%s8319_s6 + $0x10] sm:$0xff] }
 0x905   :  { %v7317_v36 = vrot.slane %v6462_v50, %v7304_v26 }
 0x906   :  { %v1611_v61 = vpack.c.bf16 %v7299_v47, %v7296_v49 }
 0x908   :  { %1863 = vmatmul.mubr.bf16.gmra.mrb[44].mxu0 %v1611_v61  ;;  %1916 = vmatmul.mubr.bf16.gmra.mrb[44].mxu1 %v1611_v61 }
 0x943   :  { %v1854_v28 = vpop.f32.mrb[40].mxu0  ;;  %v1907_v14 = vpop.f32.mrb[40].mxu1 }
 0x944   :  { %v7329_v34 = vadd.f32 %v1854_v28, %v7311_v4  ;;  %v7332_v46 = vadd.f32 %v1907_v14, %v7317_v36  ;;  %v1856_v59 = vpop.f32.mrb[41].mxu0  ;;  %v1909_v40 = vpop.f32.mrb[41].mxu1 }
 0x945   :  { %v7335_v43 = vadd.f32 %v1856_v59, %v7323_v53  ;;  %v7338_v62 = vadd.f32 %v1909_v40, %v7326_v27  ;;  %v1858_v45 = vpop.f32.mrb[42].mxu0  ;;  %v1911_v10 = vpop.f32.mrb[42].mxu1 }
 0x946   :  { %v1942_v48 = vmul.f32 0.044715, %v7329_v34  ;;  %v1944_v32 = vmul.f32 0.044715, %v7332_v46  ;;  %v1859_v52 = vadd.f32 %v1858_v45, %v7311_v4  ;;  %v1912_v9 = vadd.f32 %v1911_v10, %v7317_v36  ;;  %v1860_v35 = vpop.f32.mrb[43].mxu0  ;;  %v1913_v55 = vpop.f32.mrb[43].mxu1 }
 0x947   :  { %v1943_v22 = vmul.f32 0.044715, %v7335_v43  ;;  %v1945_v51 = vmul.f32 0.044715, %v7338_v62  ;;  %v1861_v12 = vadd.f32 %v1860_v35, %v7323_v53  ;;  %v7350_v56 = vadd.f32 %v1913_v55, %v7326_v27 }
 0x948   :  { %v1958_v6 = vmul.f32 %v1942_v48, %v7329_v34  ;;  %v1960_v38 = vmul.f32 %v1944_v32, %v7332_v46  ;;  %v1946_v24 = vmul.f32 0.044715, %v1859_v52  ;;  %v1948_v2 = vmul.f32 0.044715, %v1912_v9 }
 0x949   :  { %v1959_v20 = vmul.f32 %v1943_v22, %v7335_v43  ;;  %v1961_v60 = vmul.f32 %v1945_v51, %v7338_v62  ;;  %v1947_v30 = vmul.f32 0.044715, %v1861_v12  ;;  %v1949_v33 = vmul.f32 0.044715, %v7350_v56 }
 0x94a   :  { %v1974_v19 = vmul.f32 %v1958_v6, %v7329_v34  ;;  %v1976_v0 = vmul.f32 %v1960_v38, %v7332_v46  ;;  %v1962_v29 = vmul.f32 %v1946_v24, %v1859_v52  ;;  %v1964_v31 = vmul.f32 %v1948_v2, %v1912_v9 }
 0x94b   :  { %v1975_v63 = vmul.f32 %v1959_v20, %v7335_v43  ;;  %v1977_v44 = vmul.f32 %v1961_v60, %v7338_v62  ;;  %v1963_v54 = vmul.f32 %v1947_v30, %v1861_v12  ;;  %v1965_v61 = vmul.f32 %v1949_v33, %v7350_v56 }
 0x94c   :  { %v1990_v7 = vadd.f32 %v1974_v19, %v7329_v34  ;;  %v1992_v37 = vadd.f32 %v1976_v0, %v7332_v46  ;;  %v1978_v8 = vmul.f32 %v1962_v29, %v1859_v52  ;;  %v1980_v11 = vmul.f32 %v1964_v31, %v1912_v9 }
 0x94d   :  { %v1979_v50 = vmul.f32 %v1963_v54, %v1861_v12  ;;  %v1991_v25 = vadd.f32 %v1975_v63, %v7335_v43  ;;  %v1981_v14 = vmul.f32 %v1965_v61, %v7350_v56  ;;  %v1993_v48 = vadd.f32 %v1977_v44, %v7338_v62 }
 0x94e   :  { %v2006_v41 = vmul.f32 0.7978846, %v1990_v7  ;;  %v2008_v18 = vmul.f32 0.7978846, %v1992_v37  ;;  %v1994_v17 = vadd.f32 %v1978_v8, %v1859_v52  ;;  %v1996_v28 = vadd.f32 %v1980_v11, %v1912_v9 }
 0x94f   :  { %v1995_v40 = vadd.f32 %v1979_v50, %v1861_v12  ;;  %v2007_v45 = vmul.f32 0.7978846, %v1991_v25  ;;  %v1997_v32 = vadd.f32 %v1981_v14, %v7350_v56  ;;  %v2009_v51 = vmul.f32 0.7978846, %v1993_v48 }
 0x950   :  { %6313 = vtanh.f32 %v2006_v41  ;;  %v2010_v59 = vmul.f32 0.7978846, %v1994_v17  ;;  %v2012_v10 = vmul.f32 0.7978846, %v1996_v28  ;;  %v1926_v19 = vmul.f32 0.5, %v7329_v34 }
 0x951   :  { %6315 = vtanh.f32 %v2008_v18  ;;  %v2011_v22 = vmul.f32 0.7978846, %v1995_v40  ;;  %v2013_v35 = vmul.f32 0.7978846, %v1997_v32  ;;  %v1930_v0 = vmul.f32 0.5, %v1859_v52 }
 0x952   :  { %6317 = vtanh.f32 %v2010_v59  ;;  %v1928_v29 = vmul.f32 0.5, %v7332_v46  ;;  %v1932_v30 = vmul.f32 0.5, %v1912_v9  ;;  %v1927_v31 = vmul.f32 0.5, %v7335_v43 }
 0x953   :  { %6319 = vtanh.f32 %v2012_v10  ;;  %v1931_v41 = vmul.f32 0.5, %v1861_v12  ;;  %v1929_v34 = vmul.f32 0.5, %v7338_v62  ;;  %v1933_v52 = vmul.f32 0.5, %v7350_v56 }
 0x954   :  { %6321 = vtanh.f32 %v2007_v45 }
 0x955   :  { %6323 = vtanh.f32 %v2011_v22 }
 0x956   :  { %6325 = vtanh.f32 %v2009_v51 }
 0x957   :  { %6327 = vtanh.f32 %v2013_v35 }
 0x95a   :  { %v6314_v55 = vpop.eup %6313 }
 0x95b   :  { %v6316_v6 = vpop.eup %6315  ;;  %v2038_v38 = vadd.f32 1.0, %v6314_v55 }
 0x95c   :  { %v6318_v20 = vpop.eup %6317  ;;  %v2040_v60 = vadd.f32 1.0, %v6316_v6 }
 0x95d   :  { %v6320_v24 = vpop.eup %6319  ;;  %v2042_v2 = vadd.f32 1.0, %v6318_v20  ;;  %v2054_v44 = vmul.f32 %v2038_v38, %v1926_v19 }
 0x95e   :  { %v6322_v63 = vpop.eup %6321  ;;  %v2044_v7 = vadd.f32 1.0, %v6320_v24  ;;  %v2056_v11 = vmul.f32 %v2040_v60, %v1928_v29 }
 0x95f   :  { %v6324_v37 = vpop.eup %6323  ;;  %v2039_v33 = vadd.f32 1.0, %v6322_v63  ;;  %v2058_v8 = vmul.f32 %v2042_v2, %v1930_v0 }
 0x960   :  { %v6326_v54 = vpop.eup %6325  ;;  %v2043_v18 = vadd.f32 1.0, %v6324_v37  ;;  %v2060_v61 = vmul.f32 %v2044_v7, %v1932_v30 }
 0x961   :  { %v6328_v17 = vpop.eup %6327  ;;  %v2041_v50 = vadd.f32 1.0, %v6326_v54  ;;  %v2070_v46 = vpack.c.bf16 %v2058_v8, %v2054_v44  ;;  %v2055_v9 = vmul.f32 %v2039_v33, %v1927_v31 }
 0x962   :  { %v2059_v25 = vmul.f32 %v2043_v18, %v1931_v41  ;;  %v2045_v28 = vadd.f32 1.0, %v6328_v17  ;;  %v2072_v14 = vpack.c.bf16 %v2060_v61, %v2056_v11 }
 0x963   :  { %v2057_v59 = vmul.f32 %v2041_v50, %v1929_v34 }
 0x964   :  { %v2071_v43 = vpack.c.bf16 %v2059_v25, %v2055_v9  ;;  %v2061_v40 = vmul.f32 %v2045_v28, %v1933_v52 }
 0x966   :  { %2370 = vmatprep.mubr.bf16.mxu0 %v2071_v43  ;;  %v2073_v45 = vpack.c.bf16 %v2061_v40, %v2057_v59 }
 0x967   :  { %2371 = vmatmul.mubr.bf16.vlgmr.msra.gmra.mrb[48].mxu0 %v2070_v46 }
 0x968   :  { %2419 = vmatprep.mubr.bf16.mxu1 %v2073_v45 }
 0x969   :  { %2420 = vmatmul.mubr.bf16.vlgmr.msra.gmra.mrb[48].mxu1 %v2072_v14 }
 0x9db   :  { %v1864_v12 = vpop.f32.mrb[44].mxu0  ;;  %v1917_v10 = vpop.f32.mrb[44].mxu1 }
 0x9dc   :  { %v7372_v62 = vadd.f32 %v1864_v12, %v7311_v4  ;;  %v7375_v56 = vadd.f32 %v1917_v10, %v7317_v36  ;;  %v1866_v48 = vpop.f32.mrb[45].mxu0  ;;  %v1919_v32 = vpop.f32.mrb[45].mxu1 }
 0x9dd   :  { %v7378_v22 = vadd.f32 %v1866_v48, %v7323_v53  ;;  %v7381_v51 = vadd.f32 %v1919_v32, %v7326_v27  ;;  %v1868_v35 = vpop.f32.mrb[46].mxu0  ;;  %v1921_v55 = vpop.f32.mrb[46].mxu1 }
 0x9de   :  { %v1950_v6 = vmul.f32 0.044715, %v7372_v62  ;;  %v1952_v38 = vmul.f32 0.044715, %v7375_v56  ;;  %v7386_v20 = vadd.f32 %v1868_v35, %v7311_v4  ;;  %v7389_v60 = vadd.f32 %v1921_v55, %v7317_v36  ;;  %v1870_v24 = vpop.f32.mrb[47].mxu0  ;;  %v1923_v19 = vpop.f32.mrb[47].mxu1 }
 0x9df   :  { %v1951_v0 = vmul.f32 0.044715, %v7378_v22  ;;  %v1953_v2 = vmul.f32 0.044715, %v7381_v51  ;;  %v1871_v63 = vadd.f32 %v1870_v24, %v7323_v53  ;;  %v1924_v29 = vadd.f32 %v1923_v19, %v7326_v27 }
 0x9e0   :  { %v1966_v30 = vmul.f32 %v1950_v6, %v7372_v62  ;;  %v1954_v7 = vmul.f32 0.044715, %v7386_v20  ;;  %v1956_v4 = vmul.f32 0.044715, %v7389_v60  ;;  %v1968_v8 = vmul.f32 %v1952_v38, %v7375_v56 }
 0x9e1   :  { %v1967_v37 = vmul.f32 %v1951_v0, %v7378_v22  ;;  %v1969_v36 = vmul.f32 %v1953_v2, %v7381_v51  ;;  %v1955_v31 = vmul.f32 0.044715, %v1871_v63  ;;  %v1957_v33 = vmul.f32 0.044715, %v1924_v29 }
 0x9e2   :  { %v1982_v44 = vmul.f32 %v1966_v30, %v7372_v62  ;;  %v1970_v53 = vmul.f32 %v1954_v7, %v7386_v20  ;;  %v1972_v27 = vmul.f32 %v1956_v4, %v7389_v60  ;;  %v1984_v50 = vmul.f32 %v1968_v8, %v7375_v56 }
 0x9e3   :  { %v1983_v54 = vmul.f32 %v1967_v37, %v7378_v22  ;;  %v1985_v41 = vmul.f32 %v1969_v36, %v7381_v51  ;;  %v1971_v18 = vmul.f32 %v1955_v31, %v1871_v63  ;;  %v1973_v11 = vmul.f32 %v1957_v33, %v1924_v29 }
 0x9e4   :  { %v1986_v61 = vmul.f32 %v1970_v53, %v7386_v20  ;;  %v1988_v46 = vmul.f32 %v1972_v27, %v7389_v60  ;;  %v1998_v43 = vadd.f32 %v1982_v44, %v7372_v62  ;;  %v2000_v32 = vadd.f32 %v1984_v50, %v7375_v56 }
 0x9e5   :  { %v1987_v17 = vmul.f32 %v1971_v18, %v1871_v63  ;;  %v1989_v34 = vmul.f32 %v1973_v11, %v1924_v29  ;;  %v1999_v52 = vadd.f32 %v1983_v54, %v7378_v22  ;;  %v2001_v9 = vadd.f32 %v1985_v41, %v7381_v51 }
 0x9e6   :  { %v2002_v40 = vadd.f32 %v1986_v61, %v7386_v20  ;;  %v2014_v10 = vmul.f32 0.7978846, %v1998_v43  ;;  %v2004_v35 = vadd.f32 %v1988_v46, %v7389_v60  ;;  %v2016_v55 = vmul.f32 0.7978846, %v2000_v32 }
 0x9e7   :  { %v2003_v25 = vadd.f32 %v1987_v17, %v1871_v63  ;;  %v2015_v28 = vmul.f32 0.7978846, %v1999_v52  ;;  %v2005_v14 = vadd.f32 %v1989_v34, %v1924_v29  ;;  %v2017_v59 = vmul.f32 0.7978846, %v2001_v9 }
 0x9e8   :  { %v2018_v48 = vmul.f32 0.7978846, %v2002_v40  ;;  %v2020_v6 = vmul.f32 0.7978846, %v2004_v35  ;;  %v1935_v7 = vmul.f32 0.5, %v7378_v22  ;;  %v1939_v4 = vmul.f32 0.5, %v1871_v63 }
 0x9e9   :  { %v2019_v45 = vmul.f32 0.7978846, %v2003_v25  ;;  %6329 = vtanh.f32 %v2015_v28  ;;  %v2021_v12 = vmul.f32 0.7978846, %v2005_v14  ;;  %v1937_v31 = vmul.f32 0.5, %v7381_v51 }
 0x9ea   :  { %6331 = vtanh.f32 %v2017_v59  ;;  %v1941_v33 = vmul.f32 0.5, %v1924_v29  ;;  %v1934_v54 = vmul.f32 0.5, %v7372_v62  ;;  %v1938_v17 = vmul.f32 0.5, %v7386_v20 }
 0x9eb   :  { %6333 = vtanh.f32 %v2019_v45  ;;  %v1936_v52 = vmul.f32 0.5, %v7375_v56  ;;  %v1940_v51 = vmul.f32 0.5, %v7389_v60  ;;  %v2144_v20 = vsub.s32 5, %v6702_v15 }
 0x9ec   :  { %6335 = vtanh.f32 %v2021_v12 }
 0x9ed   :  { %6337 = vtanh.f32 %v2014_v10  ;;  %v2145_v60 = vrot.slane %v7048_v58, %v2144_v20 }
 0x9ee   :  { %6339 = vtanh.f32 %v2018_v48 }
 0x9ef   :  { %6341 = vtanh.f32 %v2016_v55 }
 0x9f0   :  { %6343 = vtanh.f32 %v2020_v6 }
 0x9f3   :  { %v6330_v38 = vpop.eup %6329 }
 0x9f4   :  { %v6332_v24 = vpop.eup %6331  ;;  %v2047_v19 = vadd.f32 1.0, %v6330_v38 }
 0x9f5   :  { %v6334_v0 = vpop.eup %6333  ;;  %v2049_v2 = vadd.f32 1.0, %v6332_v24 }
 0x9f6   :  { %v6336_v30 = vpop.eup %6335  ;;  %v2051_v37 = vadd.f32 1.0, %v6334_v0  ;;  %v2063_v53 = vmul.f32 %v2047_v19, %v1935_v7  ;;  %v6105_v7 = vld [vmem:[%s8315_s2 + $0xc0] ss:$12 sps:$4 sm:$0xff]  }
 0x9f7   :  { %v6338_v36 = vpop.eup %6337  ;;  %v2053_v44 = vadd.f32 1.0, %v6336_v30  ;;  %v2065_v11 = vmul.f32 %v2049_v2, %v1937_v31 }
 0x9f8   :  { %v6340_v8 = vpop.eup %6339  ;;  %v2067_v27 = vmul.f32 %v2051_v37, %v1939_v4  ;;  %v2046_v41 = vadd.f32 1.0, %v6338_v36  ;;  %v6107_v4 = vld [vmem:[%s8315_s2 + $0xc4] ss:$12 sps:$4 sm:$0xff]   ;;  %v6110_v37 = vld [vmem:[%s8315_s2 + $0xdc] ss:$12 sps:$4 sm:$0xff]  }
 0x9f9   :  { %v6342_v18 = vpop.eup %6341  ;;  %v2069_v61 = vmul.f32 %v2053_v44, %v1941_v33  ;;  %v2050_v34 = vadd.f32 1.0, %v6340_v8  ;;  %2680 = vmatprep.subr.bf16.mxu0 %v6107_v4 }
 0x9fa   :  { %v6344_v22 = vpop.eup %6343  ;;  %v2075_v63 = vpack.c.bf16 %v2067_v27, %v2063_v53  ;;  %v2048_v29 = vadd.f32 1.0, %v6342_v18  ;;  %v2062_v46 = vmul.f32 %v2046_v41, %v1934_v54  ;;  %2681 = vmatpush1.bf16.msra.mxu0 %v6105_v7 }
 0x9fb   :  { %v2077_v50 = vpack.c.bf16 %v2069_v61, %v2065_v11  ;;  %v2066_v9 = vmul.f32 %v2050_v34, %v1938_v17  ;;  %v2052_v25 = vadd.f32 1.0, %v6344_v22  ;;  %2682 = vmatprep.subr.bf16.mxu0 %v6110_v37 }
 0x9fc   :  { %2378 = vmatprep.mubr.bf16.mxu0 %v2075_v63  ;;  %v2064_v28 = vmul.f32 %v2048_v29, %v1936_v52 }
 0x9fd   :  { %2427 = vmatprep.mubr.bf16.mxu1 %v2077_v50  ;;  %v2074_v62 = vpack.c.bf16 %v2066_v9, %v2062_v46  ;;  %v2068_v14 = vmul.f32 %v2052_v25, %v1940_v51 }
 0x9ff   :  { %2379 = vmatmul.mubr.bf16.gmra.mrb[52].mxu0 %v2074_v62  ;;  %v2076_v43 = vpack.c.bf16 %v2068_v14, %v2064_v28  ;;  %v6113_v14 = vld [vmem:[%s8315_s2 + $0xf4] ss:$12 sps:$4 sm:$0xff]  }
 0xa00   :  { %2712 = vmatprep.mubr.bf16.mxu0 %v6507_v39 }
 0xa01   :  { %2428 = vmatmul.mubr.bf16.gmra.mrb[52].mxu1 %v2076_v43  ;;  %v6111_v43 = vld [vmem:[%s8315_s2 + $0xf0] ss:$12 sps:$4 sm:$0xff]  }
 0xa3a   :  { %v5464_v56 = vpop.f32.mrb[48].mxu0 }
 0xa3b   :  { %v5465_v59 = vpop.f32.mrb[49].mxu0 }
 0xa3c   :  { %v5492_v40 = vpop.f32.mrb[48].mxu1  ;;  %v5466_v45 = vadd.f32 %v5465_v59, %v5464_v56  ;;  %v5467_v12 = vpop.f32.mrb[50].mxu0  ;;  %v6114_v56 = vld [vmem:[%s8315_s2 + $0x108] ss:$12 sps:$4 sm:$0xff]  }
 0xa3d   :  { %v5493_v10 = vpop.f32.mrb[49].mxu1  ;;  %v5468_v48 = vpop.f32.mrb[51].mxu0  ;;  %v6122_v59 = vld [vmem:[%s8315_s2 + $0x13c] ss:$12 sps:$4 sm:$0xff]  }
 0xa3e   :  { %v2373_v32 = vadd.f32 %v5466_v45, %v2145_v60  ;;  %v5494_v35 = vadd.f32 %v5493_v10, %v5492_v40  ;;  %v5495_v55 = vpop.f32.mrb[50].mxu1  ;;  %v5469_v6 = vadd.f32 %v5468_v48, %v5467_v12  ;;  %v6120_v40 = vld [vmem:[%s8315_s2 + $0x138] ss:$12 sps:$4 sm:$0xff]   ;;  %v6125_v45 = vld [vmem:[%s8315_s2 + $0x154] ss:$12 sps:$4 sm:$0xff]  }
 0xa3f   :  { %v5496_v38 = vpop.f32.mrb[51].mxu1  ;;  %v6123_v12 = vld [vmem:[%s8315_s2 + $0x150] ss:$12 sps:$4 sm:$0xff]   ;;  %v6128_v10 = vld [vmem:[%s8315_s2 + $0x16c] ss:$12 sps:$4 sm:$0xff]  }
 0xa40   :  { %v2422_v24 = vadd.f32 %v5494_v35, %v2373_v32  ;;  %v2376_v19 = vadd.f32 %v5469_v6, %v2145_v60  ;;  %v5497_v0 = vadd.f32 %v5496_v38, %v5495_v55  ;;  %v6126_v48 = vld [vmem:[%s8315_s2 + $0x168] ss:$12 sps:$4 sm:$0xff]   ;;  %v6130_v35 = vld [vmem:[%s8315_s2 + $0xe0] ss:$12 sps:$4 sm:$0xff]  }
 0xa41   :  { %v6129_v32 = vld [vmem:[%s8315_s2 + $0xc8] ss:$12 sps:$4 sm:$0xff]  }
 0xa42   :  { %v2425_v2 = vadd.f32 %v5497_v0, %v2376_v19  ;;  %v2436_v30 = vadd.f32 %v2422_v24, %v7186_v1  ;;  %v6108_v1 = vld [vmem:[%s8315_s2 + $0xd8] ss:$12 sps:$4 sm:$0xff]   ;;  %5757 = vmatprep.subr.bf16.mxu1 %v6129_v32 }
 0xa43   :  { %2683 = vmatpush1.bf16.msra.mxu0 %v6108_v1  ;;  %5758 = vmatpush3.bf16.msra.mxu1 %v6129_v32 }
 0xa44   :  { %2440 = vadd.xlane.f32.xlu0 %v2436_v30  ;;  %v2437_v58 = vadd.f32 %v2425_v2, %v7189_v23  ;;  %2684 = vmatprep.subr.bf16.mxu0 %v6113_v14 }
 0xa45   :  { %5759 = vmatprep.subr.bf16.mxu1 %v6130_v35 }
 0xa46   :  { %2442 = vadd.xlane.f32.xlu1 %v2437_v58 }
 0xa47   :  { %2685 = vmatpush1.bf16.msra.mxu0 %v6111_v43  ;;  %5760 = vmatpush3.bf16.msra.mxu1 %v6130_v35 }
 0xad1   :  { %v2441_v23 = vpop.xlane.xlu0 %2440 }
 0xad2   :  { %v5470_v36 = vpop.f32.mrb[52].mxu0  ;;  %v2448_v31 = vmul.f32 0.0078125, %v2441_v23  ;;  %v2486_v23 = vsub.s32 6, %v6702_v15 }
 0xad3   :  { %v5471_v33 = vpop.f32.mrb[53].mxu0  ;;  %v2443_v8 = vpop.xlane.xlu1 %2442 }
 0xad4   :  { %v5498_v44 = vpop.f32.mrb[52].mxu1  ;;  %v5472_v53 = vadd.f32 %v5471_v33, %v5470_v36  ;;  %v7440_v27 = vsub.f32 %v2436_v30, %v2448_v31  ;;  %v2449_v41 = vmul.f32 0.0078125, %v2443_v8  ;;  %v5473_v18 = vpop.f32.mrb[54].mxu0  ;;  %v6464_v31 = vld [vmem:[%s8319_s6] sm:$0xff] }
 0xad5   :  { %v5499_v54 = vpop.f32.mrb[53].mxu1  ;;  %v5474_v34 = vpop.f32.mrb[55].mxu0  ;;  %v2487_v33 = vrot.slane %v6464_v31, %v2486_v23 }
 0xad6   :  { %v5500_v11 = vadd.f32 %v5499_v54, %v5498_v44  ;;  %v2381_v61 = vadd.f32 %v5472_v53, %v2145_v60  ;;  %v5501_v17 = vpop.f32.mrb[54].mxu1  ;;  %v7442_v22 = vsub.f32 %v2437_v58, %v2449_v41  ;;  %v5475_v63 = vadd.f32 %v5474_v34, %v5473_v18 }
 0xad7   :  { %v5502_v52 = vpop.f32.mrb[55].mxu1  ;;  %v2456_v51 = vmul.f32 %v7440_v27, %v7440_v27  ;;  %v2494_v44 = vsub.s32 7, %v6702_v15 }
 0xad8   :  { %v5503_v29 = vadd.f32 %v5502_v52, %v5501_v17  ;;  %v2430_v50 = vadd.f32 %v5500_v11, %v2381_v61  ;;  %v2384_v46 = vadd.f32 %v5475_v63, %v2145_v60  ;;  %v2457_v9 = vmul.f32 %v7442_v22, %v7442_v22  ;;  %v6117_v60 = vld [vmem:[%s8315_s2 + $0x120] ss:$12 sps:$4 sm:$0xff]   ;;  %v6133_v52 = vld [vmem:[%s8315_s2 + $0x128] ss:$12 sps:$4 sm:$0xff]  }
 0xad9   :  { %2460 = vadd.xlane.f32.xlu0 %v2456_v51  ;;  %v2495_v11 = vrot.slane %v6464_v31, %v2494_v44  ;;  %v6134_v51 = vld [vmem:[%s8315_s2 + $0x140] ss:$12 sps:$4 sm:$0xff]  }
 0xada   :  { %v2438_v25 = vadd.f32 %v2430_v50, %v7296_v49  ;;  %v2433_v62 = vadd.f32 %v5503_v29, %v2384_v46  ;;  %2462 = vadd.xlane.f32.xlu1 %v2457_v9  ;;  %v6116_v49 = vld [vmem:[%s8315_s2 + $0x10c] ss:$12 sps:$4 sm:$0xff]   ;;  %v6136_v50 = vld [vmem:[%s8315_s2 + $0x170] ss:$12 sps:$4 sm:$0xff]  }
 0xadb   :  { %2686 = vmatprep.subr.bf16.mxu0 %v6116_v49  ;;  %v6135_v29 = vld [vmem:[%s8315_s2 + $0x158] ss:$12 sps:$4 sm:$0xff]  }
 0xadc   :  { %v2439_v28 = vadd.f32 %v2433_v62, %v7299_v47  ;;  %2687 = vmatpush1.bf16.msra.mxu0 %v6114_v56  ;;  %v6119_v47 = vld [vmem:[%s8315_s2 + $0x124] ss:$12 sps:$4 sm:$0xff]  }
 0xadd   :  { %2444 = vadd.xlane.f32.xlu0 %v2438_v25  ;;  %2688 = vmatprep.subr.bf16.mxu0 %v6119_v47 }
 0xade   :  { %2446 = vadd.xlane.f32.xlu1 %v2439_v28 }
 0xae0   :  { %2689 = vmatpush1.bf16.msra.mxu0 %v6117_v60 }
 0xae1   :  { %2690 = vmatprep.subr.bf16.mxu0 %v6122_v59 }
 0xae4   :  { %2691 = vmatpush1.bf16.msra.mxu0 %v6120_v40 }
 0xae5   :  { %2692 = vmatprep.subr.bf16.mxu0 %v6125_v45 }
 0xae8   :  { %2693 = vmatpush1.bf16.msra.mxu0 %v6123_v12 }
 0xae9   :  { %2694 = vmatprep.subr.bf16.mxu0 %v6128_v10  ;;  %v7543_v10 = vld [vmem:[%s8319_s6 + $0x20] sm:$0xff] }
 0xaea   :  { %v2543_v32 = vrot.slane %v7543_v10, %v6705_v16 }
 0xaec   :  { %2695 = vmatpush1.bf16.msra.mxu0 %v6126_v48  ;;  %v5126_v48 = vld [vmem:[%s8319_s6 + $0x28] sm:$0xff] }
 0xaed   :  { %5777 = vmatprep.subr.bf16.mxu0 %v6508_v13 }
 0xb66   :  { %v2461_v55 = vpop.xlane.xlu0 %2460 }
 0xb67   :  { %v2468_v6 = vmul.f32 0.0078125, %v2461_v55  ;;  %v2463_v38 = vpop.xlane.xlu1 %2462  ;;  %v2547_v55 = vrot.slane %v5126_v48, %v6705_v16 }
 0xb68   :  { %v2469_v19 = vmul.f32 0.0078125, %v2463_v38 }
 0xb69   :  { %v2472_v24 = vadd.f32 1e-12, %v2468_v6 }
 0xb6a   :  { %v2445_v0 = vpop.xlane.xlu0 %2444  ;;  %v2473_v2 = vadd.f32 1e-12, %v2469_v19 }
 0xb6b   :  { %6345 = vrsqrt.f32 %v2472_v24  ;;  %v2450_v30 = vmul.f32 0.0078125, %v2445_v0  ;;  %v2447_v58 = vpop.xlane.xlu1 %2446 }
 0xb6c   :  { %6347 = vrsqrt.f32 %v2473_v2  ;;  %v2451_v4 = vmul.f32 0.0078125, %v2447_v58 }
 0xb6d   :  { %v2454_v7 = vsub.f32 %v2438_v25, %v2450_v30 }
 0xb6e   :  { %v2455_v37 = vsub.f32 %v2439_v28, %v2451_v4 }
 0xb6f   :  { %v2458_v1 = vmul.f32 %v2454_v7, %v2454_v7 }
 0xb70   :  { %v2459_v36 = vmul.f32 %v2455_v37, %v2455_v37 }
 0xb71   :  { %2464 = vadd.xlane.f32.xlu0 %v2458_v1 }
 0xb72   :  { %2466 = vadd.xlane.f32.xlu1 %v2459_v36 }
 0xb75   :  { %v6346_v8 = vpop.eup %6345 }
 0xb76   :  { %v2480_v53 = vmul.f32 %v6346_v8, %v7440_v27  ;;  %v6348_v54 = vpop.eup %6347  ;;  %v6131_v27 = vld [vmem:[%s8315_s2 + $0xf8] ss:$12 sps:$4 sm:$0xff]  }
 0xb77   :  { %v2481_v18 = vmul.f32 %v6348_v54, %v7442_v22  ;;  %5761 = vmatprep.subr.bf16.mxu1 %v6131_v27  ;;  %v6132_v22 = vld [vmem:[%s8315_s2 + $0x110] ss:$12 sps:$4 sm:$0xff]  }
 0xb78   :  { %v2488_v41 = vmul.f32 %v2487_v33, %v2480_v53  ;;  %5762 = vmatpush3.bf16.msra.mxu1 %v6131_v27 }
 0xb79   :  { %v2489_v61 = vmul.f32 %v2487_v33, %v2481_v18  ;;  %5763 = vmatprep.subr.bf16.mxu1 %v6132_v22 }
 0xb7a   :  { %v7504_v17 = vadd.f32 %v2495_v11, %v2488_v41 }
 0xb7b   :  { %v7506_v34 = vadd.f32 %v2495_v11, %v2489_v61 }
 0xb7c   :  { %5764 = vmatpush3.bf16.msra.mxu1 %v6132_v22 }
 0xb7d   :  { %v2505_v63 = vpack.c.bf16 %v7506_v34, %v7504_v17  ;;  %5765 = vmatprep.subr.bf16.mxu1 %v6133_v52 }
 0xb7f   :  { %2713 = vmatmul.mubr.bf16.vlgmr.msra.gmra.mrb[56].mxu0 %v2505_v63  ;;  %5773 = vmatprep.mubr.bf16.mxu1 %v2505_v63 }
 0xb80   :  { %2722 = vmatprep.mubr.bf16.mxu0 %v6507_v39  ;;  %5766 = vmatpush3.bf16.msra.mxu1 %v6133_v52 }
 0xb81   :  { %5767 = vmatprep.subr.bf16.mxu1 %v6134_v51 }
 0xb84   :  { %5768 = vmatpush3.bf16.msra.mxu1 %v6134_v51 }
 0xb85   :  { %5769 = vmatprep.subr.bf16.mxu1 %v6135_v29 }
 0xb88   :  { %5770 = vmatpush3.bf16.msra.mxu1 %v6135_v29 }
 0xb89   :  { %5771 = vmatprep.subr.bf16.mxu1 %v6136_v50 }
 0xb8c   :  { %5772 = vmatpush3.bf16.msra.mxu1 %v6136_v50 }
 0xb8d   :  { %5795 = vmatprep.subr.bf16.mxu1 %v6508_v13 }
 0xbfe   :  { %v2465_v46 = vpop.xlane.xlu0 %2464 }
 0xbff   :  { %v2470_v9 = vmul.f32 0.0078125, %v2465_v46  ;;  %v2467_v25 = vpop.xlane.xlu1 %2466 }
 0xc00   :  { %v2471_v28 = vmul.f32 0.0078125, %v2467_v25 }
 0xc01   :  { %v2474_v62 = vadd.f32 1e-12, %v2470_v9 }
 0xc02   :  { %v2475_v14 = vadd.f32 1e-12, %v2471_v28 }
 0xc03   :  { %6349 = vrsqrt.f32 %v2474_v62 }
 0xc04   :  { %6351 = vrsqrt.f32 %v2475_v14 }
 0xc0d   :  { %v6350_v43 = vpop.eup %6349 }
 0xc0e   :  { %v2482_v49 = vmul.f32 %v6350_v43, %v2454_v7  ;;  %v6352_v56 = vpop.eup %6351 }
 0xc0f   :  { %v2483_v47 = vmul.f32 %v6352_v56, %v2455_v37  ;;  %v5127_v37 = vld [vmem:[%s8319_s6 + $0x30] sm:$0xff] }
 0xc10   :  { %v2490_v60 = vmul.f32 %v2487_v33, %v2482_v49  ;;  %v2551_v1 = vrot.slane %v5127_v37, %v6705_v16 }
 0xc11   :  { %v2491_v59 = vmul.f32 %v2487_v33, %v2483_v47 }
 0xc12   :  { %v7530_v40 = vadd.f32 %v2495_v11, %v2490_v60 }
 0xc13   :  { %v7532_v45 = vadd.f32 %v2495_v11, %v2491_v59 }
 0xc15   :  { %v2506_v12 = vpack.c.bf16 %v7532_v45, %v7530_v40 }
 0xc17   :  { %2723 = vmatmul.mubr.bf16.gmra.mrb[60].mxu0 %v2506_v12  ;;  %5774 = vmatmul.mubr.bf16.vlgmr.msra.gmra.mrb[56].mxu1 %v2506_v12 }
 0xc18   :  { %5779 = vmatprep.mubr.msk.bf16.mxu0 %vm6509_vm0, %v6508_v13  ;;  %5797 = vmatprep.mubr.msk.bf16.mxu1 %vm6509_vm0, %v6508_v13 }
 0xc52   :  { %v2714_v35 = vpop.f32.mrb[56].mxu0 }
 0xc53   :  { %v2716_v6 = vpop.f32.mrb[57].mxu0  ;;  %v2715_v24 = vadd.f32 %v2714_v35, %v2543_v32 }
 0xc54   :  { %v2718_v38 = vpop.f32.mrb[58].mxu0  ;;  %v2717_v2 = vadd.f32 %v2716_v6, %v2547_v55 }
 0xc55   :  { %v2719_v19 = vadd.f32 %v2718_v38, %v2543_v32  ;;  %v2720_v0 = vpop.f32.mrb[59].mxu0 }
 0xc56   :  { %v2721_v30 = vadd.f32 %v2720_v0, %v2547_v55 }
 0xc57   :  { %v2782_v58 = vpack.c.bf16 %v2719_v19, %v2715_v24 }
 0xc58   :  { %v2783_v7 = vpack.c.bf16 %v2721_v30, %v2717_v2 }
 0xc5a   :  { %v2792_v4 = vsel %vm403_vm1, %v2783_v7, 0 }
 0xc5b   :  { %5778 = vmatpush3.bf16.xpose.msra.mxu0 %v2792_v4 }
 0xc5c   :  { %5783 = vmatprep.subr.bf16.mxu0 %v6508_v13 }
 0xc62   :  { %5780 = vmatmul.mubr.msk.bf16.vlgmr.msra.gmra.mrb[64].mxu0 %vm403_vm1, %v2782_v58 }
 0xc63   :  { %5785 = vmatprep.mubr.msk.bf16.mxu0 %vm6509_vm0, %v6508_v13 }
 0xcea   :  { %v2724_v36 = vpop.f32.mrb[60].mxu0  ;;  %v5775_v31 = vpop.f32.mrb[56].mxu1 }
 0xceb   :  { %v2776_v33 = vadd.f32 %v5775_v31, %v2551_v1  ;;  %v2726_v8 = vpop.f32.mrb[61].mxu0  ;;  %v2767_v53 = vpop.f32.mrb[57].mxu1  ;;  %v2725_v18 = vadd.f32 %v2724_v36, %v2543_v32 }
 0xcec   :  { %v2728_v54 = vpop.f32.mrb[62].mxu0  ;;  %v5776_v41 = vpop.f32.mrb[58].mxu1  ;;  %v2727_v22 = vadd.f32 %v2726_v8, %v2547_v55  ;;  %v2768_v52 = vadd.f32 %v2767_v53, %v2551_v1 }
 0xced   :  { %v2729_v11 = vadd.f32 %v2728_v54, %v2543_v32  ;;  %v2779_v61 = vadd.f32 %v5776_v41, %v2551_v1  ;;  %v2730_v63 = vpop.f32.mrb[63].mxu0  ;;  %v2770_v27 = vpop.f32.mrb[59].mxu1 }
 0xcee   :  { %v2731_v51 = vadd.f32 %v2730_v63, %v2547_v55  ;;  %v2771_v29 = vadd.f32 %v2770_v27, %v2551_v1 }
 0xcef   :  { %v7560_v50 = vpack.c.bf16 %v2729_v11, %v2725_v18  ;;  %v7562_v46 = vpack.c.bf16 %v2779_v61, %v2776_v33 }
 0xcf0   :  { %v7564_v16 = vpack.c.bf16 %v2731_v51, %v2727_v22  ;;  %v7566_v9 = vpack.c.bf16 %v2771_v29, %v2768_v52 }
 0xcf2   :  { %5784 = vmatpush3.bf16.msra.mxu0 %v7566_v9  ;;  %v3302_v18 = vsel %vm403_vm1, %v7564_v16, 0 }
 0xcf3   :  { %5789 = vmatprep.subr.bf16.mxu0 %v6508_v13 }
 0xd35   :  { %v2828_v25 = vpop.f32.mrb[64].mxu0 }
 0xd36   :  { %v2829_v62 = vadd.f32 %v2828_v25, %v6775_v21  ;;  %v5781_v28 = vpop.f32.mrb[65].mxu0 }
 0xd37   :  { %v2831_v14 = vpop.f32.mrb[66].mxu0 }
 0xd38   :  { %v2832_v43 = vadd.f32 %v2831_v14, %v6775_v21  ;;  %v5782_v49 = vpop.f32.mrb[67].mxu0  ;;  %v2835_v56 = vsel %vm451_vm3, %v2829_v62, -inf }
 0xd39   :  { %2836 = vmax.xlane.f32.xlu0 %v2835_v56 }
 0xd3a   :  { %v2838_v47 = vsel %vm451_vm3, %v2832_v43, -inf }
 0xd3b   :  { %2839 = vmax.xlane.f32.xlu1 %v2838_v47 }
 0xdc6   :  { %v2837_v60 = vpop.xlane.xlu0 %2836 }
 0xdc7   :  { %v2841_v59 = vsub.f32 %v2829_v62, %v2837_v60 }
 0xdc8   :  { %v2840_v12 = vpop.xlane.xlu1 %2839 }
 0xdc9   :  { %v2843_v48 = vmul.f32 1.442695, %v2841_v59  ;;  %v2842_v32 = vsub.f32 %v2832_v43, %v2840_v12 }
 0xdcb   :  { %6353 = vpow2.f32 %v2843_v48  ;;  %v2845_v35 = vmul.f32 1.442695, %v2842_v32 }
 0xdcd   :  { %6355 = vpow2.f32 %v2845_v35 }
 0xdd5   :  { %v6354_v55 = vpop.eup %6353 }
 0xdd6   :  { %v2847_v6 = vsel %vm451_vm3, %v6354_v55, 0.0 }
 0xdd7   :  { %v6356_v38 = vpop.eup %6355  ;;  %2848 = vadd.xlane.f32.xlu0 %v2847_v6 }
 0xdd8   :  { %v2850_v24 = vsel %vm451_vm3, %v6356_v38, 0.0 }
 0xdd9   :  { %2851 = vadd.xlane.f32.xlu1 %v2850_v24 }
 0xdea   :  { %2903 = vrot.lane.b32.xlu1 %v2782_v58, %s6510_s11 }
 0xded   :  { %2906 = vrot.lane.b32.xlu0 %v2783_v7, %s6510_s11 }
 0xdee   :  { %3028 = vrot.lane.b32.xlu1 %v2783_v7, %s6511_s12 }
 0xdf1   :  { %3149 = vrot.lane.b32.xlu0 %v2783_v7, %s6512_s13 }
 0xdf2   :  { %3026 = vrot.lane.b32.xlu1 %v2782_v58, %s6511_s12 }
 0xdf5   :  { %3416 = vrot.lane.b32.xlu0 %v7564_v16, %s6510_s11 }
 0xdf6   :  { %3147 = vrot.lane.b32.xlu1 %v2782_v58, %s6512_s13 }
 0xdf9   :  { %3538 = vrot.lane.b32.xlu0 %v7564_v16, %s6511_s12 }
 0xdfa   :  { %3413 = vrot.lane.b32.xlu1 %v7560_v50, %s6510_s11 }
 0xdfd   :  { %3659 = vrot.lane.b32.xlu0 %v7564_v16, %s6512_s13 }
 0xdfe   :  { %3536 = vrot.lane.b32.xlu1 %v7560_v50, %s6511_s12 }
 0xe02   :  { %3657 = vrot.lane.b32.xlu1 %v7560_v50, %s6512_s13 }
 0xe64   :  { %v2849_v19 = vpop.xlane.xlu0 %2848 }
 0xe65   :  { %6357 = vrcp.f32 %v2849_v19 }
 0xe66   :  { %v2852_v0 = vpop.xlane.xlu1 %2851 }
 0xe67   :  { %6359 = vrcp.f32 %v2852_v0 }
 0xe68   :  { %v2907_v4 = vpop.permute.xlu0 %2906 }
 0xe69   :  { %v2912_v36 = vsel %vm403_vm1, %v2907_v4, 0 }
 0xe6a   :  { %v2904_v1 = vpop.permute.xlu1 %2903 }
 0xe6c   :  { %v3150_v8 = vpop.permute.xlu0 %3149 }
 0xe6d   :  { %v3155_v54 = vsel %vm403_vm1, %v3150_v8, 0 }
 0xe6e   :  { %v3029_v31 = vpop.permute.xlu1 %3028 }
 0xe6f   :  { %v6358_v2 = vpop.eup %6357  ;;  %v3034_v33 = vsel %vm403_vm1, %v3029_v31, 0 }
 0xe70   :  { %v2855_v58 = vmul.f32 %v6358_v2, %v6354_v55  ;;  %v3417_v11 = vpop.permute.xlu0 %3416 }
 0xe71   :  { %v6360_v30 = vpop.eup %6359  ;;  %v3422_v61 = vsel %vm403_vm1, %v3417_v11, 0 }
 0xe72   :  { %v2856_v7 = vmul.f32 %v6360_v30, %v6356_v38  ;;  %v3027_v53 = vpop.permute.xlu1 %3026 }
 0xe74   :  { %v2857_v37 = vpack.c.bf16 %v2856_v7, %v2855_v58  ;;  %v3539_v63 = vpop.permute.xlu0 %3538 }
 0xe75   :  { %v3544_v22 = vsel %vm403_vm1, %v3539_v63, 0 }
 0xe76   :  { %5786 = vmatmul.mubr.msk.bf16.vlgmr.msra.gmra.mrb[68].mxu0 %vm451_vm3, %v2857_v37  ;;  %v3148_v41 = vpop.permute.xlu1 %3147 }
 0xe77   :  { %5790 = vmatpush3.bf16.xpose.msra.mxu0 %v2912_v36  ;;  %5791 = vmatprep.mubr.msk.bf16.mxu0 %vm6509_vm0, %v6508_v13 }
 0xe78   :  { %5801 = vmatprep.subr.bf16.mxu0 %v6508_v13  ;;  %v3660_v52 = vpop.permute.xlu0 %3659 }
 0xe79   :  { %v3665_v29 = vsel %vm403_vm1, %v3660_v52, 0 }
 0xe7a   :  { %v3414_v27 = vpop.permute.xlu1 %3413 }
 0xe7e   :  { %5792 = vmatmul.mubr.msk.bf16.vlgmr.msra.gmra.mrb[72].mxu0 %vm403_vm1, %v2904_v1  ;;  %v3537_v51 = vpop.permute.xlu1 %3536 }
 0xe7f   :  { %5802 = vmatpush3.bf16.xpose.msra.mxu0 %v3034_v33  ;;  %5803 = vmatprep.mubr.msk.bf16.mxu0 %vm6509_vm0, %v6508_v13 }
 0xe80   :  { %5813 = vmatprep.subr.bf16.mxu0 %v6508_v13 }
 0xe86   :  { %5804 = vmatmul.mubr.msk.bf16.vlgmr.msra.gmra.mrb[76].mxu0 %vm403_vm1, %v3027_v53 }
 0xe87   :  { %5814 = vmatpush3.bf16.xpose.msra.mxu0 %v3155_v54  ;;  %5815 = vmatprep.mubr.msk.bf16.mxu0 %vm6509_vm0, %v6508_v13 }
 0xe88   :  { %5825 = vmatprep.subr.bf16.mxu0 %v6508_v13 }
 0xe8e   :  { %5816 = vmatmul.mubr.msk.bf16.vlgmr.msra.gmra.mrb[80].mxu0 %vm403_vm1, %v3148_v41 }
 0xe8f   :  { %5826 = vmatpush3.bf16.xpose.msra.mxu0 %v3302_v18  ;;  %5827 = vmatprep.mubr.msk.bf16.mxu0 %vm6509_vm0, %v6508_v13 }
 0xe90   :  { %5837 = vmatprep.subr.bf16.mxu0 %v6508_v13 }
 0xe96   :  { %5828 = vmatmul.mubr.msk.bf16.vlgmr.msra.gmra.mrb[84].mxu0 %vm403_vm1, %v7560_v50  ;;  %v3658_v50 = vpop.permute.xlu1 %3657 }
 0xe97   :  { %5838 = vmatpush3.bf16.xpose.msra.mxu0 %v3422_v61  ;;  %5839 = vmatprep.mubr.msk.bf16.mxu0 %vm6509_vm0, %v6508_v13 }
 0xe98   :  { %5849 = vmatprep.subr.bf16.mxu0 %v6508_v13 }
 0xe9e   :  { %5840 = vmatmul.mubr.msk.bf16.vlgmr.msra.gmra.mrb[88].mxu0 %vm403_vm1, %v3414_v27 }
 0xe9f   :  { %5850 = vmatpush3.bf16.xpose.msra.mxu0 %v3544_v22  ;;  %5851 = vmatprep.mubr.msk.bf16.mxu0 %vm6509_vm0, %v6508_v13 }
 0xea0   :  { %5861 = vmatprep.subr.bf16.mxu0 %v6508_v13 }
 0xea6   :  { %5852 = vmatmul.mubr.msk.bf16.vlgmr.msra.gmra.mrb[92].mxu0 %vm403_vm1, %v3537_v51 }
 0xea7   :  { %5862 = vmatpush3.bf16.xpose.msra.mxu0 %v3665_v29  ;;  %5863 = vmatprep.mubr.msk.bf16.mxu0 %vm6509_vm0, %v6508_v13 }
 0xeae   :  { %5864 = vmatmul.mubr.msk.bf16.vlgmr.msra.gmra.mrb[96].mxu0 %vm403_vm1, %v3658_v50 }
 0xf49   :  { %v7631_v16 = vpop.f32.mrb[68].mxu0 }
 0xf4a   :  { %v5787_v25 = vpop.f32.mrb[69].mxu0 }
 0xf4b   :  { %v7633_v62 = vpop.f32.mrb[70].mxu0 }
 0xf4c   :  { %v5788_v28 = vpop.f32.mrb[71].mxu0 }
 0xf51   :  { %v2948_v14 = vpop.f32.mrb[72].mxu0 }
 0xf52   :  { %v7636_v43 = vadd.f32 %v2948_v14, %v6775_v21  ;;  %v5793_v49 = vpop.f32.mrb[73].mxu0 }
 0xf53   :  { %v2951_v56 = vpop.f32.mrb[74].mxu0 }
 0xf54   :  { %v7639_v47 = vadd.f32 %v2951_v56, %v6775_v21  ;;  %v5794_v60 = vpop.f32.mrb[75].mxu0  ;;  %v2955_v59 = vsel %vm451_vm3, %v7636_v43, -inf }
 0xf55   :  { %2956 = vmax.xlane.f32.xlu0 %v2955_v59 }
 0xf56   :  { %v2958_v12 = vsel %vm451_vm3, %v7639_v47, -inf }
 0xf57   :  { %2959 = vmax.xlane.f32.xlu1 %v2958_v12 }
 0xf59   :  { %v3070_v48 = vpop.f32.mrb[76].mxu0 }
 0xf5a   :  { %v7646_v32 = vadd.f32 %v3070_v48, %v6775_v21  ;;  %v5805_v35 = vpop.f32.mrb[77].mxu0 }
 0xf5b   :  { %v3073_v55 = vpop.f32.mrb[78].mxu0 }
 0xf5c   :  { %v7649_v6 = vadd.f32 %v3073_v55, %v6775_v21  ;;  %v5806_v38 = vpop.f32.mrb[79].mxu0  ;;  %v3077_v24 = vsel %vm451_vm3, %v7646_v32, -inf }
 0xf5d   :  { %3078 = vmax.xlane.f32.xlu0 %v3077_v24 }
 0xf5e   :  { %v3080_v19 = vsel %vm451_vm3, %v7649_v6, -inf }
 0xf61   :  { %v3191_v0 = vpop.f32.mrb[80].mxu0  ;;  %3081 = vmax.xlane.f32.xlu0 %v3080_v19 }
 0xf62   :  { %v7656_v2 = vadd.f32 %v3191_v0, %v6775_v21  ;;  %v5817_v30 = vpop.f32.mrb[81].mxu0 }
 0xf63   :  { %v3194_v58 = vpop.f32.mrb[82].mxu0 }
 0xf64   :  { %v7659_v7 = vadd.f32 %v3194_v58, %v6775_v21  ;;  %v5818_v4 = vpop.f32.mrb[83].mxu0  ;;  %v3198_v37 = vsel %vm451_vm3, %v7656_v2, -inf }
 0xf65   :  { %3199 = vmax.xlane.f32.xlu0 %v3198_v37 }
 0xf66   :  { %v3201_v1 = vsel %vm451_vm3, %v7659_v7, -inf }
 0xf67   :  { %3202 = vmax.xlane.f32.xlu1 %v3201_v1 }
 0xf69   :  { %v3338_v36 = vpop.f32.mrb[84].mxu0 }
 0xf6a   :  { %v7666_v31 = vadd.f32 %v3338_v36, %v6811_v57  ;;  %v5829_v33 = vpop.f32.mrb[85].mxu0 }
 0xf6b   :  { %v3341_v8 = vpop.f32.mrb[86].mxu0 }
 0xf6c   :  { %v7669_v53 = vadd.f32 %v3341_v8, %v6811_v57  ;;  %v5830_v21 = vpop.f32.mrb[87].mxu0  ;;  %v3345_v54 = vsel %vm451_vm3, %v7666_v31, -inf }
 0xf6d   :  { %3346 = vmax.xlane.f32.xlu0 %v3345_v54 }
 0xf6e   :  { %v3348_v41 = vsel %vm451_vm3, %v7669_v53, -inf }
 0xf6f   :  { %3349 = vmax.xlane.f32.xlu1 %v3348_v41 }
 0xf71   :  { %v3458_v18 = vpop.f32.mrb[88].mxu0 }
 0xf72   :  { %v7676_v11 = vadd.f32 %v3458_v18, %v6811_v57  ;;  %v5841_v61 = vpop.f32.mrb[89].mxu0 }
 0xf73   :  { %v3461_v63 = vpop.f32.mrb[90].mxu0 }
 0xf74   :  { %v7679_v27 = vadd.f32 %v3461_v63, %v6811_v57  ;;  %v5842_v22 = vpop.f32.mrb[91].mxu0  ;;  %v3465_v52 = vsel %vm451_vm3, %v7676_v11, -inf }
 0xf75   :  { %3466 = vmax.xlane.f32.xlu0 %v3465_v52 }
 0xf76   :  { %v3468_v51 = vsel %vm451_vm3, %v7679_v27, -inf }
 0xf77   :  { %3469 = vmax.xlane.f32.xlu1 %v3468_v51 }
 0xf79   :  { %v3580_v29 = vpop.f32.mrb[92].mxu0 }
 0xf7a   :  { %v7686_v50 = vadd.f32 %v3580_v29, %v6811_v57  ;;  %v5853_v25 = vpop.f32.mrb[93].mxu0 }
 0xf7b   :  { %v3583_v28 = vpop.f32.mrb[94].mxu0 }
 0xf7c   :  { %v7689_v14 = vadd.f32 %v3583_v28, %v6811_v57  ;;  %v5854_v49 = vpop.f32.mrb[95].mxu0  ;;  %v3587_v56 = vsel %vm451_vm3, %v7686_v50, -inf }
 0xf7d   :  { %3588 = vmax.xlane.f32.xlu0 %v3587_v56 }
 0xf7e   :  { %v3590_v60 = vsel %vm451_vm3, %v7689_v14, -inf }
 0xf7f   :  { %3591 = vmax.xlane.f32.xlu1 %v3590_v60 }
 0xf81   :  { %v3701_v59 = vpop.f32.mrb[96].mxu0 }
 0xf82   :  { %v7696_v12 = vadd.f32 %v3701_v59, %v6811_v57  ;;  %v5865_v48 = vpop.f32.mrb[97].mxu0 }
 0xf83   :  { %v3704_v35 = vpop.f32.mrb[98].mxu0 }
 0xf84   :  { %v7699_v55 = vadd.f32 %v3704_v35, %v6811_v57  ;;  %v5866_v38 = vpop.f32.mrb[99].mxu0  ;;  %v3708_v24 = vsel %vm451_vm3, %v7696_v12, -inf }
 0xf85   :  { %3709 = vmax.xlane.f32.xlu0 %v3708_v24 }
 0xf86   :  { %v3711_v19 = vsel %vm451_vm3, %v7699_v55, -inf }
 0xf87   :  { %3712 = vmax.xlane.f32.xlu1 %v3711_v19 }
 0xf98   :  { %3100 = vrot.lane.b32.xlu1 %v7566_v9, %s6511_s12 }
 0xf9b   :  { %2979 = vrot.lane.b32.xlu0 %v7566_v9, %s6510_s11 }
 0xfe2   :  { %v2957_v0 = vpop.xlane.xlu0 %2956 }
 0xfe3   :  { %v2961_v30 = vsub.f32 %v7636_v43, %v2957_v0 }
 0xfe4   :  { %v2960_v57 = vpop.xlane.xlu1 %2959 }
 0xfe5   :  { %v2963_v58 = vmul.f32 1.442695, %v2961_v30  ;;  %v2962_v4 = vsub.f32 %v7639_v47, %v2960_v57 }
 0xfe7   :  { %6361 = vpow2.f32 %v2963_v58  ;;  %v2965_v37 = vmul.f32 1.442695, %v2962_v4 }
 0xfe9   :  { %6363 = vpow2.f32 %v2965_v37 }
 0xfea   :  { %v3079_v1 = vpop.xlane.xlu0 %3078 }
 0xfeb   :  { %v3083_v36 = vsub.f32 %v7646_v32, %v3079_v1 }
 0xfed   :  { %v3085_v33 = vmul.f32 1.442695, %v3083_v36 }
 0xfee   :  { %v3082_v8 = vpop.xlane.xlu0 %3081 }
 0xfef   :  { %6365 = vpow2.f32 %v3085_v33  ;;  %v3084_v21 = vsub.f32 %v7649_v6, %v3082_v8 }
 0xff1   :  { %v7713_v54 = vpop.eup %6361  ;;  %v3087_v41 = vmul.f32 1.442695, %v3084_v21 }
 0xff2   :  { %v3200_v18 = vpop.xlane.xlu0 %3199  ;;  %v2967_v43 = vsel %vm451_vm3, %v7713_v54, 0.0 }
 0xff3   :  { %v7717_v61 = vpop.eup %6363  ;;  %6367 = vpow2.f32 %v3087_v41  ;;  %v3204_v47 = vsub.f32 %v7656_v2, %v3200_v18  ;;  %2968 = vadd.xlane.f32.xlu0 %v2967_v43 }
 0xff4   :  { %v3203_v63 = vpop.xlane.xlu1 %3202  ;;  %v2970_v32 = vsel %vm451_vm3, %v7717_v61, 0.0 }
 0xff5   :  { %v3206_v22 = vmul.f32 1.442695, %v3204_v47  ;;  %v3205_v6 = vsub.f32 %v7659_v7, %v3203_v63  ;;  %2971 = vadd.xlane.f32.xlu1 %v2970_v32 }
 0xff7   :  { %6369 = vpow2.f32 %v3206_v22  ;;  %v3208_v52 = vmul.f32 1.442695, %v3205_v6 }
 0xff9   :  { %v7723_v51 = vpop.eup %6365  ;;  %6371 = vpow2.f32 %v3208_v52 }
 0xffa   :  { %v3347_v29 = vpop.xlane.xlu0 %3346  ;;  %v3089_v25 = vsel %vm451_vm3, %v7723_v51, 0.0 }
 0xffb   :  { %v3351_v2 = vsub.f32 %v7666_v31, %v3347_v29  ;;  %3090 = vadd.xlane.f32.xlu0 %v3089_v25 }
 0xffc   :  { %v3350_v28 = vpop.xlane.xlu1 %3349 }
 0xffd   :  { %v7728_v49 = vpop.eup %6367  ;;  %v3353_v56 = vmul.f32 1.442695, %v3351_v2  ;;  %v3352_v60 = vsub.f32 %v7669_v53, %v3350_v28 }
 0xffe   :  { %v3092_v7 = vsel %vm451_vm3, %v7728_v49, 0.0 }
 0xfff   :  { %6373 = vpow2.f32 %v3353_v56  ;;  %v3355_v59 = vmul.f32 1.442695, %v3352_v60  ;;  %3093 = vadd.xlane.f32.xlu1 %v3092_v7 }
0x1001   :  { %v7733_v48 = vpop.eup %6369  ;;  %6375 = vpow2.f32 %v3355_v59 }
0x1002   :  { %v3467_v35 = vpop.xlane.xlu0 %3466  ;;  %v3210_v31 = vsel %vm451_vm3, %v7733_v48, 0.0 }
0x1003   :  { %v7737_v38 = vpop.eup %6371  ;;  %v3471_v24 = vsub.f32 %v7676_v11, %v3467_v35  ;;  %3211 = vadd.xlane.f32.xlu0 %v3210_v31 }
0x1004   :  { %v3470_v19 = vpop.xlane.xlu1 %3469  ;;  %v3213_v53 = vsel %vm451_vm3, %v7737_v38, 0.0 }
0x1005   :  { %v3473_v0 = vmul.f32 1.442695, %v3471_v24  ;;  %v3472_v30 = vsub.f32 %v7679_v27, %v3470_v19  ;;  %3214 = vadd.xlane.f32.xlu1 %v3213_v53 }
0x1007   :  { %6377 = vpow2.f32 %v3473_v0  ;;  %v3475_v57 = vmul.f32 1.442695, %v3472_v30 }
0x1009   :  { %v7743_v58 = vpop.eup %6373  ;;  %6379 = vpow2.f32 %v3475_v57 }
0x100a   :  { %v3357_v4 = vsel %vm451_vm3, %v7743_v58, 0.0  ;;  %v3589_v27 = vpop.xlane.xlu0 %3588 }
0x100b   :  { %v7747_v37 = vpop.eup %6375  ;;  %3358 = vadd.xlane.f32.xlu0 %v3357_v4  ;;  %v3593_v28 = vsub.f32 %v7686_v50, %v3589_v27 }
0x100c   :  { %v3592_v11 = vpop.xlane.xlu1 %3591  ;;  %v3360_v1 = vsel %vm451_vm3, %v7747_v37, 0.0 }
0x100d   :  { %v3594_v36 = vsub.f32 %v7689_v14, %v3592_v11  ;;  %3361 = vadd.xlane.f32.xlu1 %v3360_v1  ;;  %v3595_v56 = vmul.f32 1.442695, %v3593_v28 }
0x100f   :  { %v3597_v33 = vmul.f32 1.442695, %v3594_v36 }
0x1011   :  { %v7752_v8 = vpop.eup %6377  ;;  %6381 = vpow2.f32 %v3597_v33 }
0x1012   :  { %v3710_v21 = vpop.xlane.xlu0 %3709  ;;  %v3477_v41 = vsel %vm451_vm3, %v7752_v8, 0.0 }
0x1013   :  { %v7756_v18 = vpop.eup %6379  ;;  %v3714_v43 = vsub.f32 %v7696_v12, %v3710_v21  ;;  %3478 = vadd.xlane.f32.xlu1 %v3477_v41 }
0x1014   :  { %v3713_v47 = vpop.xlane.xlu1 %3712  ;;  %v3480_v22 = vsel %vm451_vm3, %v7756_v18, 0.0 }
0x1015   :  { %v3716_v63 = vmul.f32 1.442695, %v3714_v43  ;;  %v3715_v32 = vsub.f32 %v7699_v55, %v3713_v47 }
0x1016   :  { %v2980_v14 = vpop.permute.xlu0 %2979 }
0x1017   :  { %6383 = vpow2.f32 %v3716_v63  ;;  %v3718_v6 = vmul.f32 1.442695, %v3715_v32  ;;  %5796 = vmatpush3.bf16.msra.mxu1 %v2980_v14  ;;  %3481 = vadd.xlane.f32.xlu1 %v3480_v22 }
0x1018   :  { %5807 = vmatprep.subr.bf16.mxu1 %v6508_v13  ;;  %v3101_v7 = vpop.permute.xlu1 %3100 }
0x1019   :  { %6385 = vpow2.f32 %v3718_v6 }
0x101a   :  { %6387 = vpow2.f32 %v3595_v56 }
0x101b   :  { %v7763_v52 = vpop.eup %6381 }
0x101c   :  { %v3602_v12 = vsel %vm451_vm3, %v7763_v52, 0.0 }
0x101d   :  { %3603 = vadd.xlane.f32.xlu1 %v3602_v12 }
0x1021   :  { %v7767_v29 = vpop.eup %6383  ;;  %3221 = vrot.lane.b32.xlu0 %v7566_v9, %s6512_s13 }
0x1022   :  { %v3720_v55 = vsel %vm451_vm3, %v7767_v29, 0.0 }
0x1023   :  { %v7773_v25 = vpop.eup %6385  ;;  %3721 = vadd.xlane.f32.xlu1 %v3720_v55 }
0x1024   :  { %v3723_v2 = vsel %vm451_vm3, %v7773_v25, 0.0  ;;  %v7780_v60 = vpop.eup %6387 }
0x1025   :  { %v3599_v9 = vsel %vm451_vm3, %v7780_v60, 0.0 }
0x1027   :  { %3724 = vadd.xlane.f32.xlu1 %v3723_v2 }
0x1038   :  { %3489 = vrot.lane.b32.xlu1 %v7562_v46, %s6510_s11 }
0x1040   :  { %3600 = vadd.xlane.f32.xlu0 %v3599_v9 }
0x1056   :  { %3610 = vrot.lane.b32.xlu0 %v7562_v46, %s6511_s12 }
0x105a   :  { %3731 = vrot.lane.b32.xlu0 %v7562_v46, %s6512_s13 }
0x1080   :  { %v2969_v59 = vpop.xlane.xlu0 %2968 }
0x1081   :  { %6389 = vrcp.f32 %v2969_v59 }
0x1082   :  { %v2972_v50 = vpop.xlane.xlu1 %2971 }
0x1083   :  { %6391 = vrcp.f32 %v2972_v50 }
0x1088   :  { %v3091_v35 = vpop.xlane.xlu0 %3090 }
0x1089   :  { %6393 = vrcp.f32 %v3091_v35 }
0x108b   :  { %v6390_v31 = vpop.eup %6389 }
0x108c   :  { %v3094_v24 = vpop.xlane.xlu1 %3093  ;;  %v2975_v53 = vmul.f32 %v6390_v31, %v7713_v54 }
0x108d   :  { %v6392_v19 = vpop.eup %6391  ;;  %6395 = vrcp.f32 %v3094_v24 }
0x108e   :  { %v2976_v0 = vmul.f32 %v6392_v19, %v7717_v61 }
0x1090   :  { %v3212_v30 = vpop.xlane.xlu0 %3211  ;;  %v2977_v57 = vpack.c.bf16 %v2976_v0, %v2975_v53 }
0x1091   :  { %6397 = vrcp.f32 %v3212_v30 }
0x1092   :  { %5798 = vmatmul.mubr.msk.bf16.vlgmr.msra.gmra.mrb[60].mxu1 %vm451_vm3, %v2977_v57  ;;  %v3215_v4 = vpop.xlane.xlu1 %3214 }
0x1093   :  { %5808 = vmatpush3.bf16.msra.mxu1 %v3101_v7  ;;  %6399 = vrcp.f32 %v3215_v4  ;;  %5809 = vmatprep.mubr.msk.bf16.mxu1 %vm6509_vm0, %v6508_v13  ;;  %v6394_v11 = vpop.eup %6393 }
0x1094   :  { %5819 = vmatprep.subr.bf16.mxu1 %v6508_v13  ;;  %v3097_v36 = vmul.f32 %v6394_v11, %v7723_v51 }
0x1097   :  { %v6396_v1 = vpop.eup %6395 }
0x1098   :  { %v3098_v54 = vmul.f32 %v6396_v1, %v7728_v49  ;;  %v3359_v61 = vpop.xlane.xlu0 %3358 }
0x1099   :  { %6401 = vrcp.f32 %v3359_v61 }
0x109a   :  { %v3362_v27 = vpop.xlane.xlu1 %3361  ;;  %v3099_v33 = vpack.c.bf16 %v3098_v54, %v3097_v36 }
0x109b   :  { %6403 = vrcp.f32 %v3362_v27  ;;  %v6398_v21 = vpop.eup %6397 }
0x109c   :  { %v3222_v41 = vpop.permute.xlu0 %3221  ;;  %5810 = vmatmul.mubr.msk.bf16.vlgmr.msra.gmra.mrb[64].mxu1 %vm451_vm3, %v3099_v33  ;;  %v3218_v51 = vmul.f32 %v6398_v21, %v7733_v48 }
0x109d   :  { %v6400_v43 = vpop.eup %6399  ;;  %5820 = vmatpush3.bf16.msra.mxu1 %v3222_v41  ;;  %5821 = vmatprep.mubr.msk.bf16.mxu1 %vm6509_vm0, %v6508_v13 }
0x109e   :  { %v3219_v47 = vmul.f32 %v6400_v43, %v7737_v38  ;;  %5831 = vmatprep.subr.bf16.mxu1 %v6508_v13 }
0x10a0   :  { %v3479_v49 = vpop.xlane.xlu1 %3478  ;;  %v3220_v63 = vpack.c.bf16 %v3219_v47, %v3218_v51 }
0x10a3   :  { %v6402_v32 = vpop.eup %6401 }
0x10a4   :  { %5822 = vmatmul.mubr.msk.bf16.vlgmr.msra.gmra.mrb[68].mxu1 %vm451_vm3, %v3220_v63  ;;  %v3482_v6 = vpop.xlane.xlu1 %3481  ;;  %v3365_v38 = vmul.f32 %v6402_v32, %v7743_v58  ;;  %v6137_v32 = vld [vmem:[%s8316_s3 + $0x40] sm:$0xff]  }
0x10a5   :  { %v6404_v14 = vpop.eup %6403  ;;  %5832 = vmatpush3.bf16.msra.mxu1 %v7562_v46  ;;  %5833 = vmatprep.mubr.msk.bf16.mxu1 %vm6509_vm0, %v6508_v13  ;;  %6405 = vrcp.f32 %v3482_v6 }
0x10a6   :  { %v3366_v22 = vmul.f32 %v6404_v14, %v7747_v37  ;;  %5843 = vmatprep.subr.bf16.mxu1 %v6508_v13  ;;  %6407 = vrcp.f32 %v3479_v49  ;;  %v6138_v14 = vld [vmem:[%s8316_s3 + $0x48] sm:$0xff]   ;;  %5873 = vmatprep.subr.bf16.mxu0 %v6137_v32 }
0x10a7   :  { %5874 = vmatpush3.bf16.msra.mxu0 %v6137_v32 }
0x10a8   :  { %v3367_v48 = vpack.c.bf16 %v3366_v22, %v3365_v38  ;;  %5875 = vmatprep.subr.bf16.mxu0 %v6138_v14  ;;  %v6139_v22 = vld [vmem:[%s8316_s3 + $0x50] sm:$0xff]  }
0x10aa   :  { %v3604_v12 = vpop.xlane.xlu1 %3603 }
0x10ab   :  { %6409 = vrcp.f32 %v3604_v12  ;;  %5876 = vmatpush3.bf16.msra.mxu0 %v6138_v14  ;;  %v6140_v12 = vld [vmem:[%s8316_s3 + $0x58] sm:$0xff]  }
0x10ac   :  { %5834 = vmatmul.mubr.msk.bf16.vlgmr.msra.gmra.mrb[72].mxu1 %vm451_vm3, %v3367_v48  ;;  %5877 = vmatprep.subr.bf16.mxu0 %v6139_v22 }
0x10ad   :  { %5845 = vmatprep.mubr.msk.bf16.mxu1 %vm6509_vm0, %v6508_v13 }
0x10af   :  { %v6406_v55 = vpop.eup %6405  ;;  %5878 = vmatpush3.bf16.msra.mxu0 %v6139_v22 }
0x10b0   :  { %v3722_v46 = vpop.xlane.xlu1 %3721  ;;  %v6408_v28 = vpop.eup %6407  ;;  %v3486_v37 = vmul.f32 %v6406_v55, %v7756_v18  ;;  %5879 = vmatprep.subr.bf16.mxu0 %v6140_v12 }
0x10b1   :  { %v3485_v56 = vmul.f32 %v6408_v28, %v7752_v8  ;;  %v6142_v28 = vld [vmem:[%s8316_s3 + $0x68] sm:$0xff]  }
0x10b3   :  { %v3487_v58 = vpack.c.bf16 %v3486_v37, %v3485_v56  ;;  %5880 = vmatpush3.bf16.msra.mxu0 %v6140_v12  ;;  %v6143_v37 = vld [vmem:[%s8316_s3 + $0x70] sm:$0xff]  }
0x10b4   :  { %v3725_v2 = vpop.xlane.xlu1 %3724 }
0x10b5   :  { %v6410_v8 = vpop.eup %6409 }
0x10b6   :  { %v3608_v50 = vmul.f32 %v6410_v8, %v7763_v52  ;;  %v6144_v8 = vld [vmem:[%s8316_s3 + $0x78] sm:$0xff]  }
0x10b8   :  { %v3490_v9 = vpop.permute.xlu1 %3489 }
0x10b9   :  { %5844 = vmatpush3.bf16.msra.mxu1 %v3490_v9 }
0x10ba   :  { %5855 = vmatprep.subr.bf16.mxu1 %v6508_v13 }
0x10bc   :  { %5846 = vmatmul.mubr.msk.bf16.vlgmr.msra.gmra.mrb[76].mxu1 %vm451_vm3, %v3487_v58 }
0x10bd   :  { %5857 = vmatprep.mubr.msk.bf16.mxu1 %vm6509_vm0, %v6508_v13 }
0x10cd   :  { %v3601_v7 = vpop.xlane.xlu0 %3600 }
0x10ce   :  { %6411 = vrcp.f32 %v3601_v7 }
0x10cf   :  { %6413 = vrcp.f32 %v3725_v2  ;;  %v6141_v2 = vld [vmem:[%s8316_s3 + $0x60] sm:$0xff]  }
0x10d0   :  { %6415 = vrcp.f32 %v3722_v46  ;;  %5881 = vmatprep.subr.bf16.mxu0 %v6141_v2 }
0x10d1   :  { %v3611_v59 = vpop.permute.xlu0 %3610  ;;  %5882 = vmatpush3.bf16.msra.mxu0 %v6141_v2 }
0x10d2   :  { %5856 = vmatpush3.bf16.msra.mxu1 %v3611_v59  ;;  %5883 = vmatprep.subr.bf16.mxu0 %v6142_v28 }
0x10d3   :  { %5867 = vmatprep.subr.bf16.mxu1 %v6508_v13 }
0x10d5   :  { %v3732_v19 = vpop.permute.xlu0 %3731  ;;  %5884 = vmatpush3.bf16.msra.mxu0 %v6142_v28 }
0x10d6   :  { %5885 = vmatprep.subr.bf16.mxu0 %v6143_v37 }
0x10d8   :  { %v6412_v18 = vpop.eup %6411 }
0x10d9   :  { %v3607_v35 = vmul.f32 %v6412_v18, %v7780_v60  ;;  %v6414_v24 = vpop.eup %6413  ;;  %5886 = vmatpush3.bf16.msra.mxu0 %v6143_v37 }
0x10da   :  { %v6416_v53 = vpop.eup %6415  ;;  %v3729_v0 = vmul.f32 %v6414_v24, %v7773_v25  ;;  %5887 = vmatprep.subr.bf16.mxu0 %v6144_v8 }
0x10db   :  { %v3609_v31 = vpack.c.bf16 %v3608_v50, %v3607_v35  ;;  %v3728_v30 = vmul.f32 %v6416_v53, %v7767_v29 }
0x10dd   :  { %5858 = vmatmul.mubr.msk.bf16.vlgmr.msra.gmra.mrb[80].mxu1 %vm451_vm3, %v3609_v31  ;;  %v3730_v57 = vpack.c.bf16 %v3729_v0, %v3728_v30  ;;  %5888 = vmatpush3.bf16.msra.mxu0 %v6144_v8 }
0x10de   :  { %5868 = vmatpush3.bf16.msra.mxu1 %v3732_v19  ;;  %5869 = vmatprep.mubr.msk.bf16.mxu1 %vm6509_vm0, %v6508_v13 }
0x10e5   :  { %5870 = vmatmul.mubr.msk.bf16.vlgmr.msra.gmra.mrb[84].mxu1 %vm451_vm3, %v3730_v57 }
0x10e6   :  { %4235 = vmatprep.mubr.bf16.mxu1 %v6507_v39 }
0x1165   :  { %v3019_v52 = vpop.f32.mrb[60].mxu1 }
0x1166   :  { %v5799_v60 = vpop.f32.mrb[61].mxu1 }
0x1167   :  { %v3022_v4 = vpop.f32.mrb[62].mxu1 }
0x1168   :  { %v5955_v11 = vpack.i.bf16 %v3022_v4, %v3019_v52  ;;  %v5800_v1 = vpop.f32.mrb[63].mxu1 }
0x116a   :  { %5956 = vrot.lane.b32.xlu0 %v5955_v11, %s6512_s13 }
0x116f   :  { %v3140_v36 = vpop.f32.mrb[64].mxu1 }
0x1170   :  { %v5811_v54 = vpop.f32.mrb[65].mxu1 }
0x1171   :  { %v3143_v61 = vpop.f32.mrb[66].mxu1 }
0x1172   :  { %v5960_v27 = vpack.i.bf16 %v3143_v61, %v3140_v36  ;;  %v5812_v33 = vpop.f32.mrb[67].mxu1 }
0x1174   :  { %5961 = vrot.lane.b32.xlu1 %v5960_v27, %s6511_s12 }
0x1177   :  { %v3261_v29 = vpop.f32.mrb[68].mxu1 }
0x1178   :  { %v5823_v25 = vpop.f32.mrb[69].mxu1 }
0x1179   :  { %v3264_v21 = vpop.f32.mrb[70].mxu1 }
0x117a   :  { %v5965_v41 = vpack.i.bf16 %v3264_v21, %v3261_v29  ;;  %v5824_v43 = vpop.f32.mrb[71].mxu1 }
0x117c   :  { %5966 = vrot.lane.b32.xlu1 %v5965_v41, %s6510_s11 }
0x117f   :  { %v7831_v47 = vpop.f32.mrb[72].mxu1 }
0x1180   :  { %v5835_v51 = vpop.f32.mrb[73].mxu1 }
0x1181   :  { %v7833_v49 = vpop.f32.mrb[74].mxu1 }
0x1182   :  { %v5836_v63 = vpop.f32.mrb[75].mxu1 }
0x118f   :  { %v3529_v6 = vpop.f32.mrb[76].mxu1 }
0x1190   :  { %v5847_v38 = vpop.f32.mrb[77].mxu1 }
0x1191   :  { %v3532_v48 = vpop.f32.mrb[78].mxu1 }
0x1192   :  { %v5970_v46 = vpack.i.bf16 %v3532_v48, %v3529_v6  ;;  %v5848_v55 = vpop.f32.mrb[79].mxu1 }
0x1194   :  { %5971 = vrot.lane.b32.xlu0 %v5970_v46, %s6512_s13  ;;  %s4999_s13 = sshll.u32 %s6515_s16, 4  ;;  %s5000_s13 = int_to_ptr.vmem [resolvable:$true] %s4999_s13 }
0x1195   :  { %s6480_s17 = scalar_lea.vmem %s5000_s13, 32  ;;  %p6485_p6 = scmp.lt.s32.totalorder %s5000_s13, %s5000_s13 }
0x1196   :  { %p6481_p5 = scmp.ne.s32.totalorder %s5000_s13, %s6480_s17  ;;  %p6486_p7 = scmp.lt.s32.totalorder %s6480_s17, %s6480_s17 }
0x1198   :  { %p6487_p8 = por %p6486_p7, %p6485_p6 }
0x119a   :  { %p6488_p9 = pnand %p6487_p8, %p6481_p5 }
0x11b0   :  { %v3650_v56 = vpop.f32.mrb[80].mxu1 }
0x11b1   :  { %v5859_v9 = vpop.f32.mrb[81].mxu1 }
0x11b2   :  { %v3653_v58 = vpop.f32.mrb[82].mxu1 }
0x11b3   :  { %v5975_v7 = vpack.i.bf16 %v3653_v58, %v3650_v56  ;;  %v5860_v59 = vpop.f32.mrb[83].mxu1 }
0x11b5   :  { %5976 = vrot.lane.b32.xlu0 %v5975_v7, %s6511_s12 }
0x11b8   :  { %v3771_v18 = vpop.f32.mrb[84].mxu1 }
0x11b9   :  { %v5871_v50 = vpop.f32.mrb[85].mxu1 }
0x11ba   :  { %v3774_v35 = vpop.f32.mrb[86].mxu1  ;;  %v6151_v50 = vld [vmem:[%s8317_s4 + $0x120] ss:$16 sps:$4 sm:$0xff]  }
0x11bb   :  { %v5980_v31 = vpack.i.bf16 %v3774_v35, %v3771_v18  ;;  %v5872_v24 = vpop.f32.mrb[87].mxu1  ;;  %v6154_v35 = vld [vmem:[%s8317_s4 + $0x128] ss:$16 sps:$4 sm:$0xff]  }
0x11bd   :  { %5981 = vrot.lane.b32.xlu1 %v5980_v31, %s6510_s11 }
0x11dc   :  { %v5957_v19 = vpop.permute.xlu0 %5956 }
0x11dd   :  { %v5959_v0 = vunpack.i.h.bf16 %v5957_v19  ;;  %v5958_v30 = vunpack.i.l.bf16 %v5957_v19 }
0x11df   :  { %v3293_v4 = vsel %vm403_vm1, %v7633_v62, %v5959_v0  ;;  %v3292_v11 = vsel %vm403_vm1, %v7631_v16, %v5958_v30 }
0x11e6   :  { %v5962_v53 = vpop.permute.xlu1 %5961 }
0x11e7   :  { %v5964_v57 = vunpack.i.h.bf16 %v5962_v53  ;;  %v5963_v52 = vunpack.i.l.bf16 %v5962_v53 }
0x11e9   :  { %v3295_v54 = vsel %vm911_vm5, %v3293_v4, %v5964_v57  ;;  %v3294_v61 = vsel %vm911_vm5, %v3292_v11, %v5963_v52 }
0x11ee   :  { %v5967_v60 = vpop.permute.xlu1 %5966 }
0x11ef   :  { %v5969_v1 = vunpack.i.h.bf16 %v5967_v60  ;;  %v5968_v36 = vunpack.i.l.bf16 %v5967_v60 }
0x11f1   :  { %v3296_v27 = vsel %vm914_vm6, %v3294_v61, %v5968_v36  ;;  %v3297_v33 = vsel %vm914_vm6, %v3295_v54, %v5969_v1 }
0x11f2   :  { %v3808_v29 = vpack.c.bf16 %v3297_v33, %v3296_v27  ;;  %v6159_v33 = vld [vmem:[%s8317_s4 + $0x144] ss:$16 sps:$4 sm:$0xff]  }
0x11f4   :  { %5889 = vmatprep.mubr.bf16.mxu0 %v3808_v29  ;;  %v6162_v29 = vld [vmem:[%s8317_s4 + $0x14c] ss:$16 sps:$4 sm:$0xff]  }
0x1206   :  { %v5972_v25 = vpop.permute.xlu0 %5971 }
0x1207   :  { %v5974_v41 = vunpack.i.h.bf16 %v5972_v25  ;;  %v5973_v43 = vunpack.i.l.bf16 %v5972_v25  ;;  %v6157_v25 = vld [vmem:[%s8317_s4 + $0x140] ss:$16 sps:$4 sm:$0xff]  }
0x1209   :  { %v3803_v16 = vsel %vm403_vm1, %v7833_v49, %v5974_v41  ;;  %v3802_v32 = vsel %vm403_vm1, %v7831_v47, %v5973_v43  ;;  %v3830_v49 = vrot.slane %v7543_v10, %v1447_v3  ;;  %v6145_v3 = vld [vmem:[%s8317_s4 + $0x100] ss:$16 sps:$4 sm:$0xff]   ;;  %v6156_v10 = vld [vmem:[%s8317_s4 + $0x12c] ss:$16 sps:$4 sm:$0xff]   ;;  %v6165_v41 = vld [vmem:[%s8317_s4 + $0x164] ss:$16 sps:$4 sm:$0xff]  }
0x120a   :  { %v6168_v43 = vld [vmem:[%s8317_s4 + $0x16c] ss:$16 sps:$4 sm:$0xff]  }
0x1227   :  { %v5977_v21 = vpop.permute.xlu0 %5976 }
0x1228   :  { %v5979_v62 = vunpack.i.h.bf16 %v5977_v21  ;;  %v5978_v51 = vunpack.i.l.bf16 %v5977_v21  ;;  %v6160_v21 = vld [vmem:[%s8317_s4 + $0x148] ss:$16 sps:$4 sm:$0xff]  }
0x122a   :  { %v3805_v6 = vsel %vm911_vm5, %v3803_v16, %v5979_v62  ;;  %v3804_v38 = vsel %vm911_vm5, %v3802_v32, %v5978_v51  ;;  %v6163_v62 = vld [vmem:[%s8317_s4 + $0x160] ss:$16 sps:$4 sm:$0xff]   ;;  %v6166_v51 = vld [vmem:[%s8317_s4 + $0x168] ss:$16 sps:$4 sm:$0xff]   ;;  %v6174_v16 = vld [vmem:[%s8317_s4 + $0x18c] ss:$16 sps:$4 sm:$0xff]  }
0x122b   :  { %v6169_v32 = vld [vmem:[%s8317_s4 + $0x180] ss:$16 sps:$4 sm:$0xff]  }
0x122f   :  { %v5982_v63 = vpop.permute.xlu1 %5981 }
0x1230   :  { %v5984_v14 = vunpack.i.h.bf16 %v5982_v63  ;;  %v5983_v22 = vunpack.i.l.bf16 %v5982_v63  ;;  %v6171_v63 = vld [vmem:[%s8317_s4 + $0x184] ss:$16 sps:$4 sm:$0xff]  }
0x1232   :  { %v3807_v48 = vsel %vm914_vm6, %v3805_v6, %v5984_v14  ;;  %v3806_v12 = vsel %vm914_vm6, %v3804_v38, %v5983_v22  ;;  %v6172_v14 = vld [vmem:[%s8317_s4 + $0x188] ss:$16 sps:$4 sm:$0xff]   ;;  %v6175_v22 = vld [vmem:[%s8317_s4 + $0x1a0] ss:$16 sps:$4 sm:$0xff]   ;;  %v6177_v6 = vld [vmem:[%s8317_s4 + $0x1a4] ss:$16 sps:$4 sm:$0xff]  }
0x1233   :  { %v3809_v46 = vpack.c.bf16 %v3807_v48, %v3806_v12  ;;  %v6178_v38 = vld [vmem:[%s8317_s4 + $0x1a8] ss:$16 sps:$4 sm:$0xff]   ;;  %v6180_v48 = vld [vmem:[%s8317_s4 + $0x1ac] ss:$16 sps:$4 sm:$0xff]   ;;  %v6183_v12 = vld [vmem:[%s8317_s4 + $0x1c4] ss:$16 sps:$4 sm:$0xff]  }
0x1235   :  { %5890 = vmatmul.mubr.bf16.vlgmr.msra.gmra.mrb[100].mxu0 %v3809_v46  ;;  %v6186_v46 = vld [vmem:[%s8317_s4 + $0x1cc] ss:$16 sps:$4 sm:$0xff]  }
0x1236   :  { %4288 = vmatprep.mubr.bf16.mxu0 %v6507_v39 }
0x1308   :  { %v5891_v55 = vpop.f32.mrb[100].mxu0 }
0x1309   :  { %v3913_v47 = vpop.f32.mrb[101].mxu0  ;;  %v3922_v56 = vadd.f32 %v5891_v55, %v3830_v49  ;;  %v6184_v55 = vld [vmem:[%s8317_s4 + $0x1c8] ss:$16 sps:$4 sm:$0xff]  }
0x130a   :  { %v3914_v2 = vadd.f32 %v3913_v47, %v3830_v49  ;;  %v5892_v28 = vpop.f32.mrb[102].mxu0  ;;  %v6189_v47 = vld [vmem:[%s8317_s4 + $0x1e4] ss:$16 sps:$4 sm:$0xff]  }
0x130b   :  { %v3916_v37 = vpop.f32.mrb[103].mxu0  ;;  %v3930_v59 = vadd.f32 %v3922_v56, %v7530_v40  ;;  %v3925_v8 = vadd.f32 %v5892_v28, %v3830_v49  ;;  %v6150_v40 = vld [vmem:[%s8317_s4 + $0x10c] ss:$16 sps:$4 sm:$0xff]   ;;  %v6187_v28 = vld [vmem:[%s8317_s4 + $0x1e0] ss:$16 sps:$4 sm:$0xff]  }
0x130c   :  { %v3928_v9 = vadd.f32 %v3914_v2, %v7504_v17  ;;  %v3917_v58 = vadd.f32 %v3916_v37, %v3830_v49  ;;  %v6147_v17 = vld [vmem:[%s8317_s4 + $0x104] ss:$16 sps:$4 sm:$0xff]   ;;  %4256 = vmatprep.subr.bf16.mxu0 %v6150_v40  ;;  %v6181_v49 = vld [vmem:[%s8317_s4 + $0x1c0] ss:$16 sps:$4 sm:$0xff]   ;;  %v6192_v2 = vld [vmem:[%s8317_s4 + $0x1ec] ss:$16 sps:$4 sm:$0xff]  }
0x130d   :  { %v3931_v18 = vadd.f32 %v3925_v8, %v7532_v45  ;;  %v6153_v45 = vld [vmem:[%s8317_s4 + $0x124] ss:$16 sps:$4 sm:$0xff]   ;;  %4203 = vmatprep.subr.bf16.mxu1 %v6147_v17  ;;  %v6190_v37 = vld [vmem:[%s8317_s4 + $0x1e8] ss:$16 sps:$4 sm:$0xff]  }
0x130e   :  { %v3929_v7 = vadd.f32 %v3917_v58, %v7506_v34  ;;  %3932 = vadd.xlane.f32.xlu0 %v3928_v9  ;;  %v6148_v34 = vld [vmem:[%s8317_s4 + $0x108] ss:$16 sps:$4 sm:$0xff]   ;;  %4204 = vmatpush1.bf16.msra.mxu1 %v6145_v3 }
0x130f   :  { %4257 = vmatpush1.bf16.msra.mxu0 %v6148_v34  ;;  %4205 = vmatprep.subr.bf16.mxu1 %v6153_v45 }
0x1310   :  { %3934 = vadd.xlane.f32.xlu1 %v3929_v7  ;;  %4258 = vmatprep.subr.bf16.mxu0 %v6156_v10  ;;  %v8001_v10 = vld [vmem:[%s8319_s6 + $0x20] sm:$0xff] }
0x1312   :  { %3936 = vadd.xlane.f32.xlu0 %v3930_v59  ;;  %4206 = vmatpush1.bf16.msra.mxu1 %v6151_v50  ;;  %v3979_v50 = vrot.slane %v8001_v10, %v1596_v42 }
0x1313   :  { %4259 = vmatpush1.bf16.msra.mxu0 %v6154_v35  ;;  %4207 = vmatprep.subr.bf16.mxu1 %v6159_v33 }
0x1314   :  { %4260 = vmatprep.subr.bf16.mxu0 %v6162_v29 }
0x1316   :  { %3938 = vadd.xlane.f32.xlu0 %v3931_v18  ;;  %4208 = vmatpush1.bf16.msra.mxu1 %v6157_v25  ;;  %v6195_v25 = vld [vmem:[%s8318_s5 + $0x100] sm:$0xff]  }
0x1317   :  { %4261 = vmatpush1.bf16.msra.mxu0 %v6160_v21  ;;  %4209 = vmatprep.subr.bf16.mxu1 %v6165_v41  ;;  %v6197_v21 = vld [vmem:[%s8318_s5 + $0x148] sm:$0xff]  }
0x1318   :  { %4262 = vmatprep.subr.bf16.mxu0 %v6168_v43  ;;  %v6198_v41 = vld [vmem:[%s8318_s5 + $0x1c8] sm:$0xff]  }
0x1319   :  { %v6199_v43 = vld [vmem:[%s8318_s5 + $0x108] sm:$0xff]  }
0x131a   :  { %4210 = vmatpush1.bf16.msra.mxu1 %v6163_v62  ;;  %v6200_v62 = vld [vmem:[%s8318_s5 + $0x188] sm:$0xff]  }
0x131b   :  { %4263 = vmatpush1.bf16.msra.mxu0 %v6166_v51  ;;  %4211 = vmatprep.subr.bf16.mxu1 %v6171_v63  ;;  %v6201_v51 = vld [vmem:[%s8318_s5 + $0x150] sm:$0xff]  }
0x131c   :  { %4264 = vmatprep.subr.bf16.mxu0 %v6174_v16  ;;  %v6202_v63 = vld [vmem:[%s8318_s5 + $0x1d0] sm:$0xff]  }
0x131d   :  { %v6203_v16 = vld [vmem:[%s8318_s5 + $0x110] sm:$0xff]  }
0x131e   :  { %4212 = vmatpush1.bf16.msra.mxu1 %v6169_v32  ;;  %v6204_v32 = vld [vmem:[%s8318_s5 + $0x190] sm:$0xff]  }
0x131f   :  { %4265 = vmatpush1.bf16.msra.mxu0 %v6172_v14  ;;  %4213 = vmatprep.subr.bf16.mxu1 %v6177_v6  ;;  %v6205_v14 = vld [vmem:[%s8318_s5 + $0x158] sm:$0xff]  }
0x1320   :  { %4266 = vmatprep.subr.bf16.mxu0 %v6180_v48  ;;  %v6207_v6 = vld [vmem:[%s8318_s5 + $0x118] sm:$0xff]   ;;  %v6209_v48 = vld [vmem:[%s8318_s5 + $0x160] sm:$0xff]  }
0x1322   :  { %4214 = vmatpush1.bf16.msra.mxu1 %v6175_v22  ;;  %v6206_v22 = vld [vmem:[%s8318_s5 + $0x1d8] sm:$0xff]  }
0x1323   :  { %4267 = vmatpush1.bf16.msra.mxu0 %v6178_v38  ;;  %4215 = vmatprep.subr.bf16.mxu1 %v6183_v12  ;;  %v6208_v38 = vld [vmem:[%s8318_s5 + $0x198] sm:$0xff]   ;;  %v6210_v12 = vld [vmem:[%s8318_s5 + $0x1e0] sm:$0xff]  }
0x1324   :  { %4268 = vmatprep.subr.bf16.mxu0 %v6186_v46  ;;  %v6211_v46 = vld [vmem:[%s8318_s5 + $0x120] sm:$0xff]  }
0x1326   :  { %4216 = vmatpush1.bf16.msra.mxu1 %v6181_v49  ;;  %v6212_v49 = vld [vmem:[%s8318_s5 + $0x1a0] sm:$0xff]  }
0x1327   :  { %4269 = vmatpush1.bf16.msra.mxu0 %v6184_v55  ;;  %4217 = vmatprep.subr.bf16.mxu1 %v6189_v47  ;;  %v6213_v55 = vld [vmem:[%s8318_s5 + $0x168] sm:$0xff]  }
0x1328   :  { %4270 = vmatprep.subr.bf16.mxu0 %v6192_v2  ;;  %v6214_v47 = vld [vmem:[%s8318_s5 + $0x1e8] sm:$0xff]  }
0x1329   :  { %v6215_v2 = vld [vmem:[%s8318_s5 + $0x128] sm:$0xff]  }
0x132a   :  { %4218 = vmatpush1.bf16.msra.mxu1 %v6187_v28  ;;  %v6216_v28 = vld [vmem:[%s8318_s5 + $0x1a8] sm:$0xff]  }
0x132b   :  { %4271 = vmatpush1.bf16.msra.mxu0 %v6190_v37  ;;  %v6217_v37 = vld [vmem:[%s8318_s5 + $0x170] sm:$0xff]  }
0x139b   :  { %v3933_v31 = vpop.xlane.xlu0 %3932 }
0x139c   :  { %v3940_v24 = vmul.f32 0.0078125, %v3933_v31 }
0x139d   :  { %v3935_v19 = vpop.xlane.xlu1 %3934 }
0x139e   :  { %v7910_v53 = vsub.f32 %v3928_v9, %v3940_v24  ;;  %v3941_v0 = vmul.f32 0.0078125, %v3935_v19 }
0x139f   :  { %v3937_v30 = vpop.xlane.xlu0 %3936 }
0x13a0   :  { %v7912_v57 = vsub.f32 %v3929_v7, %v3941_v0  ;;  %v3942_v52 = vmul.f32 0.0078125, %v3937_v30  ;;  %v3948_v60 = vmul.f32 %v7910_v53, %v7910_v53  ;;  %v3987_v30 = vrot.slane %v8001_v10, %v1604_v5 }
0x13a2   :  { %v7916_v4 = vsub.f32 %v3930_v59, %v3942_v52  ;;  %3952 = vadd.xlane.f32.xlu0 %v3948_v60  ;;  %v3949_v11 = vmul.f32 %v7912_v57, %v7912_v57 }
0x13a3   :  { %v3939_v1 = vpop.xlane.xlu0 %3938 }
0x13a4   :  { %v3943_v36 = vmul.f32 0.0078125, %v3939_v1  ;;  %3954 = vadd.xlane.f32.xlu1 %v3949_v11  ;;  %v3950_v54 = vmul.f32 %v7916_v4, %v7916_v4 }
0x13a6   :  { %v7922_v61 = vsub.f32 %v3931_v18, %v3943_v36  ;;  %3956 = vadd.xlane.f32.xlu0 %v3950_v54 }
0x13a8   :  { %v3951_v27 = vmul.f32 %v7922_v61, %v7922_v61 }
0x13aa   :  { %3958 = vadd.xlane.f32.xlu1 %v3951_v27 }
0x142f   :  { %v3953_v56 = vpop.xlane.xlu0 %3952 }
0x1430   :  { %v3960_v9 = vmul.f32 0.0078125, %v3953_v56  ;;  %v6218_v56 = vld [vmem:[%s8318_s5 + $0x1f0] sm:$0xff]  }
0x1431   :  { %v3955_v58 = vpop.xlane.xlu1 %3954 }
0x1432   :  { %v3964_v7 = vadd.f32 1e-12, %v3960_v9  ;;  %v3961_v59 = vmul.f32 0.0078125, %v3955_v58  ;;  %v6219_v9 = vld [vmem:[%s8318_s5 + $0x130] sm:$0xff]  }
0x1433   :  { %v3957_v8 = vpop.xlane.xlu0 %3956  ;;  %v6220_v58 = vld [vmem:[%s8318_s5 + $0x1b0] sm:$0xff]  }
0x1434   :  { %6417 = vrsqrt.f32 %v3964_v7  ;;  %v3965_v18 = vadd.f32 1e-12, %v3961_v59  ;;  %v3962_v3 = vmul.f32 0.0078125, %v3957_v8  ;;  %v6221_v7 = vld [vmem:[%s8318_s5 + $0x178] sm:$0xff]  }
0x1435   :  { %v6222_v59 = vld [vmem:[%s8318_s5 + $0x1f8] sm:$0xff]  }
0x1436   :  { %6419 = vrsqrt.f32 %v3965_v18  ;;  %v3966_v17 = vadd.f32 1e-12, %v3962_v3  ;;  %v6223_v8 = vld [vmem:[%s8318_s5 + $0x138] sm:$0xff]   ;;  %v8120_v3 = vrot.slane %v8001_v10, %v7304_v26 }
0x1437   :  { %v3959_v34 = vpop.xlane.xlu1 %3958  ;;  %v6224_v18 = vld [vmem:[%s8318_s5 + $0x1b8] sm:$0xff]  }
0x1438   :  { %6421 = vrsqrt.f32 %v3966_v17  ;;  %v3963_v40 = vmul.f32 0.0078125, %v3959_v34  ;;  %v6466_v17 = vld [vmem:[%s8319_s6 + $0x30] sm:$0xff] }
0x1439   :  { %v8126_v34 = vrot.slane %v6466_v17, %v7304_v26 }
0x143a   :  { %v3967_v45 = vadd.f32 1e-12, %v3963_v40  ;;  %v5128_v40 = vld [vmem:[%s8319_s6 + $0x38] sm:$0xff] }
0x143c   :  { %6423 = vrsqrt.f32 %v3967_v45 }
0x143e   :  { %v6418_v35 = vpop.eup %6417 }
0x143f   :  { %v3972_v31 = vmul.f32 %v6418_v35, %v7910_v53  ;;  %v6467_v35 = vld [vmem:[%s8319_s6 + $0x28] sm:$0xff] }
0x1440   :  { %v6420_v24 = vpop.eup %6419 }
0x1441   :  { %v3973_v19 = vmul.f32 %v6420_v24, %v7912_v57  ;;  %v3980_v0 = vmul.f32 %v3979_v50, %v3972_v31  ;;  %v8135_v31 = vrot.slane %v6467_v35, %v7304_v26 }
0x1442   :  { %v6422_v52 = vpop.eup %6421 }
0x1443   :  { %v3981_v60 = vmul.f32 %v3979_v50, %v3973_v19  ;;  %v8011_v11 = vadd.f32 %v3987_v30, %v3980_v0  ;;  %v3974_v36 = vmul.f32 %v6422_v52, %v7916_v4  ;;  %v6193_v4 = vld [vmem:[%s8318_s5 + $0x140] sm:$0xff]   ;;  %v8140_v52 = vrot.slane %v5128_v40, %v7304_v26 }
0x1444   :  { %5556 = vmatprep.subr.bf16.mxu1 %v6193_v4 }
0x1445   :  { %v3989_v1 = vadd.f32 %v3987_v30, %v3981_v60  ;;  %v3982_v57 = vmul.f32 %v3979_v50, %v3974_v36 }
0x1446   :  { %v6424_v54 = vpop.eup %6423 }
0x1447   :  { %v3992_v42 = vpack.c.bf16 %v3989_v1, %v8011_v11  ;;  %v3975_v53 = vmul.f32 %v6424_v54, %v7922_v61  ;;  %v8018_v33 = vadd.f32 %v3987_v30, %v3982_v57  ;;  %v6194_v61 = vld [vmem:[%s8318_s5 + $0x1c0] sm:$0xff]  }
0x1448   :  { %5584 = vmatprep.subr.bf16.mxu0 %v6194_v61 }
0x1449   :  { %4236 = vmatmul.mubr.bf16.vlgmr.msra.gmra.mrb[88].mxu1 %v3992_v42  ;;  %4289 = vmatmul.mubr.bf16.vlgmr.msra.gmra.mrb[104].mxu0 %v3992_v42  ;;  %v3983_v27 = vmul.f32 %v3979_v50, %v3975_v53 }
0x144a   :  { %4245 = vmatprep.mubr.bf16.mxu1 %v6507_v39  ;;  %4298 = vmatprep.mubr.bf16.mxu0 %v6507_v39  ;;  %v6196_v39 = vld [vmem:[%s8318_s5 + $0x180] sm:$0xff]  }
0x144b   :  { %v3991_v5 = vadd.f32 %v3987_v30, %v3983_v27  ;;  %5557 = vmatpush3.bf16.msra.mxu1 %v6195_v25  ;;  %5585 = vmatpush3.bf16.msra.mxu0 %v6196_v39 }
0x144c   :  { %5558 = vmatprep.subr.bf16.mxu1 %v6197_v21  ;;  %5586 = vmatprep.subr.bf16.mxu0 %v6198_v41 }
0x144d   :  { %v3993_v29 = vpack.c.bf16 %v3991_v5, %v8018_v33 }
0x144f   :  { %5559 = vmatpush3.bf16.msra.mxu1 %v6199_v43  ;;  %5587 = vmatpush3.bf16.msra.mxu0 %v6200_v62 }
0x1450   :  { %5560 = vmatprep.subr.bf16.mxu1 %v6201_v51  ;;  %5588 = vmatprep.subr.bf16.mxu0 %v6202_v63 }
0x1451   :  { %4246 = vmatmul.mubr.bf16.gmra.mrb[92].mxu1 %v3993_v29  ;;  %4299 = vmatmul.mubr.bf16.gmra.mrb[108].mxu0 %v3993_v29 }
0x1453   :  { %5561 = vmatpush3.bf16.msra.mxu1 %v6203_v16  ;;  %5589 = vmatpush3.bf16.msra.mxu0 %v6204_v32 }
0x1454   :  { %5562 = vmatprep.subr.bf16.mxu1 %v6205_v14  ;;  %5590 = vmatprep.subr.bf16.mxu0 %v6206_v22 }
0x1457   :  { %5563 = vmatpush3.bf16.msra.mxu1 %v6207_v6  ;;  %5591 = vmatpush3.bf16.msra.mxu0 %v6208_v38 }
0x1458   :  { %5564 = vmatprep.subr.bf16.mxu1 %v6209_v48  ;;  %5592 = vmatprep.subr.bf16.mxu0 %v6210_v12 }
0x145b   :  { %5565 = vmatpush3.bf16.msra.mxu1 %v6211_v46  ;;  %5593 = vmatpush3.bf16.msra.mxu0 %v6212_v49 }
0x145c   :  { %5566 = vmatprep.subr.bf16.mxu1 %v6213_v55  ;;  %5594 = vmatprep.subr.bf16.mxu0 %v6214_v47 }
0x145f   :  { %5567 = vmatpush3.bf16.msra.mxu1 %v6215_v2  ;;  %5595 = vmatpush3.bf16.msra.mxu0 %v6216_v28 }
0x1460   :  { %5568 = vmatprep.subr.bf16.mxu1 %v6217_v37  ;;  %5596 = vmatprep.subr.bf16.mxu0 %v6218_v56 }
0x1463   :  { %5569 = vmatpush3.bf16.msra.mxu1 %v6219_v9  ;;  %5597 = vmatpush3.bf16.msra.mxu0 %v6220_v58 }
0x1464   :  { %5570 = vmatprep.subr.bf16.mxu1 %v6221_v7  ;;  %5598 = vmatprep.subr.bf16.mxu0 %v6222_v59 }
0x1467   :  { %5571 = vmatpush3.bf16.msra.mxu1 %v6223_v8  ;;  %5599 = vmatpush3.bf16.msra.mxu0 %v6224_v18 }
0x1468   :  { %5893 = vmatprep.subr.bf16.mxu1 %v6508_v13 }
0x151c   :  { %v4237_v45 = vpop.f32.mrb[88].mxu1  ;;  %v4290_v50 = vpop.f32.mrb[104].mxu0 }
0x151d   :  { %v4238_v24 = vadd.f32 %v4237_v45, %v8120_v3  ;;  %v4291_v19 = vadd.f32 %v4290_v50, %v8126_v34  ;;  %v4239_v0 = vpop.f32.mrb[89].mxu1  ;;  %v4292_v30 = vpop.f32.mrb[105].mxu0 }
0x151e   :  { %v4241_v60 = vpop.f32.mrb[90].mxu1  ;;  %v4294_v1 = vpop.f32.mrb[106].mxu0  ;;  %v8143_v42 = vadd.f32 %v4239_v0, %v8135_v31  ;;  %v8153_v26 = vadd.f32 %v4292_v30, %v8140_v52 }
0x151f   :  { %v4325_v36 = vmul.f32 0.044715, %v4238_v24  ;;  %v4327_v54 = vmul.f32 0.044715, %v4291_v19  ;;  %v4242_v53 = vadd.f32 %v4241_v60, %v8120_v3  ;;  %v8147_v57 = vadd.f32 %v4294_v1, %v8126_v34  ;;  %v4243_v27 = vpop.f32.mrb[91].mxu1  ;;  %v4296_v5 = vpop.f32.mrb[107].mxu0 }
0x1520   :  { %v8150_v61 = vadd.f32 %v4243_v27, %v8135_v31  ;;  %v8156_v39 = vadd.f32 %v4296_v5, %v8140_v52  ;;  %v8158_v21 = vmul.f32 0.5, %v4238_v24  ;;  %v4326_v51 = vmul.f32 0.044715, %v8143_v42 }
0x1521   :  { %v4341_v29 = vmul.f32 %v4325_v36, %v4238_v24  ;;  %v4343_v4 = vmul.f32 %v4327_v54, %v4291_v19  ;;  %v4329_v25 = vmul.f32 0.044715, %v4242_v53  ;;  %v4331_v62 = vmul.f32 0.044715, %v8147_v57 }
0x1522   :  { %v4330_v16 = vmul.f32 0.044715, %v8150_v61  ;;  %v8163_v6 = vmul.f32 0.5, %v4291_v19  ;;  %v4328_v49 = vmul.f32 0.044715, %v8153_v26  ;;  %v4342_v8 = vmul.f32 %v4326_v51, %v8143_v42 }
0x1523   :  { %v4357_v41 = vmul.f32 %v4341_v29, %v4238_v24  ;;  %v4359_v43 = vmul.f32 %v4343_v4, %v4291_v19  ;;  %v4345_v63 = vmul.f32 %v4329_v25, %v4242_v53  ;;  %v4347_v48 = vmul.f32 %v4331_v62, %v8147_v57 }
0x1524   :  { %v4247_v32 = vpop.f32.mrb[92].mxu1  ;;  %v4300_v14 = vpop.f32.mrb[108].mxu0  ;;  %v4332_v47 = vmul.f32 0.044715, %v8156_v39  ;;  %v4346_v17 = vmul.f32 %v4330_v16, %v8150_v61  ;;  %v4358_v54 = vmul.f32 %v4342_v8, %v8143_v42 }
0x1525   :  { %v4373_v22 = vadd.f32 %v4357_v41, %v4238_v24  ;;  %v4375_v38 = vadd.f32 %v4359_v43, %v4291_v19  ;;  %v4249_v12 = vpop.f32.mrb[93].mxu1  ;;  %v4302_v46 = vpop.f32.mrb[109].mxu0  ;;  %v4361_v55 = vmul.f32 %v4345_v63, %v4242_v53  ;;  %v8169_v2 = vadd.f32 %v4247_v32, %v8120_v3 }
0x1526   :  { %v4251_v28 = vpop.f32.mrb[94].mxu1  ;;  %v4304_v37 = vpop.f32.mrb[110].mxu0  ;;  %v4363_v58 = vmul.f32 %v4347_v48, %v8147_v57  ;;  %v8175_v40 = vadd.f32 %v4300_v14, %v8126_v34  ;;  %v8180_v35 = vadd.f32 %v4249_v12, %v8135_v31  ;;  %v4344_v24 = vmul.f32 %v4328_v49, %v8153_v26 }
0x1527   :  { %v4389_v56 = vmul.f32 0.7978846, %v4373_v22  ;;  %v4391_v9 = vmul.f32 0.7978846, %v4375_v38  ;;  %v4253_v7 = vpop.f32.mrb[95].mxu1  ;;  %v4306_v59 = vpop.f32.mrb[111].mxu0  ;;  %v4377_v18 = vadd.f32 %v4361_v55, %v4242_v53  ;;  %v4348_v0 = vmul.f32 %v4332_v47, %v8156_v39 }
0x1528   :  { %v4379_v45 = vadd.f32 %v4363_v58, %v8147_v57  ;;  %v4333_v50 = vmul.f32 0.044715, %v8169_v2  ;;  %v4334_v60 = vmul.f32 0.044715, %v8180_v35  ;;  %v8186_v1 = vadd.f32 %v4302_v46, %v8140_v52 }
0x1529   :  { %6425 = vtanh.f32 %v4389_v56  ;;  %v4393_v19 = vmul.f32 0.7978846, %v4377_v18  ;;  %v8189_v36 = vadd.f32 %v4251_v28, %v8120_v3  ;;  %v4362_v27 = vmul.f32 %v4346_v17, %v8150_v61 }
0x152a   :  { %6427 = vtanh.f32 %v4391_v9  ;;  %v4395_v30 = vmul.f32 0.7978846, %v4379_v45  ;;  %v8194_v5 = vadd.f32 %v4304_v37, %v8126_v34  ;;  %v4349_v29 = vmul.f32 %v4333_v50, %v8169_v2 }
0x152b   :  { %6429 = vtanh.f32 %v4393_v19  ;;  %v4335_v4 = vmul.f32 0.044715, %v8175_v40  ;;  %v4336_v25 = vmul.f32 0.044715, %v8186_v1  ;;  %v4313_v41 = vmul.f32 0.5, %v4242_v53 }
0x152c   :  { %6431 = vtanh.f32 %v4395_v30  ;;  %v4350_v43 = vmul.f32 %v4334_v60, %v8180_v35  ;;  %v8201_v3 = vadd.f32 %v4253_v7, %v8135_v31  ;;  %v8204_v62 = vadd.f32 %v4306_v59, %v8140_v52 }
0x152d   :  { %v4360_v51 = vmul.f32 %v4344_v24, %v8153_v26  ;;  %v4364_v34 = vmul.f32 %v4348_v0, %v8156_v39  ;;  %v4337_v63 = vmul.f32 0.044715, %v8189_v36  ;;  %v4339_v16 = vmul.f32 0.044715, %v8194_v5 }
0x152e   :  { %v4352_v32 = vmul.f32 %v4336_v25, %v8186_v1  ;;  %v4338_v53 = vmul.f32 0.044715, %v8201_v3  ;;  %v4340_v14 = vmul.f32 0.044715, %v8204_v62  ;;  %v4374_v31 = vadd.f32 %v4358_v54, %v8143_v42 }
0x152f   :  { %v4315_v22 = vmul.f32 0.5, %v8147_v57  ;;  %v4365_v52 = vmul.f32 %v4349_v29, %v8169_v2  ;;  %v4351_v38 = vmul.f32 %v4335_v4, %v8175_v40  ;;  %v4378_v48 = vadd.f32 %v4362_v27, %v8150_v61 }
0x1530   :  { %v4366_v12 = vmul.f32 %v4350_v43, %v8180_v35  ;;  %v4354_v46 = vmul.f32 %v4338_v53, %v8201_v3  ;;  %v4356_v49 = vmul.f32 %v4340_v14, %v8204_v62  ;;  %v4390_v55 = vmul.f32 0.7978846, %v4374_v31 }
0x1531   :  { %v4353_v28 = vmul.f32 %v4337_v63, %v8189_v36  ;;  %v4394_v37 = vmul.f32 0.7978846, %v4378_v48  ;;  %v4376_v56 = vadd.f32 %v4360_v51, %v8153_v26  ;;  %v4380_v57 = vadd.f32 %v4364_v34, %v8156_v39 }
0x1532   :  { %v4368_v58 = vmul.f32 %v4352_v32, %v8186_v1  ;;  %v4355_v7 = vmul.f32 %v4339_v16, %v8194_v5  ;;  %v4370_v59 = vmul.f32 %v4354_v46, %v8201_v3  ;;  %6433 = vtanh.f32 %v4390_v55 }
0x1533   :  { %v6426_v47 = vpop.eup %6425  ;;  %6435 = vtanh.f32 %v4394_v37  ;;  %v4392_v8 = vmul.f32 0.7978846, %v4376_v56  ;;  %v4396_v18 = vmul.f32 0.7978846, %v4380_v57  ;;  %v4367_v50 = vmul.f32 %v4351_v38, %v8175_v40 }
0x1534   :  { %v6428_v9 = vpop.eup %6427  ;;  %v4421_v17 = vadd.f32 1.0, %v6426_v47  ;;  %v4372_v24 = vmul.f32 %v4356_v49, %v8204_v62  ;;  %v4382_v0 = vadd.f32 %v4366_v12, %v8180_v35  ;;  %v4369_v60 = vmul.f32 %v4353_v28, %v8189_v36 }
0x1535   :  { %v6430_v45 = vpop.eup %6429  ;;  %v4423_v19 = vadd.f32 1.0, %v6428_v9  ;;  %6437 = vtanh.f32 %v4392_v8  ;;  %v4386_v27 = vadd.f32 %v4370_v59, %v8201_v3  ;;  %v4371_v29 = vmul.f32 %v4355_v7, %v8194_v5 }
0x1536   :  { %v6432_v30 = vpop.eup %6431  ;;  %v4425_v54 = vadd.f32 1.0, %v6430_v45  ;;  %6439 = vtanh.f32 %v4396_v18  ;;  %v4398_v25 = vmul.f32 0.7978846, %v4382_v0  ;;  %v4437_v43 = vmul.f32 %v4421_v17, %v8158_v21 }
0x1537   :  { %v4427_v4 = vadd.f32 1.0, %v6432_v30  ;;  %v4402_v34 = vmul.f32 0.7978846, %v4386_v27  ;;  %v4384_v63 = vadd.f32 %v4368_v58, %v8186_v1  ;;  %v4439_v16 = vmul.f32 %v4423_v19, %v8163_v6 }
0x1538   :  { %v4441_v51 = vmul.f32 %v4425_v54, %v4313_v41  ;;  %6441 = vtanh.f32 %v4398_v25  ;;  %v4388_v53 = vadd.f32 %v4372_v24, %v8204_v62  ;;  %v4381_v12 = vadd.f32 %v4365_v52, %v8169_v2 }
0x1539   :  { %v4443_v32 = vmul.f32 %v4427_v4, %v4315_v22  ;;  %6443 = vtanh.f32 %v4402_v34  ;;  %v4400_v31 = vmul.f32 0.7978846, %v4384_v63  ;;  %v4385_v46 = vadd.f32 %v4369_v60, %v8189_v36 }
0x153a   :  { %v4453_v14 = vpack.c.bf16 %v4441_v51, %v4437_v43  ;;  %v4404_v48 = vmul.f32 0.7978846, %v4388_v53  ;;  %v4383_v21 = vadd.f32 %v4367_v50, %v8175_v40  ;;  %v4397_v49 = vmul.f32 0.7978846, %v4381_v12 }
0x153b   :  { %v4455_v38 = vpack.c.bf16 %v4443_v32, %v4439_v16  ;;  %6445 = vtanh.f32 %v4400_v31  ;;  %v4401_v6 = vmul.f32 0.7978846, %v4385_v46  ;;  %v4387_v22 = vadd.f32 %v4371_v29, %v8194_v5 }
0x153c   :  { %v6434_v41 = vpop.eup %6433  ;;  %6447 = vtanh.f32 %v4404_v48  ;;  %v4310_v47 = vmul.f32 0.5, %v8143_v42  ;;  %v4399_v37 = vmul.f32 0.7978846, %v4383_v21  ;;  %v4314_v56 = vmul.f32 0.5, %v8150_v61 }
0x153d   :  { %v6436_v55 = vpop.eup %6435  ;;  %v4422_v28 = vadd.f32 1.0, %v6434_v41  ;;  %6449 = vtanh.f32 %v4397_v49  ;;  %v4403_v52 = vmul.f32 0.7978846, %v4387_v22  ;;  %v4312_v18 = vmul.f32 0.5, %v8153_v26 }
0x153e   :  { %v4426_v57 = vadd.f32 1.0, %v6436_v55  ;;  %6451 = vtanh.f32 %v4401_v6  ;;  %v4316_v17 = vmul.f32 0.5, %v8156_v39  ;;  %v4318_v30 = vmul.f32 0.5, %v8180_v35 }
0x153f   :  { %v6438_v9 = vpop.eup %6437  ;;  %v4438_v7 = vmul.f32 %v4422_v28, %v4310_v47  ;;  %6453 = vtanh.f32 %v4399_v37  ;;  %v4322_v60 = vmul.f32 0.5, %v8201_v3  ;;  %v4320_v43 = vmul.f32 0.5, %v8186_v1 }
0x1540   :  { %v6440_v58 = vpop.eup %6439  ;;  %v4442_v59 = vmul.f32 %v4426_v57, %v4314_v56  ;;  %v4424_v8 = vadd.f32 1.0, %v6438_v9  ;;  %6455 = vtanh.f32 %v4403_v52  ;;  %v4324_v51 = vmul.f32 0.5, %v8204_v62 }
0x1541   :  { %v4428_v45 = vadd.f32 1.0, %v6440_v58  ;;  %v4321_v48 = vmul.f32 0.5, %v8189_v36  ;;  %v4319_v1 = vmul.f32 0.5, %v8175_v40  ;;  %v4529_v40 = vrot.slane %v8001_v10, %v2144_v20 }
0x1542   :  { %v6442_v42 = vpop.eup %6441  ;;  %v4454_v50 = vpack.c.bf16 %v4442_v59, %v4438_v7  ;;  %v4440_v61 = vmul.f32 %v4424_v8, %v4312_v18 }
0x1543   :  { %v6444_v24 = vpop.eup %6443  ;;  %v4444_v19 = vmul.f32 %v4428_v45, %v4316_v17  ;;  %v4430_v0 = vadd.f32 1.0, %v6442_v42 }
0x1544   :  { %4754 = vmatprep.mubr.bf16.mxu1 %v4454_v50  ;;  %v4434_v54 = vadd.f32 1.0, %v6444_v24 }
0x1545   :  { %v6446_v27 = vpop.eup %6445  ;;  %v4456_v29 = vpack.c.bf16 %v4444_v19, %v4440_v61  ;;  %4755 = vmatmul.mubr.bf16.vlgmr.msra.gmra.mrb[96].mxu1 %v4453_v14  ;;  %v4446_v4 = vmul.f32 %v4430_v0, %v4318_v30  ;;  %v4317_v14 = vmul.f32 0.5, %v8169_v2 }
0x1546   :  { %v6448_v26 = vpop.eup %6447  ;;  %v4450_v39 = vmul.f32 %v4434_v54, %v4322_v60  ;;  %v4432_v25 = vadd.f32 1.0, %v6446_v27 }
0x1547   :  { %4801 = vmatprep.mubr.bf16.mxu0 %v4456_v29  ;;  %v4436_v34 = vadd.f32 1.0, %v6448_v26  ;;  %v6450_v63 = vpop.eup %6449 }
0x1548   :  { %4802 = vmatmul.mubr.bf16.vlgmr.msra.gmra.mrb[112].mxu0 %v4455_v38  ;;  %v4458_v16 = vpack.c.bf16 %v4450_v39, %v4446_v4  ;;  %v6452_v35 = vpop.eup %6451  ;;  %v4448_v32 = vmul.f32 %v4432_v25, %v4320_v43  ;;  %v4429_v53 = vadd.f32 1.0, %v6450_v63  ;;  %v4323_v38 = vmul.f32 0.5, %v8194_v5  ;;  %v6227_v63 = vld [vmem:[%s8321_s8 + $0x10] sm:$0xff]  }
0x1549   :  { %v4452_v3 = vmul.f32 %v4436_v34, %v4324_v51  ;;  %v6454_v31 = vpop.eup %6453  ;;  %v4433_v12 = vadd.f32 1.0, %v6452_v35  ;;  %v6225_v34 = vld [vmem:[%s8321_s8] sm:$0xff]  }
0x154a   :  { %4761 = vmatprep.mubr.bf16.mxu1 %v4458_v16  ;;  %v6456_v46 = vpop.eup %6455  ;;  %v4431_v62 = vadd.f32 1.0, %v6454_v31  ;;  %v4445_v41 = vmul.f32 %v4429_v53, %v4317_v14  ;;  %5894 = vmatpush3.bf16.msra.mxu1 %v6225_v34  ;;  %v6228_v16 = vld [vmem:[%s8321_s8 + $0x18] sm:$0xff]   ;;  %v6229_v35 = vld [vmem:[%s8321_s8 + $0x20] sm:$0xff]  }
0x154b   :  { %v4460_v21 = vpack.c.bf16 %v4452_v3, %v4448_v32  ;;  %v4449_v49 = vmul.f32 %v4433_v12, %v4321_v48  ;;  %v4435_v6 = vadd.f32 1.0, %v6456_v46  ;;  %5895 = vmatprep.subr.bf16.mxu1 %v6508_v13  ;;  %v6230_v32 = vld [vmem:[%s8321_s8 + $0x28] sm:$0xff]   ;;  %v6231_v3 = vld [vmem:[%s8321_s8 + $0x30] sm:$0xff]   ;;  %v6232_v53 = vld [vmem:[%s8321_s8 + $0x38] sm:$0xff]  }
0x154c   :  { %v4447_v55 = vmul.f32 %v4431_v62, %v4319_v1  ;;  %v4843_v62 = vrot.slane %v8001_v10, %v2486_v23  ;;  %v5385_v23 = vld [vmem:[%s8320_s7 + $0x2] ss:$0 sm:$0xff] }
0x154d   :  { %4808 = vmatprep.mubr.bf16.mxu0 %v4460_v21  ;;  %v4457_v22 = vpack.c.bf16 %v4449_v49, %v4445_v41  ;;  %v4451_v47 = vmul.f32 %v4435_v6, %v4323_v38 }
0x154f   :  { %4762 = vmatmul.mubr.bf16.gmra.mrb[100].mxu1 %v4457_v22  ;;  %v4459_v28 = vpack.c.bf16 %v4451_v47, %v4447_v55 }
0x1550   :  { %5909 = vmatprep.mubr.msk.bf16.mxu1 %vm6509_vm0, %v6508_v13 }
0x1551   :  { %4809 = vmatmul.mubr.bf16.gmra.mrb[116].mxu0 %v4459_v28 }
0x1618   :  { %v5572_v2 = vpop.f32.mrb[96].mxu1 }
0x1619   :  { %v5573_v36 = vpop.f32.mrb[97].mxu1 }
0x161a   :  { %v5574_v37 = vadd.f32 %v5573_v36, %v5572_v2  ;;  %v5575_v56 = vpop.f32.mrb[98].mxu1  ;;  %v6514_v36 = vmov 1966171168  }
0x161b   :  { %v5600_v5 = vpop.f32.mrb[112].mxu0  ;;  %v5576_v57 = vpop.f32.mrb[99].mxu1 }
0x161c   :  { %v4757_v52 = vadd.f32 %v5574_v37, %v4529_v40  ;;  %v5601_v9 = vpop.f32.mrb[113].mxu0  ;;  %v4969_v37 = vunpack.c.l.s4 %v6514_v36 }
0x161d   :  { %v5602_v58 = vadd.f32 %v5601_v9, %v5600_v5  ;;  %v5603_v7 = vpop.f32.mrb[114].mxu0 }
0x161e   :  { %v5604_v59 = vpop.f32.mrb[115].mxu0  ;;  %v4970_v56 = vunpack.c.0.s8 %v4969_v37 }
0x161f   :  { %v4804_v8 = vadd.f32 %v5602_v58, %v4757_v52 }
0x1620   :  { %v4973_v5 = vsub.s32 %v4970_v56, %v6702_v15 }
0x1621   :  { %v4816_v18 = vadd.f32 %v4804_v8, %v8011_v11 }
0x1622   :  { %v5578_v17 = vpop.f32.mrb[100].mxu1 }
0x1623   :  { %4818 = vadd.xlane.f32.xlu1 %v4816_v18  ;;  %v5579_v45 = vpop.f32.mrb[101].mxu1 }
0x1624   :  { %v5606_v42 = vpop.f32.mrb[116].mxu0  ;;  %v5580_v50 = vadd.f32 %v5579_v45, %v5578_v17  ;;  %v5581_v24 = vpop.f32.mrb[102].mxu1 }
0x1625   :  { %v5607_v20 = vpop.f32.mrb[117].mxu0  ;;  %v5582_v61 = vpop.f32.mrb[103].mxu1 }
0x1626   :  { %v4764_v19 = vadd.f32 %v5580_v50, %v4529_v40  ;;  %v5608_v0 = vadd.f32 %v5607_v20, %v5606_v42  ;;  %v5609_v30 = vpop.f32.mrb[118].mxu0 }
0x1627   :  { %v5610_v60 = vpop.f32.mrb[119].mxu0 }
0x1628   :  { %v4811_v54 = vadd.f32 %v5608_v0, %v4764_v19 }
0x162a   :  { %v4817_v27 = vadd.f32 %v4811_v54, %v8018_v33  ;;  %v6226_v33 = vld [vmem:[%s8321_s8 + $0x8] sm:$0xff]  }
0x162b   :  { %5896 = vmatpush3.bf16.msra.mxu1 %v6226_v33 }
0x162c   :  { %4820 = vadd.xlane.f32.xlu0 %v4817_v27  ;;  %5897 = vmatprep.subr.bf16.mxu1 %v6508_v13 }
0x162f   :  { %5898 = vmatpush3.bf16.msra.mxu1 %v6227_v63 }
0x1630   :  { %5899 = vmatprep.subr.bf16.mxu1 %v6508_v13 }
0x1633   :  { %5900 = vmatpush3.bf16.msra.mxu1 %v6228_v16 }
0x1634   :  { %5901 = vmatprep.subr.bf16.mxu1 %v6508_v13 }
0x1637   :  { %5902 = vmatpush3.bf16.msra.mxu1 %v6229_v35 }
0x1638   :  { %5903 = vmatprep.subr.bf16.mxu1 %v6508_v13 }
0x163b   :  { %5904 = vmatpush3.bf16.msra.mxu1 %v6230_v32 }
0x163c   :  { %5905 = vmatprep.subr.bf16.mxu1 %v6508_v13 }
0x163f   :  { %5906 = vmatpush3.bf16.msra.mxu1 %v6231_v3 }
0x1640   :  { %5907 = vmatprep.subr.bf16.mxu1 %v6508_v13  ;;  %v4849_v13 = vrot.slane %v8001_v10, %v2494_v44 }
0x1643   :  { %5908 = vmatpush3.bf16.msra.mxu1 %v6232_v53 }
0x16b0   :  { %v4819_v29 = vpop.xlane.xlu1 %4818 }
0x16b1   :  { %v4822_v26 = vmul.f32 0.0078125, %v4819_v29 }
0x16b3   :  { %v4824_v4 = vsub.f32 %v4816_v18, %v4822_v26 }
0x16b5   :  { %v4826_v11 = vmul.f32 %v4824_v4, %v4824_v4 }
0x16b7   :  { %4828 = vadd.xlane.f32.xlu1 %v4826_v11 }
0x16b9   :  { %v4821_v39 = vpop.xlane.xlu0 %4820 }
0x16ba   :  { %v4823_v25 = vmul.f32 0.0078125, %v4821_v39 }
0x16bc   :  { %v4825_v43 = vsub.f32 %v4817_v27, %v4823_v25 }
0x16be   :  { %v4827_v51 = vmul.f32 %v4825_v43, %v4825_v43 }
0x16c0   :  { %4830 = vadd.xlane.f32.xlu0 %v4827_v51 }
0x1744   :  { %v4829_v31 = vpop.xlane.xlu1 %4828 }
0x1745   :  { %v4832_v14 = vmul.f32 0.0078125, %v4829_v31 }
0x1747   :  { %v4834_v48 = vadd.f32 1e-12, %v4832_v14 }
0x1749   :  { %6457 = vrsqrt.f32 %v4834_v48 }
0x174d   :  { %v4831_v12 = vpop.xlane.xlu0 %4830 }
0x174e   :  { %v4833_v46 = vmul.f32 0.0078125, %v4831_v12 }
0x1750   :  { %v4835_v21 = vadd.f32 1e-12, %v4833_v46 }
0x1752   :  { %6459 = vrsqrt.f32 %v4835_v21 }
0x1753   :  { %v6458_v1 = vpop.eup %6457 }
0x1754   :  { %v4838_v41 = vmul.f32 %v6458_v1, %v4824_v4 }
0x1756   :  { %v4844_v6 = vmul.f32 %v4843_v62, %v4838_v41 }
0x1758   :  { %v4850_v47 = vadd.f32 %v4849_v13, %v4844_v6 }
0x175c   :  { %v6460_v49 = vpop.eup %6459 }
0x175d   :  { %v4839_v38 = vmul.f32 %v6460_v49, %v4825_v43 }
0x175f   :  { %v4845_v22 = vmul.f32 %v4843_v62, %v4839_v38 }
0x1761   :  { %v4851_v55 = vadd.f32 %v4849_v13, %v4845_v22 }
0x1763   :  { %v4853_v28 = vrot.slane %v4851_v55, 7 }
0x1765   :  { %v4856_v2 = vsel %vm4855_vm7, %v4850_v47, %v4853_v28 }
0x1766   :  { %v4857_v40 = vpack.c.bf16 %v4856_v2, %v4856_v2 }
0x1768   :  { %5910 = vmatmul.mubr.bf16.vlgmr.msra.gmra.mrb[104].mxu1 %v4857_v40 }
0x183b   :  { %v4961_v57 = vpop.f32.mrb[104].mxu1 }
0x183c   :  { %v4962_v44 = vadd.f32 %v5385_v23, %v4961_v57  ;;  %v5911_v10 = vpop.f32.mrb[105].mxu1 }
0x183d   :  { %v4964_v52 = vpop.f32.mrb[106].mxu1 }
0x183e   :  { %v4974_v9 = vrot.slane %v4962_v44, %v4973_v5  ;;  %v5912_v58 = vpop.f32.mrb[107].mxu1 }
0x1840   :  { %v4975_v7 = vcombine.high %v4974_v9, %v4974_v9  ;;  %5394 = vst.sshfl [vmem:[#allocation4] sm:$0x1 pattern:$0x73625140] %v4974_v9 }
0x1842   :  { %5395 = vst.sshfl [vmem:[#allocation4 + $0x1] sm:$0x1 pattern:$0x73625140] %v4975_v7 }
0x1843   :  { %6491 = shalt.err (!%p6488_p9)
}
0x1844   :  { %s6492_s11 = scalar_lea.hbm %s8322_s9, 32 }
0x1845   :  { %p6493_p10 = scmp.ne.s32.totalorder %s8322_s9, %s6492_s11  ;;  %p6496_p11 = scmp.lt.u32.totalorder %s6492_s11, %s8322_s9 }
0x1847   :  { %p6498_p12 = pnand %p6496_p11, %p6493_p10 }
0x1849   :  { %6501 = shalt.err (!%p6498_p12)
}
0x184a   :  { %s6516_s5 = smov 16   ;;  %s6517_s19 = smov 1  }
0x184b   :  { %5005 = dma.vmem_to_hbm [thread:$0]  %s5000_s13, 32, %s8322_s9, [#allocation5], %s6516_s5, %s6516_s5, %s6517_s19  }
0x184c   :  { %6504 = dma.done.wait [#allocation5], 32  }
0x184d   :  { %6505 = vsyncadd [#allocation5], 4294967264 }
0x184e   :  { %5009 = vsyncpa [#allocation5], 1 }

</bundles_post_ra>
